<compile_context>
chip_gen: v5e
topology: v5e:2x2
jax: 0.10.0
libtpu: 0.0.40
codegen_flags: <defaults>
</compile_context>

<pallas_src>
import functools

import jax
import jax.numpy as jnp
import numpy as np
from jax import lax
from jax.experimental import pallas as pl
from jax.experimental.pallas import tpu as pltpu


# ============================================================================
# Fused forward kernel — one grid step == one batch element, all T timesteps.
# ============================================================================
def _fused_forward_kernel(
    # -------- inputs --------
    x1p_ref,      # (1, T, Hg+2, Wg*C)  H-padded grid obs, lanes = (w, c)
    sbd_ref,      # (1, T*h, T*h)       block-diagonal transposed social state
    h0_ref,       # (1, 1, Hs)
    c0_ref,       # (1, 1, Hs)
    w1b_ref,      # (3, Wg*C,  Wg*32)   conv1 weight, banded over W
    b1r_ref,      # (1, Wg*32)
    w2b_ref,      # (3, Wg*32, Wg*32)   conv2 weight, banded over W
    b2r_ref,      # (1, Wg*32)
    gw1_ref,      # (T*h, 64)           GCN layer1 (X = I => X @ W1, tiled T times)
    gb1_ref, gw2_ref, gb2_ref, gw3_ref, gb3_ref, gwl_ref, gbl_ref,
    fcwc_ref,     # (Hg, Wg*32, fc)     fc1 conv rows, NCHW->NHWC perm folded in
    fcwe_ref,     # (64, fc)            fc1 embedding rows
    fcb_ref,      # (1, fc)
    wih_ref,      # (fc, 4*Hs)
    whh_ref,      # (Hs, 4*Hs)
    lb_ref,       # (1, 4*Hs)
    aw_ref,       # (Hs, num_out)
    ab_ref,       # (1, num_out)
    # -------- outputs --------
    act_ref,      # (1, T, num_out)
    hout_ref,     # (1, 1, Hs)
    cout_ref,     # (1, 1, Hs)
    # -------- scratch --------
    x2s,          # VMEM (T, Hg+2, Wg*32)  H-padded conv2 input
    *, T, Hg, Wg, C, hsoc, Hs,
):
    f32 = jnp.float32

    # ---------------- GNN social embedding (dense block-diagonal GCN) -------
    Th = T * hsoc
    sbd = sbd_ref[0]                                           # (Th, Th)
    ri = lax.broadcasted_iota(jnp.int32, (Th, Th), 0)
    ci = lax.broadcasted_iota(jnp.int32, (Th, Th), 1)
    eye = (ri == ci).astype(f32)
    a_t = ((sbd + eye) >= 1.0).astype(f32)                     # A^T with self loops
    deg = jnp.sum(a_t, axis=1, keepdims=True)                  # (Th, 1) in-degree
    dinv = lax.rsqrt(deg)

    def prop(x):   # D^-1/2 A^T D^-1/2 @ x, using only row scalings (no transpose)
        return dinv * jnp.dot(a_t, dinv * x, preferred_element_type=f32)

    h1 = jnp.maximum(prop(gw1_ref[...]) + gb1_ref[...], 0.0)                # (Th, 64)
    h2 = jnp.maximum(
        prop(jnp.dot(h1, gw2_ref[...], preferred_element_type=f32)) + gb2_ref[...],
        0.0)
    h3 = jnp.maximum(
        prop(jnp.dot(h2, gw3_ref[...], preferred_element_type=f32)) + gb3_ref[...],
        0.0)
    pooled = jnp.mean(h3.reshape(T, hsoc, h3.shape[-1]), axis=1)            # (T, 64)
    emb = jnp.dot(pooled, gwl_ref[...], preferred_element_type=f32) + gbl_ref[...]

    # ---------------- conv encoder (banded-W matmuls, lane-dense) -----------
    WC2 = Wg * 32
    x1 = x1p_ref[0]                                            # (T, Hg+2, Wg*C)
    y1 = jnp.zeros((T * Hg, WC2), f32)
    for dy in range(3):
        lhs = x1[:, dy:dy + Hg, :].reshape(T * Hg, Wg * C)
        y1 = y1 + jnp.dot(lhs, w1b_ref[dy], preferred_element_type=f32)
    y1 = jnp.maximum(y1 + b1r_ref[...], 0.0)                   # (T*Hg, Wg*32)

    # H-pad conv1 output via a VMEM scratch (static ref stores; no jnp.pad).
    zrow = jnp.zeros((T, 1, WC2), f32)
    x2s[:, 0:1, :] = zrow
    x2s[:, Hg + 1:Hg + 2, :] = zrow
    x2s[:, 1:Hg + 1, :] = y1.reshape(T, Hg, WC2)

    y2 = jnp.zeros((T * Hg, WC2), f32)
    for dy in range(3):
        lhs = x2s[:, dy:dy + Hg, :].reshape(T * Hg, WC2)
        y2 = y2 + jnp.dot(lhs, w2b_ref[dy], preferred_element_type=f32)
    y2 = jnp.maximum(y2 + b2r_ref[...], 0.0).reshape(T, Hg, WC2)

    # ---------------- fc1 (+ReLU): NCHW-flatten permutation folded into W ---
    acc = jnp.dot(emb, fcwe_ref[...], preferred_element_type=f32) + fcb_ref[...]
    for hrow in range(Hg):
        acc = acc + jnp.dot(y2[:, hrow, :], fcwc_ref[hrow],
                            preferred_element_type=f32)
    feat = jnp.maximum(acc, 0.0)                               # (T, fc)

    # ---------------- LSTM: x @ W_ih hoisted out of the recurrence ----------
    xg = jnp.dot(feat, wih_ref[...], preferred_element_type=f32) + lb_ref[...]
    h = h0_ref[0].astype(f32)                                  # (1, Hs)
    cst = c0_ref[0].astype(f32)                                # (1, Hs)
    whh = whh_ref[...]
    hs_list = []
    for t in range(T):                                         # T is static & small
        gates = xg[t:t + 1, :] + jnp.dot(h, whh, preferred_element_type=f32)
        # NOTE: 32-lane gate slices; negligible at this width/T.
        ig = jax.nn.sigmoid(gates[:, 0:Hs])
        fg = jax.nn.sigmoid(gates[:, Hs:2 * Hs])
        gg = jnp.tanh(gates[:, 2 * Hs:3 * Hs])
        og = jax.nn.sigmoid(gates[:, 3 * Hs:4 * Hs])
        cst = fg * cst + ig * gg
        h = og * jnp.tanh(cst)
        hs_list.append(h)
    feats = jnp.concatenate(hs_list, axis=0)                   # (T, Hs)

    # ---------------- action head -------------------------------------------
    action = jnp.dot(feats, aw_ref[...], preferred_element_type=f32) + ab_ref[...]
    act_ref[0] = action.astype(act_ref.dtype)
    hout_ref[0] = h.astype(hout_ref.dtype)
    cout_ref[0] = cst.astype(cout_ref.dtype)
    # TODO(synk): select_group / action_mask / player_id branches and
    # value_function() are inactive in this config and not implemented.


# ============================================================================
# Host-side weight preparation (done once): banded conv weights, tiled biases,
# fc1 permutation fold, GNN layer-1 tiling.
# ============================================================================
def prepare_kernel_params(params, *, T, Hg, Wg):
    (w1, b1), (w2, b2), (w3, b3), (wl, bl) = params['gnn']

    def band(w_hwio):
        kh, kw, cin, cout = w_hwio.shape
        w_np = np.asarray(w_hwio)
        wb = np.zeros((kh, Wg * cin, Wg * cout), np.float32)
        for dy in range(kh):
            for wx in range(Wg):
                for dx in range(kw):
                    wi = wx + dx - 1
                    if 0 <= wi < Wg:
                        wb[dy, wi * cin:(wi + 1) * cin,
                           wx * cout:(wx + 1) * cout] = w_np[dy, dx]
        return jnp.asarray(wb)

    c2out = params['conv2_w'].shape[-1]
    emb_dim = wl.shape[0]
    fc_w = params['fc_w']
    fc = fc_w.shape[1]
    # fc1 conv rows: PyTorch NCHW flat order (c, h, w) -> (h, (w, c)) blocks
    fcwc = (fc_w[emb_dim:]
            .reshape(c2out, Hg, Wg, fc)
            .transpose(1, 2, 0, 3)
            .reshape(Hg, Wg * c2out, fc))

    return dict(
        w1b=band(params['conv1_w']),
        b1r=jnp.tile(params['conv1_b'].reshape(-1), Wg).reshape(1, -1),
        w2b=band(params['conv2_w']),
        b2r=jnp.tile(params['conv2_b'].reshape(-1), Wg).reshape(1, -1),
        gw1r=jnp.tile(w1, (T, 1)),
        gb1=b1, gw2=w2, gb2=b2, gw3=w3, gb3=b3, gwl=wl, gbl=bl,
        fcwc=fcwc, fcwe=fc_w[:emb_dim], fcb=params['fc_b'],
        wih=params['lstm_wih_t'], whh=params['lstm_whh_t'], lb=params['lstm_b'],
        aw=params['act_w'], ab=params['act_b'],
    )


# ============================================================================
# Forward wrapper: tiny input-format glue + a single fused pallas_call.
# ============================================================================
def grnn_forward(kp, grid_obs, social_state, h0, c0):
    B, T, C, Hg, Wg = grid_obs.shape
    hsoc = social_state.shape[-1]
    Hs = h0.shape[-1]
    num_out = kp['ab'].shape[-1]

    # Input-format glue (tiny tensors, one-time): NCHW -> (H, W*C) with H-pad,
    # and the block-diagonal transposed social adjacency input.
    x = jnp.transpose(grid_obs, (0, 1, 3, 4, 2)).reshape(B, T, Hg, Wg * C)
    x = jnp.pad(x, ((0, 0), (0, 0), (1, 1), (0, 0)))
    soc_t = jnp.swapaxes(social_state, -1, -2).astype(jnp.float32)
    eye_t = jnp.eye(T, dtype=jnp.float32)
    sbd = (soc_t[:, :, :, None, :] * eye_t[None, :, None, :, None]
           ).reshape(B, T * hsoc, T * hsoc)
    h0b = h0[:, None, :]
    c0b = c0[:, None, :]

    def fullspec(a):
        nd = a.ndim
        return pl.BlockSpec(a.shape, lambda b: (0,) * nd)

    weights = [kp['w1b'], kp['b1r'], kp['w2b'], kp['b2r'],
               kp['gw1r'], kp['gb1'], kp['gw2'], kp['gb2'],
               kp['gw3'], kp['gb3'], kp['gwl'], kp['gbl'],
               kp['fcwc'], kp['fcwe'], kp['fcb'],
               kp['wih'], kp['whh'], kp['lb'],
               kp['aw'], kp['ab']]

    kernel = functools.partial(_fused_forward_kernel, T=T, Hg=Hg, Wg=Wg, C=C,
                               hsoc=hsoc, Hs=Hs)
    action, h_n, c_n = pl.pallas_call(
        kernel,
        out_shape=(
            jax.ShapeDtypeStruct((B, T, num_out), jnp.float32),
            jax.ShapeDtypeStruct((B, 1, Hs), jnp.float32),
            jax.ShapeDtypeStruct((B, 1, Hs), jnp.float32),
        ),
        grid=(B,),
        in_specs=[
            pl.BlockSpec((1, T, Hg + 2, Wg * C), lambda b: (b, 0, 0, 0)),
            pl.BlockSpec((1, T * hsoc, T * hsoc), lambda b: (b, 0, 0)),
            pl.BlockSpec((1, 1, Hs), lambda b: (b, 0, 0)),
            pl.BlockSpec((1, 1, Hs), lambda b: (b, 0, 0)),
        ] + [fullspec(w) for w in weights],
        out_specs=(
            pl.BlockSpec((1, T, num_out), lambda b: (b, 0, 0)),
            pl.BlockSpec((1, 1, Hs), lambda b: (b, 0, 0)),
            pl.BlockSpec((1, 1, Hs), lambda b: (b, 0, 0)),
        ),
        scratch_shapes=[pltpu.VMEM((T, Hg + 2, Wg * 32), jnp.float32)],
        compiler_params=pltpu.CompilerParams(
            dimension_semantics=("parallel",)),     # 2 steps -> both v7x cores
    )(x, sbd, h0b, c0b, *weights)

    return action.reshape(B * T, num_out), h_n[:, 0, :], c_n[:, 0, :]


# ============================================================================
# Pure-JAX reference (PyTorch-equivalent semantics, original weight layout)
# ============================================================================
def ref_forward(params, grid_obs, social_state, h0, c0):
    B, T, C, Hg, Wg = grid_obs.shape
    BT = B * T
    hsoc = social_state.shape[-1]

    # GNN
    soc = social_state.reshape(BT, hsoc, hsoc).astype(jnp.float32)
    I = jnp.eye(hsoc, dtype=jnp.float32)
    A = (soc + I >= 1.0).astype(jnp.float32)                 # A[b, i, j]
    deg = A.sum(axis=1)                                      # in-degree (per target)
    dinv = 1.0 / jnp.sqrt(deg)
    P = dinv[:, :, None] * jnp.swapaxes(A, 1, 2) * dinv[:, None, :]
    (w1, b1), (w2, b2), (w3, b3), (wl, bl) = params['gnn']
    h1 = jax.nn.relu(jnp.einsum('bji,ik->bjk', P, w1) + b1)
    h2 = jax.nn.relu(jnp.einsum('bji,bik->bjk', P, h1 @ w2) + b2)
    h3 = jax.nn.relu(jnp.einsum('bji,bik->bjk', P, h2 @ w3) + b3)
    emb = h3.mean(axis=1) @ wl + bl

    # conv
    x = grid_obs.reshape(BT, C, Hg, Wg).transpose(0, 2, 3, 1)
    for w, b in [(params['conv1_w'], params['conv1_b']),
                 (params['conv2_w'], params['conv2_b'])]:
        x = jax.lax.conv_general_dilated(
            x, w, (1, 1), 'SAME',
            dimension_numbers=('NHWC', 'HWIO', 'NHWC'))
        x = jax.nn.relu(x + b.reshape(1, 1, 1, -1))
    conv_flat = x.transpose(0, 3, 1, 2).reshape(BT, -1)      # NCHW flatten order

    feat = jnp.concatenate([emb, conv_flat], axis=-1)
    feat = jax.nn.relu(feat @ params['fc_w'] + params['fc_b'])

    x_tbf = feat.reshape(B, T, -1).transpose(1, 0, 2)
    Hs = h0.shape[1]

    def step(carry, x_t):
        h, c = carry
        gates = x_t @ params['lstm_wih_t'] + h @ params['lstm_whh_t'] + params['lstm_b']
        i = jax.nn.sigmoid(gates[:, :Hs])
        f = jax.nn.sigmoid(gates[:, Hs:2 * Hs])
        g = jnp.tanh(gates[:, 2 * Hs:3 * Hs])
        o = jax.nn.sigmoid(gates[:, 3 * Hs:])
        c = f * c + i * g
        h = o * jnp.tanh(c)
        return (h, c), h

    (h_n, c_n), feats = jax.lax.scan(step, (h0, c0), x_tbf)
    feats_bt = feats.transpose(1, 0, 2).reshape(BT, -1)
    action = feats_bt @ params['act_w'] + params['act_b']
    return action, h_n, c_n


# ============================================================================
# Deterministic parameter init (PyTorch-style layout: HWIO conv, (in,out) fc)
# ============================================================================
def init_params(key, *, grid_c, grid_h, grid_w, soc_h, fc_size, lstm_h, num_outputs):
    ks = list(jax.random.split(key, 24))
    nk = iter(ks)

    def dense(fan_in, shape):
        return jax.random.normal(next(nk), shape, jnp.float32) / jnp.sqrt(float(fan_in))

    gnn = (
        (dense(soc_h, (soc_h, 64)), dense(64, (1, 64)) * 0.1),
        (dense(64, (64, 64)), dense(64, (1, 64)) * 0.1),
        (dense(64, (64, 64)), dense(64, (1, 64)) * 0.1),
        (dense(64, (64, 64)), dense(64, (1, 64)) * 0.1),
    )
    fc_in = 32 * grid_h * grid_w + 64
    params = dict(
        gnn=gnn,
        conv1_w=dense(9 * grid_c, (3, 3, grid_c, 32)),
        conv1_b=dense(32, (1, 32)) * 0.1,
        conv2_w=dense(9 * 32, (3, 3, 32, 32)),
        conv2_b=dense(32, (1, 32)) * 0.1,
        fc_w=dense(fc_in, (fc_in, fc_size)),
        fc_b=dense(fc_size, (1, fc_size)) * 0.1,
        lstm_wih_t=dense(fc_size, (fc_size, 4 * lstm_h)),
        lstm_whh_t=dense(lstm_h, (lstm_h, 4 * lstm_h)),
        lstm_b=dense(lstm_h, (1, 4 * lstm_h)) * 0.1,
        act_w=dense(lstm_h, (lstm_h, num_outputs)),
        act_b=dense(num_outputs, (1, num_outputs)) * 0.1,
    )
    return params


if __name__ == "__main__":
    B, T = 2, 4
    GRID_C, GRID_H, GRID_W = 4, 8, 8          # grid_observation_shape
    SOC_H = 8                                  # social_state_shape = (8, 8)
    FC_SIZE = 128
    LSTM_H = 32
    NUM_OUTPUTS = 6

    key = jax.random.PRNGKey(0)
    kpk, kg, ks = jax.random.split(key, 3)
    params = init_params(kpk, grid_c=GRID_C, grid_h=GRID_H, grid_w=GRID_W,
                         soc_h=SOC_H, fc_size=FC_SIZE, lstm_h=LSTM_H,
                         num_outputs=NUM_OUTPUTS)
    kparams = prepare_kernel_params(params, T=T, Hg=GRID_H, Wg=GRID_W)

    grid_obs = jax.random.normal(kg, (B, T, GRID_C, GRID_H, GRID_W), jnp.float32)
    social_state = jax.random.bernoulli(ks, 0.3, (B, T, SOC_H, SOC_H)).astype(jnp.float32)
    h0 = jnp.zeros((B, LSTM_H), jnp.float32)   # get_initial_state(): zeros
    c0 = jnp.zeros((B, LSTM_H), jnp.float32)

    fwd = jax.jit(grnn_forward)
    action, h_n, c_n = fwd(kparams, grid_obs, social_state, h0, c0)
    jax.block_until_ready((action, h_n, c_n))

    with jax.default_matmul_precision("highest"):
        action_r, h_r, c_r = ref_forward(params, grid_obs, social_state, h0, c0)

    np.testing.assert_allclose(np.asarray(action), np.asarray(action_r),
                               rtol=2e-2, atol=2e-2)
    np.testing.assert_allclose(np.asarray(h_n), np.asarray(h_r), rtol=2e-2, atol=2e-2)
    np.testing.assert_allclose(np.asarray(c_n), np.asarray(c_r), rtol=2e-2, atol=2e-2)

    assert action.shape == (B * T, NUM_OUTPUTS)
    print("KERNEL_OK")
</pallas_src>

<mosaic_0001>
module attributes {stable_mosaic.version = 11 : i64} {
  func.func @_fused_forward_kernel(%arg0: i32, %arg1: memref<1x4x10x32xf32, #tpu.memory_space<vmem>>, %arg2: memref<1x32x32xf32, #tpu.memory_space<vmem>>, %arg3: memref<1x1x32xf32, #tpu.memory_space<vmem>>, %arg4: memref<1x1x32xf32, #tpu.memory_space<vmem>>, %arg5: memref<3x32x256xf32, #tpu.memory_space<vmem>>, %arg6: memref<1x256xf32, #tpu.memory_space<vmem>>, %arg7: memref<3x256x256xf32, #tpu.memory_space<vmem>>, %arg8: memref<1x256xf32, #tpu.memory_space<vmem>>, %arg9: memref<32x64xf32, #tpu.memory_space<vmem>>, %arg10: memref<1x64xf32, #tpu.memory_space<vmem>>, %arg11: memref<64x64xf32, #tpu.memory_space<vmem>>, %arg12: memref<1x64xf32, #tpu.memory_space<vmem>>, %arg13: memref<64x64xf32, #tpu.memory_space<vmem>>, %arg14: memref<1x64xf32, #tpu.memory_space<vmem>>, %arg15: memref<64x64xf32, #tpu.memory_space<vmem>>, %arg16: memref<1x64xf32, #tpu.memory_space<vmem>>, %arg17: memref<8x256x128xf32, #tpu.memory_space<vmem>>, %arg18: memref<64x128xf32, #tpu.memory_space<vmem>>, %arg19: memref<1x128xf32, #tpu.memory_space<vmem>>, %arg20: memref<128x128xf32, #tpu.memory_space<vmem>>, %arg21: memref<32x128xf32, #tpu.memory_space<vmem>>, %arg22: memref<1x128xf32, #tpu.memory_space<vmem>>, %arg23: memref<32x6xf32, #tpu.memory_space<vmem>>, %arg24: memref<1x6xf32, #tpu.memory_space<vmem>>, %arg25: memref<1x4x6xf32, #tpu.memory_space<vmem>>, %arg26: memref<1x1x32xf32, #tpu.memory_space<vmem>>, %arg27: memref<1x1x32xf32, #tpu.memory_space<vmem>>, %arg28: memref<4x10x256xf32, #tpu.memory_space<vmem>>) attributes {dimension_semantics = [#tpu.dimension_semantics<parallel>], iteration_bounds = array<i64: 2>, scalar_prefetch = 0 : i64, scratch_operands = 1 : i64, tpu.core_type = #tpu.core_type<tc>, window_params = [{transform_indices = @transform_0, window_bounds = array<i64: 1, 4, 10, 32>}, {transform_indices = @transform_1, window_bounds = array<i64: 1, 32, 32>}, {transform_indices = @transform_2, window_bounds = array<i64: 1, 1, 32>}, {transform_indices = @transform_3, window_bounds = array<i64: 1, 1, 32>}, {pipeline_mode = #tpu.pipeline_mode<synchronous>, transform_indices = @transform_4, window_bounds = array<i64: 3, 32, 256>}, {pipeline_mode = #tpu.pipeline_mode<synchronous>, transform_indices = @transform_5, window_bounds = array<i64: 1, 256>}, {pipeline_mode = #tpu.pipeline_mode<synchronous>, transform_indices = @transform_6, window_bounds = array<i64: 3, 256, 256>}, {pipeline_mode = #tpu.pipeline_mode<synchronous>, transform_indices = @transform_7, window_bounds = array<i64: 1, 256>}, {pipeline_mode = #tpu.pipeline_mode<synchronous>, transform_indices = @transform_8, window_bounds = array<i64: 32, 64>}, {pipeline_mode = #tpu.pipeline_mode<synchronous>, transform_indices = @transform_9, window_bounds = array<i64: 1, 64>}, {pipeline_mode = #tpu.pipeline_mode<synchronous>, transform_indices = @transform_10, window_bounds = array<i64: 64, 64>}, {pipeline_mode = #tpu.pipeline_mode<synchronous>, transform_indices = @transform_11, window_bounds = array<i64: 1, 64>}, {pipeline_mode = #tpu.pipeline_mode<synchronous>, transform_indices = @transform_12, window_bounds = array<i64: 64, 64>}, {pipeline_mode = #tpu.pipeline_mode<synchronous>, transform_indices = @transform_13, window_bounds = array<i64: 1, 64>}, {pipeline_mode = #tpu.pipeline_mode<synchronous>, transform_indices = @transform_14, window_bounds = array<i64: 64, 64>}, {pipeline_mode = #tpu.pipeline_mode<synchronous>, transform_indices = @transform_15, window_bounds = array<i64: 1, 64>}, {pipeline_mode = #tpu.pipeline_mode<synchronous>, transform_indices = @transform_16, window_bounds = array<i64: 8, 256, 128>}, {pipeline_mode = #tpu.pipeline_mode<synchronous>, transform_indices = @transform_17, window_bounds = array<i64: 64, 128>}, {pipeline_mode = #tpu.pipeline_mode<synchronous>, transform_indices = @transform_18, window_bounds = array<i64: 1, 128>}, {pipeline_mode = #tpu.pipeline_mode<synchronous>, transform_indices = @transform_19, window_bounds = array<i64: 128, 128>}, {pipeline_mode = #tpu.pipeline_mode<synchronous>, transform_indices = @transform_20, window_bounds = array<i64: 32, 128>}, {pipeline_mode = #tpu.pipeline_mode<synchronous>, transform_indices = @transform_21, window_bounds = array<i64: 1, 128>}, {pipeline_mode = #tpu.pipeline_mode<synchronous>, transform_indices = @transform_22, window_bounds = array<i64: 32, 6>}, {pipeline_mode = #tpu.pipeline_mode<synchronous>, transform_indices = @transform_23, window_bounds = array<i64: 1, 6>}, {transform_indices = @transform_24, window_bounds = array<i64: 1, 4, 6>}, {transform_indices = @transform_25, window_bounds = array<i64: 1, 1, 32>}, {transform_indices = @transform_26, window_bounds = array<i64: 1, 1, 32>}]} {
    %c0 = arith.constant 0 : index
    %c0_0 = arith.constant 0 : index
    %c0_1 = arith.constant 0 : index
    %0 = vector.load %arg2[%c0, %c0_0, %c0_1] : memref<1x32x32xf32, #tpu.memory_space<vmem>>, vector<1x32x32xf32>
    %1 = vector.shape_cast %0 : vector<1x32x32xf32> to vector<32x32xf32>
    %2 = tpu.iota {dimensions = array<i32: 0>} : vector<32x32xi32>
    %3 = tpu.iota {dimensions = array<i32: 1>} : vector<32x32xi32>
    %4 = arith.cmpi eq, %2, %3 : vector<32x32xi32>
    %5 = arith.extui %4 : vector<32x32xi1> to vector<32x32xi32>
    %6 = arith.sitofp %5 : vector<32x32xi32> to vector<32x32xf32>
    %7 = arith.addf %1, %6 : vector<32x32xf32>
    %cst = arith.constant 1.000000e+00 : f32
    %8 = vector.broadcast %cst : f32 to vector<32x32xf32>
    %9 = arith.cmpf oge, %7, %8 : vector<32x32xf32>
    %10 = arith.extui %9 : vector<32x32xi1> to vector<32x32xi32>
    %11 = arith.sitofp %10 : vector<32x32xi32> to vector<32x32xf32>
    %cst_2 = arith.constant dense<0.000000e+00> : vector<32xf32>
    %12 = vector.multi_reduction <add>, %11, %cst_2 [1] : vector<32x32xf32> to vector<32xf32>
    %13 = vector.shape_cast %12 : vector<32xf32> to vector<32x1xf32>
    %14 = math.rsqrt %13 : vector<32x1xf32>
    %c0_3 = arith.constant 0 : index
    %c0_4 = arith.constant 0 : index
    %15 = vector.load %arg9[%c0_3, %c0_4] : memref<32x64xf32, #tpu.memory_space<vmem>>, vector<32x64xf32>
    %16 = vector.broadcast %14 : vector<32x1xf32> to vector<32x64xf32>
    %17 = arith.mulf %16, %15 : vector<32x64xf32>
    %cst_5 = arith.constant dense<0.000000e+00> : vector<32x64xf32>
    %18 = tpu.matmul %11, %17, %cst_5 {dimension_numbers = #tpu.dot_dimension_numbers<[1], [0], [0], [1], [0, 0, 1, 1], [], []>} : vector<32x32xf32>, vector<32x64xf32>, vector<32x64xf32> -> vector<32x64xf32>
    %19 = vector.broadcast %14 : vector<32x1xf32> to vector<32x64xf32>
    %20 = arith.mulf %19, %18 : vector<32x64xf32>
    %c0_6 = arith.constant 0 : index
    %c0_7 = arith.constant 0 : index
    %21 = vector.load %arg10[%c0_6, %c0_7] : memref<1x64xf32, #tpu.memory_space<vmem>>, vector<1x64xf32>
    %22 = vector.broadcast %21 : vector<1x64xf32> to vector<32x64xf32>
    %23 = arith.addf %20, %22 : vector<32x64xf32>
    %cst_8 = arith.constant 0.000000e+00 : f32
    %24 = vector.broadcast %cst_8 : f32 to vector<32x64xf32>
    %25 = arith.maximumf %23, %24 : vector<32x64xf32>
    %c0_9 = arith.constant 0 : index
    %c0_10 = arith.constant 0 : index
    %26 = vector.load %arg11[%c0_9, %c0_10] : memref<64x64xf32, #tpu.memory_space<vmem>>, vector<64x64xf32>
    %cst_11 = arith.constant dense<0.000000e+00> : vector<32x64xf32>
    %27 = tpu.matmul %25, %26, %cst_11 {dimension_numbers = #tpu.dot_dimension_numbers<[1], [0], [0], [1], [0, 0, 1, 1], [], []>} : vector<32x64xf32>, vector<64x64xf32>, vector<32x64xf32> -> vector<32x64xf32>
    %28 = vector.broadcast %14 : vector<32x1xf32> to vector<32x64xf32>
    %29 = arith.mulf %28, %27 : vector<32x64xf32>
    %cst_12 = arith.constant dense<0.000000e+00> : vector<32x64xf32>
    %30 = tpu.matmul %11, %29, %cst_12 {dimension_numbers = #tpu.dot_dimension_numbers<[1], [0], [0], [1], [0, 0, 1, 1], [], []>} : vector<32x32xf32>, vector<32x64xf32>, vector<32x64xf32> -> vector<32x64xf32>
    %31 = vector.broadcast %14 : vector<32x1xf32> to vector<32x64xf32>
    %32 = arith.mulf %31, %30 : vector<32x64xf32>
    %c0_13 = arith.constant 0 : index
    %c0_14 = arith.constant 0 : index
    %33 = vector.load %arg12[%c0_13, %c0_14] : memref<1x64xf32, #tpu.memory_space<vmem>>, vector<1x64xf32>
    %34 = vector.broadcast %33 : vector<1x64xf32> to vector<32x64xf32>
    %35 = arith.addf %32, %34 : vector<32x64xf32>
    %cst_15 = arith.constant 0.000000e+00 : f32
    %36 = vector.broadcast %cst_15 : f32 to vector<32x64xf32>
    %37 = arith.maximumf %35, %36 : vector<32x64xf32>
    %c0_16 = arith.constant 0 : index
    %c0_17 = arith.constant 0 : index
    %38 = vector.load %arg13[%c0_16, %c0_17] : memref<64x64xf32, #tpu.memory_space<vmem>>, vector<64x64xf32>
    %cst_18 = arith.constant dense<0.000000e+00> : vector<32x64xf32>
    %39 = tpu.matmul %37, %38, %cst_18 {dimension_numbers = #tpu.dot_dimension_numbers<[1], [0], [0], [1], [0, 0, 1, 1], [], []>} : vector<32x64xf32>, vector<64x64xf32>, vector<32x64xf32> -> vector<32x64xf32>
    %40 = vector.broadcast %14 : vector<32x1xf32> to vector<32x64xf32>
    %41 = arith.mulf %40, %39 : vector<32x64xf32>
    %cst_19 = arith.constant dense<0.000000e+00> : vector<32x64xf32>
    %42 = tpu.matmul %11, %41, %cst_19 {dimension_numbers = #tpu.dot_dimension_numbers<[1], [0], [0], [1], [0, 0, 1, 1], [], []>} : vector<32x32xf32>, vector<32x64xf32>, vector<32x64xf32> -> vector<32x64xf32>
    %43 = vector.broadcast %14 : vector<32x1xf32> to vector<32x64xf32>
    %44 = arith.mulf %43, %42 : vector<32x64xf32>
    %c0_20 = arith.constant 0 : index
    %c0_21 = arith.constant 0 : index
    %45 = vector.load %arg14[%c0_20, %c0_21] : memref<1x64xf32, #tpu.memory_space<vmem>>, vector<1x64xf32>
    %46 = vector.broadcast %45 : vector<1x64xf32> to vector<32x64xf32>
    %47 = arith.addf %44, %46 : vector<32x64xf32>
    %cst_22 = arith.constant 0.000000e+00 : f32
    %48 = vector.broadcast %cst_22 : f32 to vector<32x64xf32>
    %49 = arith.maximumf %47, %48 : vector<32x64xf32>
    %50 = vector.shape_cast %49 : vector<32x64xf32> to vector<4x8x64xf32>
    %cst_23 = arith.constant dense<0.000000e+00> : vector<4x64xf32>
    %51 = vector.multi_reduction <add>, %50, %cst_23 [1] : vector<4x8x64xf32> to vector<4x64xf32>
    %cst_24 = arith.constant 8.000000e+00 : f32
    %52 = vector.broadcast %cst_24 : f32 to vector<4x64xf32>
    %53 = arith.divf %51, %52 : vector<4x64xf32>
    %c0_25 = arith.constant 0 : index
    %c0_26 = arith.constant 0 : index
    %54 = vector.load %arg15[%c0_25, %c0_26] : memref<64x64xf32, #tpu.memory_space<vmem>>, vector<64x64xf32>
    %cst_27 = arith.constant dense<0.000000e+00> : vector<4x64xf32>
    %55 = tpu.matmul %53, %54, %cst_27 {dimension_numbers = #tpu.dot_dimension_numbers<[1], [0], [0], [1], [0, 0, 1, 1], [], []>} : vector<4x64xf32>, vector<64x64xf32>, vector<4x64xf32> -> vector<4x64xf32>
    %c0_28 = arith.constant 0 : index
    %c0_29 = arith.constant 0 : index
    %56 = vector.load %arg16[%c0_28, %c0_29] : memref<1x64xf32, #tpu.memory_space<vmem>>, vector<1x64xf32>
    %57 = vector.broadcast %56 : vector<1x64xf32> to vector<4x64xf32>
    %58 = arith.addf %55, %57 : vector<4x64xf32>
    %c0_30 = arith.constant 0 : index
    %c0_31 = arith.constant 0 : index
    %c0_32 = arith.constant 0 : index
    %c0_33 = arith.constant 0 : index
    %59 = vector.load %arg1[%c0_30, %c0_31, %c0_32, %c0_33] : memref<1x4x10x32xf32, #tpu.memory_space<vmem>>, vector<1x4x10x32xf32>
    %60 = vector.shape_cast %59 : vector<1x4x10x32xf32> to vector<4x10x32xf32>
    %cst_34 = arith.constant 0.000000e+00 : f32
    %61 = vector.broadcast %cst_34 : f32 to vector<32x256xf32>
    %62 = vector.extract_strided_slice %60 {offsets = [0, 0, 0], sizes = [4, 8, 32], strides = [1, 1, 1]} : vector<4x10x32xf32> to vector<4x8x32xf32>
    %63 = vector.shape_cast %62 : vector<4x8x32xf32> to vector<32x32xf32>
    %c0_35 = arith.constant 0 : index
    %c0_36 = arith.constant 0 : index
    %c0_37 = arith.constant 0 : index
    %64 = vector.load %arg5[%c0_35, %c0_36, %c0_37] : memref<3x32x256xf32, #tpu.memory_space<vmem>>, vector<1x32x256xf32>
    %65 = vector.shape_cast %64 : vector<1x32x256xf32> to vector<32x256xf32>
    %cst_38 = arith.constant dense<0.000000e+00> : vector<32x256xf32>
    %66 = tpu.matmul %63, %65, %cst_38 {dimension_numbers = #tpu.dot_dimension_numbers<[1], [0], [0], [1], [0, 0, 1, 1], [], []>} : vector<32x32xf32>, vector<32x256xf32>, vector<32x256xf32> -> vector<32x256xf32>
    %67 = arith.addf %61, %66 : vector<32x256xf32>
    %68 = vector.extract_strided_slice %60 {offsets = [0, 1, 0], sizes = [4, 8, 32], strides = [1, 1, 1]} : vector<4x10x32xf32> to vector<4x8x32xf32>
    %69 = vector.shape_cast %68 : vector<4x8x32xf32> to vector<32x32xf32>
    %c1 = arith.constant 1 : index
    %c0_39 = arith.constant 0 : index
    %c0_40 = arith.constant 0 : index
    %70 = vector.load %arg5[%c1, %c0_39, %c0_40] : memref<3x32x256xf32, #tpu.memory_space<vmem>>, vector<1x32x256xf32>
    %71 = vector.shape_cast %70 : vector<1x32x256xf32> to vector<32x256xf32>
    %cst_41 = arith.constant dense<0.000000e+00> : vector<32x256xf32>
    %72 = tpu.matmul %69, %71, %cst_41 {dimension_numbers = #tpu.dot_dimension_numbers<[1], [0], [0], [1], [0, 0, 1, 1], [], []>} : vector<32x32xf32>, vector<32x256xf32>, vector<32x256xf32> -> vector<32x256xf32>
    %73 = arith.addf %67, %72 : vector<32x256xf32>
    %74 = vector.extract_strided_slice %60 {offsets = [0, 2, 0], sizes = [4, 8, 32], strides = [1, 1, 1]} : vector<4x10x32xf32> to vector<4x8x32xf32>
    %75 = vector.shape_cast %74 : vector<4x8x32xf32> to vector<32x32xf32>
    %c2 = arith.constant 2 : index
    %c0_42 = arith.constant 0 : index
    %c0_43 = arith.constant 0 : index
    %76 = vector.load %arg5[%c2, %c0_42, %c0_43] : memref<3x32x256xf32, #tpu.memory_space<vmem>>, vector<1x32x256xf32>
    %77 = vector.shape_cast %76 : vector<1x32x256xf32> to vector<32x256xf32>
    %cst_44 = arith.constant dense<0.000000e+00> : vector<32x256xf32>
    %78 = tpu.matmul %75, %77, %cst_44 {dimension_numbers = #tpu.dot_dimension_numbers<[1], [0], [0], [1], [0, 0, 1, 1], [], []>} : vector<32x32xf32>, vector<32x256xf32>, vector<32x256xf32> -> vector<32x256xf32>
    %79 = arith.addf %73, %78 : vector<32x256xf32>
    %c0_45 = arith.constant 0 : index
    %c0_46 = arith.constant 0 : index
    %80 = vector.load %arg6[%c0_45, %c0_46] : memref<1x256xf32, #tpu.memory_space<vmem>>, vector<1x256xf32>
    %81 = vector.broadcast %80 : vector<1x256xf32> to vector<32x256xf32>
    %82 = arith.addf %79, %81 : vector<32x256xf32>
    %cst_47 = arith.constant 0.000000e+00 : f32
    %83 = vector.broadcast %cst_47 : f32 to vector<32x256xf32>
    %84 = arith.maximumf %82, %83 : vector<32x256xf32>
    %cst_48 = arith.constant 0.000000e+00 : f32
    %85 = vector.broadcast %cst_48 : f32 to vector<4x1x256xf32>
    %c0_49 = arith.constant 0 : index
    %c0_50 = arith.constant 0 : index
    %c0_51 = arith.constant 0 : index
    %86 = vector.load %arg28[%c0_49, %c0_50, %c0_51] : memref<4x10x256xf32, #tpu.memory_space<vmem>>, vector<4x1x256xf32>
    tpu.vector_store %arg28[%c0_49, %c0_50, %c0_51], %85 {strides = array<i32>} : memref<4x10x256xf32, #tpu.memory_space<vmem>>, vector<4x1x256xf32>,
    %c0_52 = arith.constant 0 : index
    %c9 = arith.constant 9 : index
    %c0_53 = arith.constant 0 : index
    %87 = vector.load %arg28[%c0_52, %c9, %c0_53] : memref<4x10x256xf32, #tpu.memory_space<vmem>>, vector<4x1x256xf32>
    tpu.vector_store %arg28[%c0_52, %c9, %c0_53], %85 {strides = array<i32>} : memref<4x10x256xf32, #tpu.memory_space<vmem>>, vector<4x1x256xf32>,
    %88 = vector.shape_cast %84 : vector<32x256xf32> to vector<4x8x256xf32>
    %c0_54 = arith.constant 0 : index
    %c1_55 = arith.constant 1 : index
    %c0_56 = arith.constant 0 : index
    %89 = vector.load %arg28[%c0_54, %c1_55, %c0_56] : memref<4x10x256xf32, #tpu.memory_space<vmem>>, vector<4x8x256xf32>
    tpu.vector_store %arg28[%c0_54, %c1_55, %c0_56], %88 {strides = array<i32>} : memref<4x10x256xf32, #tpu.memory_space<vmem>>, vector<4x8x256xf32>,
    %cst_57 = arith.constant 0.000000e+00 : f32
    %90 = vector.broadcast %cst_57 : f32 to vector<32x256xf32>
    %c0_58 = arith.constant 0 : index
    %c0_59 = arith.constant 0 : index
    %c0_60 = arith.constant 0 : index
    %91 = vector.load %arg28[%c0_58, %c0_59, %c0_60] : memref<4x10x256xf32, #tpu.memory_space<vmem>>, vector<4x8x256xf32>
    %92 = vector.shape_cast %91 : vector<4x8x256xf32> to vector<32x256xf32>
    %c0_61 = arith.constant 0 : index
    %c0_62 = arith.constant 0 : index
    %c0_63 = arith.constant 0 : index
    %93 = vector.load %arg7[%c0_61, %c0_62, %c0_63] : memref<3x256x256xf32, #tpu.memory_space<vmem>>, vector<1x256x256xf32>
    %94 = vector.shape_cast %93 : vector<1x256x256xf32> to vector<256x256xf32>
    %cst_64 = arith.constant dense<0.000000e+00> : vector<32x256xf32>
    %95 = tpu.matmul %92, %94, %cst_64 {dimension_numbers = #tpu.dot_dimension_numbers<[1], [0], [0], [1], [0, 0, 1, 1], [], []>} : vector<32x256xf32>, vector<256x256xf32>, vector<32x256xf32> -> vector<32x256xf32>
    %96 = arith.addf %90, %95 : vector<32x256xf32>
    %c0_65 = arith.constant 0 : index
    %c1_66 = arith.constant 1 : index
    %c0_67 = arith.constant 0 : index
    %97 = vector.load %arg28[%c0_65, %c1_66, %c0_67] : memref<4x10x256xf32, #tpu.memory_space<vmem>>, vector<4x8x256xf32>
    %98 = vector.shape_cast %97 : vector<4x8x256xf32> to vector<32x256xf32>
    %c1_68 = arith.constant 1 : index
    %c0_69 = arith.constant 0 : index
    %c0_70 = arith.constant 0 : index
    %99 = vector.load %arg7[%c1_68, %c0_69, %c0_70] : memref<3x256x256xf32, #tpu.memory_space<vmem>>, vector<1x256x256xf32>
    %100 = vector.shape_cast %99 : vector<1x256x256xf32> to vector<256x256xf32>
    %cst_71 = arith.constant dense<0.000000e+00> : vector<32x256xf32>
    %101 = tpu.matmul %98, %100, %cst_71 {dimension_numbers = #tpu.dot_dimension_numbers<[1], [0], [0], [1], [0, 0, 1, 1], [], []>} : vector<32x256xf32>, vector<256x256xf32>, vector<32x256xf32> -> vector<32x256xf32>
    %102 = arith.addf %96, %101 : vector<32x256xf32>
    %c0_72 = arith.constant 0 : index
    %c2_73 = arith.constant 2 : index
    %c0_74 = arith.constant 0 : index
    %103 = vector.load %arg28[%c0_72, %c2_73, %c0_74] : memref<4x10x256xf32, #tpu.memory_space<vmem>>, vector<4x8x256xf32>
    %104 = vector.shape_cast %103 : vector<4x8x256xf32> to vector<32x256xf32>
    %c2_75 = arith.constant 2 : index
    %c0_76 = arith.constant 0 : index
    %c0_77 = arith.constant 0 : index
    %105 = vector.load %arg7[%c2_75, %c0_76, %c0_77] : memref<3x256x256xf32, #tpu.memory_space<vmem>>, vector<1x256x256xf32>
    %106 = vector.shape_cast %105 : vector<1x256x256xf32> to vector<256x256xf32>
    %cst_78 = arith.constant dense<0.000000e+00> : vector<32x256xf32>
    %107 = tpu.matmul %104, %106, %cst_78 {dimension_numbers = #tpu.dot_dimension_numbers<[1], [0], [0], [1], [0, 0, 1, 1], [], []>} : vector<32x256xf32>, vector<256x256xf32>, vector<32x256xf32> -> vector<32x256xf32>
    %108 = arith.addf %102, %107 : vector<32x256xf32>
    %c0_79 = arith.constant 0 : index
    %c0_80 = arith.constant 0 : index
    %109 = vector.load %arg8[%c0_79, %c0_80] : memref<1x256xf32, #tpu.memory_space<vmem>>, vector<1x256xf32>
    %110 = vector.broadcast %109 : vector<1x256xf32> to vector<32x256xf32>
    %111 = arith.addf %108, %110 : vector<32x256xf32>
    %cst_81 = arith.constant 0.000000e+00 : f32
    %112 = vector.broadcast %cst_81 : f32 to vector<32x256xf32>
    %113 = arith.maximumf %111, %112 : vector<32x256xf32>
    %114 = vector.shape_cast %113 : vector<32x256xf32> to vector<4x8x256xf32>
    %c0_82 = arith.constant 0 : index
    %c0_83 = arith.constant 0 : index
    %115 = vector.load %arg18[%c0_82, %c0_83] : memref<64x128xf32, #tpu.memory_space<vmem>>, vector<64x128xf32>
    %cst_84 = arith.constant dense<0.000000e+00> : vector<4x128xf32>
    %116 = tpu.matmul %58, %115, %cst_84 {dimension_numbers = #tpu.dot_dimension_numbers<[1], [0], [0], [1], [0, 0, 1, 1], [], []>} : vector<4x64xf32>, vector<64x128xf32>, vector<4x128xf32> -> vector<4x128xf32>
    %c0_85 = arith.constant 0 : index
    %c0_86 = arith.constant 0 : index
    %117 = vector.load %arg19[%c0_85, %c0_86] : memref<1x128xf32, #tpu.memory_space<vmem>>, vector<1x128xf32>
    %118 = vector.broadcast %117 : vector<1x128xf32> to vector<4x128xf32>
    %119 = arith.addf %116, %118 : vector<4x128xf32>
    %120 = vector.extract_strided_slice %114 {offsets = [0, 0, 0], sizes = [4, 1, 256], strides = [1, 1, 1]} : vector<4x8x256xf32> to vector<4x1x256xf32>
    %121 = vector.shape_cast %120 : vector<4x1x256xf32> to vector<4x256xf32>
    %c0_87 = arith.constant 0 : index
    %c0_88 = arith.constant 0 : index
    %c0_89 = arith.constant 0 : index
    %122 = vector.load %arg17[%c0_87, %c0_88, %c0_89] : memref<8x256x128xf32, #tpu.memory_space<vmem>>, vector<1x256x128xf32>
    %123 = vector.shape_cast %122 : vector<1x256x128xf32> to vector<256x128xf32>
    %cst_90 = arith.constant dense<0.000000e+00> : vector<4x128xf32>
    %124 = tpu.matmul %121, %123, %cst_90 {dimension_numbers = #tpu.dot_dimension_numbers<[1], [0], [0], [1], [0, 0, 1, 1], [], []>} : vector<4x256xf32>, vector<256x128xf32>, vector<4x128xf32> -> vector<4x128xf32>
    %125 = arith.addf %119, %124 : vector<4x128xf32>
    %126 = vector.extract_strided_slice %114 {offsets = [0, 1, 0], sizes = [4, 1, 256], strides = [1, 1, 1]} : vector<4x8x256xf32> to vector<4x1x256xf32>
    %127 = vector.shape_cast %126 : vector<4x1x256xf32> to vector<4x256xf32>
    %c1_91 = arith.constant 1 : index
    %c0_92 = arith.constant 0 : index
    %c0_93 = arith.constant 0 : index
    %128 = vector.load %arg17[%c1_91, %c0_92, %c0_93] : memref<8x256x128xf32, #tpu.memory_space<vmem>>, vector<1x256x128xf32>
    %129 = vector.shape_cast %128 : vector<1x256x128xf32> to vector<256x128xf32>
    %cst_94 = arith.constant dense<0.000000e+00> : vector<4x128xf32>
    %130 = tpu.matmul %127, %129, %cst_94 {dimension_numbers = #tpu.dot_dimension_numbers<[1], [0], [0], [1], [0, 0, 1, 1], [], []>} : vector<4x256xf32>, vector<256x128xf32>, vector<4x128xf32> -> vector<4x128xf32>
    %131 = arith.addf %125, %130 : vector<4x128xf32>
    %132 = vector.extract_strided_slice %114 {offsets = [0, 2, 0], sizes = [4, 1, 256], strides = [1, 1, 1]} : vector<4x8x256xf32> to vector<4x1x256xf32>
    %133 = vector.shape_cast %132 : vector<4x1x256xf32> to vector<4x256xf32>
    %c2_95 = arith.constant 2 : index
    %c0_96 = arith.constant 0 : index
    %c0_97 = arith.constant 0 : index
    %134 = vector.load %arg17[%c2_95, %c0_96, %c0_97] : memref<8x256x128xf32, #tpu.memory_space<vmem>>, vector<1x256x128xf32>
    %135 = vector.shape_cast %134 : vector<1x256x128xf32> to vector<256x128xf32>
    %cst_98 = arith.constant dense<0.000000e+00> : vector<4x128xf32>
    %136 = tpu.matmul %133, %135, %cst_98 {dimension_numbers = #tpu.dot_dimension_numbers<[1], [0], [0], [1], [0, 0, 1, 1], [], []>} : vector<4x256xf32>, vector<256x128xf32>, vector<4x128xf32> -> vector<4x128xf32>
    %137 = arith.addf %131, %136 : vector<4x128xf32>
    %138 = vector.extract_strided_slice %114 {offsets = [0, 3, 0], sizes = [4, 1, 256], strides = [1, 1, 1]} : vector<4x8x256xf32> to vector<4x1x256xf32>
    %139 = vector.shape_cast %138 : vector<4x1x256xf32> to vector<4x256xf32>
    %c3 = arith.constant 3 : index
    %c0_99 = arith.constant 0 : index
    %c0_100 = arith.constant 0 : index
    %140 = vector.load %arg17[%c3, %c0_99, %c0_100] : memref<8x256x128xf32, #tpu.memory_space<vmem>>, vector<1x256x128xf32>
    %141 = vector.shape_cast %140 : vector<1x256x128xf32> to vector<256x128xf32>
    %cst_101 = arith.constant dense<0.000000e+00> : vector<4x128xf32>
    %142 = tpu.matmul %139, %141, %cst_101 {dimension_numbers = #tpu.dot_dimension_numbers<[1], [0], [0], [1], [0, 0, 1, 1], [], []>} : vector<4x256xf32>, vector<256x128xf32>, vector<4x128xf32> -> vector<4x128xf32>
    %143 = arith.addf %137, %142 : vector<4x128xf32>
    %144 = vector.extract_strided_slice %114 {offsets = [0, 4, 0], sizes = [4, 1, 256], strides = [1, 1, 1]} : vector<4x8x256xf32> to vector<4x1x256xf32>
    %145 = vector.shape_cast %144 : vector<4x1x256xf32> to vector<4x256xf32>
    %c4 = arith.constant 4 : index
    %c0_102 = arith.constant 0 : index
    %c0_103 = arith.constant 0 : index
    %146 = vector.load %arg17[%c4, %c0_102, %c0_103] : memref<8x256x128xf32, #tpu.memory_space<vmem>>, vector<1x256x128xf32>
    %147 = vector.shape_cast %146 : vector<1x256x128xf32> to vector<256x128xf32>
    %cst_104 = arith.constant dense<0.000000e+00> : vector<4x128xf32>
    %148 = tpu.matmul %145, %147, %cst_104 {dimension_numbers = #tpu.dot_dimension_numbers<[1], [0], [0], [1], [0, 0, 1, 1], [], []>} : vector<4x256xf32>, vector<256x128xf32>, vector<4x128xf32> -> vector<4x128xf32>
    %149 = arith.addf %143, %148 : vector<4x128xf32>
    %150 = vector.extract_strided_slice %114 {offsets = [0, 5, 0], sizes = [4, 1, 256], strides = [1, 1, 1]} : vector<4x8x256xf32> to vector<4x1x256xf32>
    %151 = vector.shape_cast %150 : vector<4x1x256xf32> to vector<4x256xf32>
    %c5 = arith.constant 5 : index
    %c0_105 = arith.constant 0 : index
    %c0_106 = arith.constant 0 : index
    %152 = vector.load %arg17[%c5, %c0_105, %c0_106] : memref<8x256x128xf32, #tpu.memory_space<vmem>>, vector<1x256x128xf32>
    %153 = vector.shape_cast %152 : vector<1x256x128xf32> to vector<256x128xf32>
    %cst_107 = arith.constant dense<0.000000e+00> : vector<4x128xf32>
    %154 = tpu.matmul %151, %153, %cst_107 {dimension_numbers = #tpu.dot_dimension_numbers<[1], [0], [0], [1], [0, 0, 1, 1], [], []>} : vector<4x256xf32>, vector<256x128xf32>, vector<4x128xf32> -> vector<4x128xf32>
    %155 = arith.addf %149, %154 : vector<4x128xf32>
    %156 = vector.extract_strided_slice %114 {offsets = [0, 6, 0], sizes = [4, 1, 256], strides = [1, 1, 1]} : vector<4x8x256xf32> to vector<4x1x256xf32>
    %157 = vector.shape_cast %156 : vector<4x1x256xf32> to vector<4x256xf32>
    %c6 = arith.constant 6 : index
    %c0_108 = arith.constant 0 : index
    %c0_109 = arith.constant 0 : index
    %158 = vector.load %arg17[%c6, %c0_108, %c0_109] : memref<8x256x128xf32, #tpu.memory_space<vmem>>, vector<1x256x128xf32>
    %159 = vector.shape_cast %158 : vector<1x256x128xf32> to vector<256x128xf32>
    %cst_110 = arith.constant dense<0.000000e+00> : vector<4x128xf32>
    %160 = tpu.matmul %157, %159, %cst_110 {dimension_numbers = #tpu.dot_dimension_numbers<[1], [0], [0], [1], [0, 0, 1, 1], [], []>} : vector<4x256xf32>, vector<256x128xf32>, vector<4x128xf32> -> vector<4x128xf32>
    %161 = arith.addf %155, %160 : vector<4x128xf32>
    %162 = vector.extract_strided_slice %114 {offsets = [0, 7, 0], sizes = [4, 1, 256], strides = [1, 1, 1]} : vector<4x8x256xf32> to vector<4x1x256xf32>
    %163 = vector.shape_cast %162 : vector<4x1x256xf32> to vector<4x256xf32>
    %c7 = arith.constant 7 : index
    %c0_111 = arith.constant 0 : index
    %c0_112 = arith.constant 0 : index
    %164 = vector.load %arg17[%c7, %c0_111, %c0_112] : memref<8x256x128xf32, #tpu.memory_space<vmem>>, vector<1x256x128xf32>
    %165 = vector.shape_cast %164 : vector<1x256x128xf32> to vector<256x128xf32>
    %cst_113 = arith.constant dense<0.000000e+00> : vector<4x128xf32>
    %166 = tpu.matmul %163, %165, %cst_113 {dimension_numbers = #tpu.dot_dimension_numbers<[1], [0], [0], [1], [0, 0, 1, 1], [], []>} : vector<4x256xf32>, vector<256x128xf32>, vector<4x128xf32> -> vector<4x128xf32>
    %167 = arith.addf %161, %166 : vector<4x128xf32>
    %cst_114 = arith.constant 0.000000e+00 : f32
    %168 = vector.broadcast %cst_114 : f32 to vector<4x128xf32>
    %169 = arith.maximumf %167, %168 : vector<4x128xf32>
    %c0_115 = arith.constant 0 : index
    %c0_116 = arith.constant 0 : index
    %170 = vector.load %arg20[%c0_115, %c0_116] : memref<128x128xf32, #tpu.memory_space<vmem>>, vector<128x128xf32>
    %cst_117 = arith.constant dense<0.000000e+00> : vector<4x128xf32>
    %171 = tpu.matmul %169, %170, %cst_117 {dimension_numbers = #tpu.dot_dimension_numbers<[1], [0], [0], [1], [0, 0, 1, 1], [], []>} : vector<4x128xf32>, vector<128x128xf32>, vector<4x128xf32> -> vector<4x128xf32>
    %c0_118 = arith.constant 0 : index
    %c0_119 = arith.constant 0 : index
    %172 = vector.load %arg22[%c0_118, %c0_119] : memref<1x128xf32, #tpu.memory_space<vmem>>, vector<1x128xf32>
    %173 = vector.broadcast %172 : vector<1x128xf32> to vector<4x128xf32>
    %174 = arith.addf %171, %173 : vector<4x128xf32>
    %c0_120 = arith.constant 0 : index
    %c0_121 = arith.constant 0 : index
    %c0_122 = arith.constant 0 : index
    %175 = vector.load %arg3[%c0_120, %c0_121, %c0_122] : memref<1x1x32xf32, #tpu.memory_space<vmem>>, vector<1x1x32xf32>
    %176 = vector.shape_cast %175 : vector<1x1x32xf32> to vector<1x32xf32>
    %c0_123 = arith.constant 0 : index
    %c0_124 = arith.constant 0 : index
    %c0_125 = arith.constant 0 : index
    %177 = vector.load %arg4[%c0_123, %c0_124, %c0_125] : memref<1x1x32xf32, #tpu.memory_space<vmem>>, vector<1x1x32xf32>
    %178 = vector.shape_cast %177 : vector<1x1x32xf32> to vector<1x32xf32>
    %c0_126 = arith.constant 0 : index
    %c0_127 = arith.constant 0 : index
    %179 = vector.load %arg21[%c0_126, %c0_127] : memref<32x128xf32, #tpu.memory_space<vmem>>, vector<32x128xf32>
    %180 = vector.extract_strided_slice %174 {offsets = [0, 0], sizes = [1, 128], strides = [1, 1]} : vector<4x128xf32> to vector<1x128xf32>
    %cst_128 = arith.constant dense<0.000000e+00> : vector<1x128xf32>
    %181 = tpu.matmul %176, %179, %cst_128 {dimension_numbers = #tpu.dot_dimension_numbers<[1], [0], [0], [1], [0, 0, 1, 1], [], []>} : vector<1x32xf32>, vector<32x128xf32>, vector<1x128xf32> -> vector<1x128xf32>
    %182 = arith.addf %180, %181 : vector<1x128xf32>
    %183 = vector.extract_strided_slice %182 {offsets = [0, 0], sizes = [1, 32], strides = [1, 1]} : vector<1x128xf32> to vector<1x32xf32>
    %184 = arith.negf %183 : vector<1x32xf32>
    %185 = math.exp %184 : vector<1x32xf32>
    %cst_129 = arith.constant 1.000000e+00 : f32
    %186 = vector.broadcast %cst_129 : f32 to vector<1x32xf32>
    %187 = arith.addf %186, %185 : vector<1x32xf32>
    %188 = arith.divf %186, %187 : vector<1x32xf32>
    %189 = vector.extract_strided_slice %182 {offsets = [0, 32], sizes = [1, 32], strides = [1, 1]} : vector<1x128xf32> to vector<1x32xf32>
    %190 = arith.negf %189 : vector<1x32xf32>
    %191 = math.exp %190 : vector<1x32xf32>
    %cst_130 = arith.constant 1.000000e+00 : f32
    %192 = vector.broadcast %cst_130 : f32 to vector<1x32xf32>
    %193 = arith.addf %192, %191 : vector<1x32xf32>
    %194 = arith.divf %192, %193 : vector<1x32xf32>
    %195 = vector.extract_strided_slice %182 {offsets = [0, 64], sizes = [1, 32], strides = [1, 1]} : vector<1x128xf32> to vector<1x32xf32>
    %196 = math.tanh %195 : vector<1x32xf32>
    %197 = vector.extract_strided_slice %182 {offsets = [0, 96], sizes = [1, 32], strides = [1, 1]} : vector<1x128xf32> to vector<1x32xf32>
    %198 = arith.negf %197 : vector<1x32xf32>
    %199 = math.exp %198 : vector<1x32xf32>
    %cst_131 = arith.constant 1.000000e+00 : f32
    %200 = vector.broadcast %cst_131 : f32 to vector<1x32xf32>
    %201 = arith.addf %200, %199 : vector<1x32xf32>
    %202 = arith.divf %200, %201 : vector<1x32xf32>
    %203 = arith.mulf %194, %178 : vector<1x32xf32>
    %204 = arith.mulf %188, %196 : vector<1x32xf32>
    %205 = arith.addf %203, %204 : vector<1x32xf32>
    %206 = math.tanh %205 : vector<1x32xf32>
    %207 = arith.mulf %202, %206 : vector<1x32xf32>
    %208 = vector.extract_strided_slice %174 {offsets = [1, 0], sizes = [1, 128], strides = [1, 1]} : vector<4x128xf32> to vector<1x128xf32>
    %cst_132 = arith.constant dense<0.000000e+00> : vector<1x128xf32>
    %209 = tpu.matmul %207, %179, %cst_132 {dimension_numbers = #tpu.dot_dimension_numbers<[1], [0], [0], [1], [0, 0, 1, 1], [], []>} : vector<1x32xf32>, vector<32x128xf32>, vector<1x128xf32> -> vector<1x128xf32>
    %210 = arith.addf %208, %209 : vector<1x128xf32>
    %211 = vector.extract_strided_slice %210 {offsets = [0, 0], sizes = [1, 32], strides = [1, 1]} : vector<1x128xf32> to vector<1x32xf32>
    %212 = arith.negf %211 : vector<1x32xf32>
    %213 = math.exp %212 : vector<1x32xf32>
    %cst_133 = arith.constant 1.000000e+00 : f32
    %214 = vector.broadcast %cst_133 : f32 to vector<1x32xf32>
    %215 = arith.addf %214, %213 : vector<1x32xf32>
    %216 = arith.divf %214, %215 : vector<1x32xf32>
    %217 = vector.extract_strided_slice %210 {offsets = [0, 32], sizes = [1, 32], strides = [1, 1]} : vector<1x128xf32> to vector<1x32xf32>
    %218 = arith.negf %217 : vector<1x32xf32>
    %219 = math.exp %218 : vector<1x32xf32>
    %cst_134 = arith.constant 1.000000e+00 : f32
    %220 = vector.broadcast %cst_134 : f32 to vector<1x32xf32>
    %221 = arith.addf %220, %219 : vector<1x32xf32>
    %222 = arith.divf %220, %221 : vector<1x32xf32>
    %223 = vector.extract_strided_slice %210 {offsets = [0, 64], sizes = [1, 32], strides = [1, 1]} : vector<1x128xf32> to vector<1x32xf32>
    %224 = math.tanh %223 : vector<1x32xf32>
    %225 = vector.extract_strided_slice %210 {offsets = [0, 96], sizes = [1, 32], strides = [1, 1]} : vector<1x128xf32> to vector<1x32xf32>
    %226 = arith.negf %225 : vector<1x32xf32>
    %227 = math.exp %226 : vector<1x32xf32>
    %cst_135 = arith.constant 1.000000e+00 : f32
    %228 = vector.broadcast %cst_135 : f32 to vector<1x32xf32>
    %229 = arith.addf %228, %227 : vector<1x32xf32>
    %230 = arith.divf %228, %229 : vector<1x32xf32>
    %231 = arith.mulf %222, %205 : vector<1x32xf32>
    %232 = arith.mulf %216, %224 : vector<1x32xf32>
    %233 = arith.addf %231, %232 : vector<1x32xf32>
    %234 = math.tanh %233 : vector<1x32xf32>
    %235 = arith.mulf %230, %234 : vector<1x32xf32>
    %236 = vector.extract_strided_slice %174 {offsets = [2, 0], sizes = [1, 128], strides = [1, 1]} : vector<4x128xf32> to vector<1x128xf32>
    %cst_136 = arith.constant dense<0.000000e+00> : vector<1x128xf32>
    %237 = tpu.matmul %235, %179, %cst_136 {dimension_numbers = #tpu.dot_dimension_numbers<[1], [0], [0], [1], [0, 0, 1, 1], [], []>} : vector<1x32xf32>, vector<32x128xf32>, vector<1x128xf32> -> vector<1x128xf32>
    %238 = arith.addf %236, %237 : vector<1x128xf32>
    %239 = vector.extract_strided_slice %238 {offsets = [0, 0], sizes = [1, 32], strides = [1, 1]} : vector<1x128xf32> to vector<1x32xf32>
    %240 = arith.negf %239 : vector<1x32xf32>
    %241 = math.exp %240 : vector<1x32xf32>
    %cst_137 = arith.constant 1.000000e+00 : f32
    %242 = vector.broadcast %cst_137 : f32 to vector<1x32xf32>
    %243 = arith.addf %242, %241 : vector<1x32xf32>
    %244 = arith.divf %242, %243 : vector<1x32xf32>
    %245 = vector.extract_strided_slice %238 {offsets = [0, 32], sizes = [1, 32], strides = [1, 1]} : vector<1x128xf32> to vector<1x32xf32>
    %246 = arith.negf %245 : vector<1x32xf32>
    %247 = math.exp %246 : vector<1x32xf32>
    %cst_138 = arith.constant 1.000000e+00 : f32
    %248 = vector.broadcast %cst_138 : f32 to vector<1x32xf32>
    %249 = arith.addf %248, %247 : vector<1x32xf32>
    %250 = arith.divf %248, %249 : vector<1x32xf32>
    %251 = vector.extract_strided_slice %238 {offsets = [0, 64], sizes = [1, 32], strides = [1, 1]} : vector<1x128xf32> to vector<1x32xf32>
    %252 = math.tanh %251 : vector<1x32xf32>
    %253 = vector.extract_strided_slice %238 {offsets = [0, 96], sizes = [1, 32], strides = [1, 1]} : vector<1x128xf32> to vector<1x32xf32>
    %254 = arith.negf %253 : vector<1x32xf32>
    %255 = math.exp %254 : vector<1x32xf32>
    %cst_139 = arith.constant 1.000000e+00 : f32
    %256 = vector.broadcast %cst_139 : f32 to vector<1x32xf32>
    %257 = arith.addf %256, %255 : vector<1x32xf32>
    %258 = arith.divf %256, %257 : vector<1x32xf32>
    %259 = arith.mulf %250, %233 : vector<1x32xf32>
    %260 = arith.mulf %244, %252 : vector<1x32xf32>
    %261 = arith.addf %259, %260 : vector<1x32xf32>
    %262 = math.tanh %261 : vector<1x32xf32>
    %263 = arith.mulf %258, %262 : vector<1x32xf32>
    %264 = vector.extract_strided_slice %174 {offsets = [3, 0], sizes = [1, 128], strides = [1, 1]} : vector<4x128xf32> to vector<1x128xf32>
    %cst_140 = arith.constant dense<0.000000e+00> : vector<1x128xf32>
    %265 = tpu.matmul %263, %179, %cst_140 {dimension_numbers = #tpu.dot_dimension_numbers<[1], [0], [0], [1], [0, 0, 1, 1], [], []>} : vector<1x32xf32>, vector<32x128xf32>, vector<1x128xf32> -> vector<1x128xf32>
    %266 = arith.addf %264, %265 : vector<1x128xf32>
    %267 = vector.extract_strided_slice %266 {offsets = [0, 0], sizes = [1, 32], strides = [1, 1]} : vector<1x128xf32> to vector<1x32xf32>
    %268 = arith.negf %267 : vector<1x32xf32>
    %269 = math.exp %268 : vector<1x32xf32>
    %cst_141 = arith.constant 1.000000e+00 : f32
    %270 = vector.broadcast %cst_141 : f32 to vector<1x32xf32>
    %271 = arith.addf %270, %269 : vector<1x32xf32>
    %272 = arith.divf %270, %271 : vector<1x32xf32>
    %273 = vector.extract_strided_slice %266 {offsets = [0, 32], sizes = [1, 32], strides = [1, 1]} : vector<1x128xf32> to vector<1x32xf32>
    %274 = arith.negf %273 : vector<1x32xf32>
    %275 = math.exp %274 : vector<1x32xf32>
    %cst_142 = arith.constant 1.000000e+00 : f32
    %276 = vector.broadcast %cst_142 : f32 to vector<1x32xf32>
    %277 = arith.addf %276, %275 : vector<1x32xf32>
    %278 = arith.divf %276, %277 : vector<1x32xf32>
    %279 = vector.extract_strided_slice %266 {offsets = [0, 64], sizes = [1, 32], strides = [1, 1]} : vector<1x128xf32> to vector<1x32xf32>
    %280 = math.tanh %279 : vector<1x32xf32>
    %281 = vector.extract_strided_slice %266 {offsets = [0, 96], sizes = [1, 32], strides = [1, 1]} : vector<1x128xf32> to vector<1x32xf32>
    %282 = arith.negf %281 : vector<1x32xf32>
    %283 = math.exp %282 : vector<1x32xf32>
    %cst_143 = arith.constant 1.000000e+00 : f32
    %284 = vector.broadcast %cst_143 : f32 to vector<1x32xf32>
    %285 = arith.addf %284, %283 : vector<1x32xf32>
    %286 = arith.divf %284, %285 : vector<1x32xf32>
    %287 = arith.mulf %278, %261 : vector<1x32xf32>
    %288 = arith.mulf %272, %280 : vector<1x32xf32>
    %289 = arith.addf %287, %288 : vector<1x32xf32>
    %290 = math.tanh %289 : vector<1x32xf32>
    %291 = arith.mulf %286, %290 : vector<1x32xf32>
    %292 = tpu.concatenate %207, %235, %263, %291 in 0 : vector<1x32xf32>, vector<1x32xf32>, vector<1x32xf32>, vector<1x32xf32> -> vector<4x32xf32>
    %c0_144 = arith.constant 0 : index
    %c0_145 = arith.constant 0 : index
    %293 = vector.load %arg23[%c0_144, %c0_145] : memref<32x6xf32, #tpu.memory_space<vmem>>, vector<32x6xf32>
    %cst_146 = arith.constant dense<0.000000e+00> : vector<4x6xf32>
    %294 = tpu.matmul %292, %293, %cst_146 {dimension_numbers = #tpu.dot_dimension_numbers<[1], [0], [0], [1], [0, 0, 1, 1], [], []>} : vector<4x32xf32>, vector<32x6xf32>, vector<4x6xf32> -> vector<4x6xf32>
    %c0_147 = arith.constant 0 : index
    %c0_148 = arith.constant 0 : index
    %295 = vector.load %arg24[%c0_147, %c0_148] : memref<1x6xf32, #tpu.memory_space<vmem>>, vector<1x6xf32>
    %296 = vector.broadcast %295 : vector<1x6xf32> to vector<4x6xf32>
    %297 = arith.addf %294, %296 : vector<4x6xf32>
    %c0_149 = arith.constant 0 : index
    %c0_150 = arith.constant 0 : index
    %c0_151 = arith.constant 0 : index
    %298 = vector.load %arg25[%c0_149, %c0_150, %c0_151] : memref<1x4x6xf32, #tpu.memory_space<vmem>>, vector<1x4x6xf32>
    %299 = vector.shape_cast %298 : vector<1x4x6xf32> to vector<4x6xf32>
    %300 = vector.shape_cast %297 : vector<4x6xf32> to vector<1x4x6xf32>
    tpu.vector_store %arg25[%c0_149, %c0_150, %c0_151], %300 {strides = array<i32>} : memref<1x4x6xf32, #tpu.memory_space<vmem>>, vector<1x4x6xf32>,
    %c0_152 = arith.constant 0 : index
    %c0_153 = arith.constant 0 : index
    %c0_154 = arith.constant 0 : index
    %301 = vector.load %arg26[%c0_152, %c0_153, %c0_154] : memref<1x1x32xf32, #tpu.memory_space<vmem>>, vector<1x1x32xf32>
    %302 = vector.shape_cast %301 : vector<1x1x32xf32> to vector<1x32xf32>
    %303 = vector.shape_cast %291 : vector<1x32xf32> to vector<1x1x32xf32>
    tpu.vector_store %arg26[%c0_152, %c0_153, %c0_154], %303 {strides = array<i32>} : memref<1x1x32xf32, #tpu.memory_space<vmem>>, vector<1x1x32xf32>,
    %c0_155 = arith.constant 0 : index
    %c0_156 = arith.constant 0 : index
    %c0_157 = arith.constant 0 : index
    %304 = vector.load %arg27[%c0_155, %c0_156, %c0_157] : memref<1x1x32xf32, #tpu.memory_space<vmem>>, vector<1x1x32xf32>
    %305 = vector.shape_cast %304 : vector<1x1x32xf32> to vector<1x32xf32>
    %306 = vector.shape_cast %289 : vector<1x32xf32> to vector<1x1x32xf32>
    tpu.vector_store %arg27[%c0_155, %c0_156, %c0_157], %306 {strides = array<i32>} : memref<1x1x32xf32, #tpu.memory_space<vmem>>, vector<1x1x32xf32>,
    return
  }
  func.func @transform_0(%arg0: i32) -> (i32, i32, i32, i32) {
    %c0_i32 = arith.constant 0 : i32
    %c0_i32_0 = arith.constant 0 : i32
    %c0_i32_1 = arith.constant 0 : i32
    %c0_i32_2 = arith.constant 0 : i32
    return %arg0, %c0_i32, %c0_i32_0, %c0_i32_1 : i32, i32, i32, i32
  }
  func.func @transform_1(%arg0: i32) -> (i32, i32, i32) {
    %c0_i32 = arith.constant 0 : i32
    %c0_i32_0 = arith.constant 0 : i32
    %c0_i32_1 = arith.constant 0 : i32
    return %arg0, %c0_i32, %c0_i32_0 : i32, i32, i32
  }
  func.func @transform_2(%arg0: i32) -> (i32, i32, i32) {
    %c0_i32 = arith.constant 0 : i32
    %c0_i32_0 = arith.constant 0 : i32
    %c0_i32_1 = arith.constant 0 : i32
    return %arg0, %c0_i32, %c0_i32_0 : i32, i32, i32
  }
  func.func @transform_3(%arg0: i32) -> (i32, i32, i32) {
    %c0_i32 = arith.constant 0 : i32
    %c0_i32_0 = arith.constant 0 : i32
    %c0_i32_1 = arith.constant 0 : i32
    return %arg0, %c0_i32, %c0_i32_0 : i32, i32, i32
  }
  func.func @transform_4(%arg0: i32) -> (i32, i32, i32) {
    %c0_i32 = arith.constant 0 : i32
    %c0_i32_0 = arith.constant 0 : i32
    %c0_i32_1 = arith.constant 0 : i32
    %c0_i32_2 = arith.constant 0 : i32
    return %c0_i32, %c0_i32_0, %c0_i32_1 : i32, i32, i32
  }
  func.func @transform_5(%arg0: i32) -> (i32, i32) {
    %c0_i32 = arith.constant 0 : i32
    %c0_i32_0 = arith.constant 0 : i32
    %c0_i32_1 = arith.constant 0 : i32
    return %c0_i32, %c0_i32_0 : i32, i32
  }
  func.func @transform_6(%arg0: i32) -> (i32, i32, i32) {
    %c0_i32 = arith.constant 0 : i32
    %c0_i32_0 = arith.constant 0 : i32
    %c0_i32_1 = arith.constant 0 : i32
    %c0_i32_2 = arith.constant 0 : i32
    return %c0_i32, %c0_i32_0, %c0_i32_1 : i32, i32, i32
  }
  func.func @transform_7(%arg0: i32) -> (i32, i32) {
    %c0_i32 = arith.constant 0 : i32
    %c0_i32_0 = arith.constant 0 : i32
    %c0_i32_1 = arith.constant 0 : i32
    return %c0_i32, %c0_i32_0 : i32, i32
  }
  func.func @transform_8(%arg0: i32) -> (i32, i32) {
    %c0_i32 = arith.constant 0 : i32
    %c0_i32_0 = arith.constant 0 : i32
    %c0_i32_1 = arith.constant 0 : i32
    return %c0_i32, %c0_i32_0 : i32, i32
  }
  func.func @transform_9(%arg0: i32) -> (i32, i32) {
    %c0_i32 = arith.constant 0 : i32
    %c0_i32_0 = arith.constant 0 : i32
    %c0_i32_1 = arith.constant 0 : i32
    return %c0_i32, %c0_i32_0 : i32, i32
  }
  func.func @transform_10(%arg0: i32) -> (i32, i32) {
    %c0_i32 = arith.constant 0 : i32
    %c0_i32_0 = arith.constant 0 : i32
    %c0_i32_1 = arith.constant 0 : i32
    return %c0_i32, %c0_i32_0 : i32, i32
  }
  func.func @transform_11(%arg0: i32) -> (i32, i32) {
    %c0_i32 = arith.constant 0 : i32
    %c0_i32_0 = arith.constant 0 : i32
    %c0_i32_1 = arith.constant 0 : i32
    return %c0_i32, %c0_i32_0 : i32, i32
  }
  func.func @transform_12(%arg0: i32) -> (i32, i32) {
    %c0_i32 = arith.constant 0 : i32
    %c0_i32_0 = arith.constant 0 : i32
    %c0_i32_1 = arith.constant 0 : i32
    return %c0_i32, %c0_i32_0 : i32, i32
  }
  func.func @transform_13(%arg0: i32) -> (i32, i32) {
    %c0_i32 = arith.constant 0 : i32
    %c0_i32_0 = arith.constant 0 : i32
    %c0_i32_1 = arith.constant 0 : i32
    return %c0_i32, %c0_i32_0 : i32, i32
  }
  func.func @transform_14(%arg0: i32) -> (i32, i32) {
    %c0_i32 = arith.constant 0 : i32
    %c0_i32_0 = arith.constant 0 : i32
    %c0_i32_1 = arith.constant 0 : i32
    return %c0_i32, %c0_i32_0 : i32, i32
  }
  func.func @transform_15(%arg0: i32) -> (i32, i32) {
    %c0_i32 = arith.constant 0 : i32
    %c0_i32_0 = arith.constant 0 : i32
    %c0_i32_1 = arith.constant 0 : i32
    return %c0_i32, %c0_i32_0 : i32, i32
  }
  func.func @transform_16(%arg0: i32) -> (i32, i32, i32) {
    %c0_i32 = arith.constant 0 : i32
    %c0_i32_0 = arith.constant 0 : i32
    %c0_i32_1 = arith.constant 0 : i32
    %c0_i32_2 = arith.constant 0 : i32
    return %c0_i32, %c0_i32_0, %c0_i32_1 : i32, i32, i32
  }
  func.func @transform_17(%arg0: i32) -> (i32, i32) {
    %c0_i32 = arith.constant 0 : i32
    %c0_i32_0 = arith.constant 0 : i32
    %c0_i32_1 = arith.constant 0 : i32
    return %c0_i32, %c0_i32_0 : i32, i32
  }
  func.func @transform_18(%arg0: i32) -> (i32, i32) {
    %c0_i32 = arith.constant 0 : i32
    %c0_i32_0 = arith.constant 0 : i32
    %c0_i32_1 = arith.constant 0 : i32
    return %c0_i32, %c0_i32_0 : i32, i32
  }
  func.func @transform_19(%arg0: i32) -> (i32, i32) {
    %c0_i32 = arith.constant 0 : i32
    %c0_i32_0 = arith.constant 0 : i32
    %c0_i32_1 = arith.constant 0 : i32
    return %c0_i32, %c0_i32_0 : i32, i32
  }
  func.func @transform_20(%arg0: i32) -> (i32, i32) {
    %c0_i32 = arith.constant 0 : i32
    %c0_i32_0 = arith.constant 0 : i32
    %c0_i32_1 = arith.constant 0 : i32
    return %c0_i32, %c0_i32_0 : i32, i32
  }
  func.func @transform_21(%arg0: i32) -> (i32, i32) {
    %c0_i32 = arith.constant 0 : i32
    %c0_i32_0 = arith.constant 0 : i32
    %c0_i32_1 = arith.constant 0 : i32
    return %c0_i32, %c0_i32_0 : i32, i32
  }
  func.func @transform_22(%arg0: i32) -> (i32, i32) {
    %c0_i32 = arith.constant 0 : i32
    %c0_i32_0 = arith.constant 0 : i32
    %c0_i32_1 = arith.constant 0 : i32
    return %c0_i32, %c0_i32_0 : i32, i32
  }
  func.func @transform_23(%arg0: i32) -> (i32, i32) {
    %c0_i32 = arith.constant 0 : i32
    %c0_i32_0 = arith.constant 0 : i32
    %c0_i32_1 = arith.constant 0 : i32
    return %c0_i32, %c0_i32_0 : i32, i32
  }
  func.func @transform_24(%arg0: i32) -> (i32, i32, i32) {
    %c0_i32 = arith.constant 0 : i32
    %c0_i32_0 = arith.constant 0 : i32
    %c0_i32_1 = arith.constant 0 : i32
    return %arg0, %c0_i32, %c0_i32_0 : i32, i32, i32
  }
  func.func @transform_25(%arg0: i32) -> (i32, i32, i32) {
    %c0_i32 = arith.constant 0 : i32
    %c0_i32_0 = arith.constant 0 : i32
    %c0_i32_1 = arith.constant 0 : i32
    return %arg0, %c0_i32, %c0_i32_0 : i32, i32, i32
  }
  func.func @transform_26(%arg0: i32) -> (i32, i32, i32) {
    %c0_i32 = arith.constant 0 : i32
    %c0_i32_0 = arith.constant 0 : i32
    %c0_i32_1 = arith.constant 0 : i32
    return %arg0, %c0_i32, %c0_i32_0 : i32, i32, i32
  }
}

</mosaic_0001>

<bundles_post_ra>
// kernel: grnn_forward.1
= control target key start
LH: loop header
LB: loop body
LE: loop exit
PB: predicated region body
PF: predicated region fallthrough
CT: control target
= control target key end

     0   :  { %s5390_s0 = inlined_call_operand.vmem [shape: f32[2,4,10,32], index: 0, kind: input, shape index: {}]   ;;  %s5391_s1 = inlined_call_operand.vmem [shape: f32[2,32,32], index: 1, kind: input, shape index: {}]   ;;  %s5392_s2 = inlined_call_operand.vmem [shape: f32[2,1,32], index: 2, kind: input, shape index: {}]   ;;  %s5393_s3 = inlined_call_operand.vmem [shape: f32[2,1,32], index: 3, kind: input, shape index: {}]   ;;  %s5394_s4 = inlined_call_operand.vmem [shape: f32[3,32,256], index: 4, kind: input, shape index: {}]   ;;  %s5395_s5 = inlined_call_operand.vmem [shape: f32[1,256], index: 5, kind: input, shape index: {}]   ;;  %s5396_s6 = inlined_call_operand.hbm [shape: f32[3,256,256], index: 6, kind: input, shape index: {}]   ;;  %s5397_s7 = inlined_call_operand.vmem [shape: f32[1,256], index: 7, kind: input, shape index: {}]   ;;  %s5398_s8 = inlined_call_operand.vmem [shape: f32[32,64], index: 8, kind: input, shape index: {}]   ;;  %s5399_s9 = inlined_call_operand.vmem [shape: f32[1,64], index: 9, kind: input, shape index: {}]   ;;  %s5400_s10 = inlined_call_operand.vmem [shape: f32[64,64], index: 10, kind: input, shape index: {}]   ;;  %s5401_s11 = inlined_call_operand.vmem [shape: f32[1,64], index: 11, kind: input, shape index: {}]   ;;  %s5402_s12 = inlined_call_operand.vmem [shape: f32[64,64], index: 12, kind: input, shape index: {}]   ;;  %s5403_s13 = inlined_call_operand.vmem [shape: f32[1,64], index: 13, kind: input, shape index: {}]   ;;  %s5404_s14 = inlined_call_operand.vmem [shape: f32[64,64], index: 14, kind: input, shape index: {}]   ;;  %s5405_s15 = inlined_call_operand.vmem [shape: f32[1,64], index: 15, kind: input, shape index: {}]   ;;  %s5406_s16 = inlined_call_operand.hbm [shape: f32[8,256,128], index: 16, kind: input, shape index: {}]   ;;  %s5407_s17 = inlined_call_operand.vmem [shape: f32[64,128], index: 17, kind: input, shape index: {}]   ;;  %s5408_s18 = inlined_call_operand.vmem [shape: f32[1,128], index: 18, kind: input, shape index: {}]   ;;  %s5409_s19 = inlined_call_operand.vmem [shape: f32[128,128], index: 19, kind: input, shape index: {}]   ;;  %s5410_s20 = inlined_call_operand.vmem [shape: f32[32,128], index: 20, kind: input, shape index: {}]   ;;  %s5411_s21 = inlined_call_operand.vmem [shape: f32[1,128], index: 21, kind: input, shape index: {}]   ;;  %s5412_s22 = inlined_call_operand.vmem [shape: f32[32,6], index: 22, kind: input, shape index: {}]   ;;  %s5413_s23 = inlined_call_operand.vmem [shape: f32[1,6], index: 23, kind: input, shape index: {}]   ;;  %s5414_s24 = inlined_call_operand.hbm [shape: f32[2,4,6], index: 24, kind: output, shape index: {0}]   ;;  %s5415_s25 = inlined_call_operand.hbm [shape: f32[2,1,32], index: 25, kind: output, shape index: {1}]   ;;  %s5416_s26 = inlined_call_operand.hbm [shape: f32[2,1,32], index: 26, kind: output, shape index: {2}]  }
   0x1   :  { %5432 = sst [smem:[#allocation22_spill]] %s5390_s0 }
   0x2   :  { %5433 = sst [smem:[#allocation23_spill]] %s5391_s1 }
   0x3   :  { %5434 = sst [smem:[#allocation24_spill]] %s5392_s2 }
   0x4   :  { %5435 = sst [smem:[#allocation25_spill]] %s5393_s3 }
   0x5   :  { %5436 = sst [smem:[#allocation26_spill]] %s5394_s4 }
   0x6   :  { %5437 = sst [smem:[#allocation27_spill]] %s5395_s5 }
   0x7   :  { %5438 = sst [smem:[#allocation28_spill]] %s5396_s6 }
   0x8   :  { %5439 = sst [smem:[#allocation29_spill]] %s5397_s7 }
   0x9   :  { %5440 = sst [smem:[#allocation30_spill]] %s5398_s8 }
   0xa   :  { %5441 = sst [smem:[#allocation31_spill]] %s5399_s9 }
   0xb   :  { %5442 = sst [smem:[#allocation32_spill]] %s5400_s10 }
   0xc   :  { %5443 = sst [smem:[#allocation33_spill]] %s5401_s11 }
   0xd   :  { %5444 = sst [smem:[#allocation34_spill]] %s5402_s12 }
   0xe   :  { %5445 = sst [smem:[#allocation35_spill]] %s5413_s23 }
   0xf   :  { %32 = vsyncpa [#allocation4], 0 }
  0x10   :  { %33 = vsyncpa [#allocation7], 0 }
  0x11   :  { %34 = vsyncpa [#allocation5], 0 }
  0x12   :  { %36 = vsyncpa [#allocation5 + $0x1], 0 }
  0x13   :  { %37 = vsyncpa [#allocation10], 0 }
  0x14   :  { %39 = vsyncpa [#allocation10 + $0x1], 0  ;;  %s4307_s27 = smov 0   ;;  %s4309_s3 = smov 0  }
  0x15   :  { %s4311_s7 = smov 0   ;;  %s4313_s28 = smov 0  }
  0x16 LB: > { %5446 = sst [smem:[#allocation16_spill]] %s4147_s27  ;;  %s4328_s8 = sadd.s32 4294967295, %s4159_s28   ;;  %s4159_s28 = sphi %s4313_s28, %s5477_s28   ;;  %s4155_s7 = sphi %s4311_s7, %s5479_s7   ;;  %s4151_s3 = sphi %s4309_s3, %s5481_s3   ;;  %s4147_s27 = sphi %s4307_s27, %s5480_s27  }
  0x17   : > { %5447 = sst [smem:[#allocation17_spill]] %s4155_s7  ;;  %s5420_s4 = sadd.s32 4294967294, %s4159_s28  }
  0x18   : > { %5448 = sst [smem:[#allocation18_spill]] %s4159_s28  ;;  %s4332_s29 = sadd.s32 1, %s4159_s28  }
  0x19   : > { %5449 = sst [smem:[#allocation19_spill]] %s4332_s29  ;;  %s576_s0 = sadd.s32 1, %s4155_s7 }
  0x1a   : > { %s573_s9 = ssub.s32 %s4159_s28, %s4332_s29  ;;  %p586_p0 = scmp.ne.s32.totalorder %s4155_s7, %s4151_s3 }
  0x1b   : > { %p574_p1 = scmp.eq.s32.totalorder %s573_s9, 0  ;;  %p587_p2 = scmp.eq.s32.totalorder %s4328_s8, 1 }
  0x1c   : > { %p592_p3 = scmp.ne.s32.totalorder %s4151_s3, %s4147_s27  ;;  %p593_p4 = scmp.eq.s32.totalorder %s5420_s4, 1 }
  0x1d   : > { %s4345_s30 = scalar_select %p574_p1, %s4155_s7, %s576_s0  }
  0x1e   : > { %p4347_p5 = por %p587_p2, %p586_p0  ;;  %p4351_p6 = por %p593_p4, %p592_p3 }
  0x1f   : > { %5450 = sst [smem:[#allocation20_spill]] %s4345_s30  ;;  %p3739_p7 = scmp.ge.s32.totalorder %s4159_s28, 1 }
  0x20   : > { %s5452_s5 = scalar_select %p4351_p6, 1, 0 }
  0x21   : > { %p652_p8 = scmp.lt.s32.totalorder %s4159_s28, 3  ;;  %p3871_p9 = scmp.eq.s32.totalorder %s4328_s8, 0 }
  0x22   : > { %5453 = sst [smem:[#allocation21_spill]] %s5452_s5  ;;  %s4161_s4 = smov [#allocation3]  }
  0x23   : > { %p4358_p10 = pnand %p3739_p7, %p652_p8  ;;  %s5455_s9 = sld [smem:[#allocation28_spill]] }
  0x24   : > { %s671_s30 = sshll.u32 %s4161_s4, 4  ;;  %s710_s5 = sshll.u32 %s5406_s16, 4  ;;  %s672_s30 = int_to_ptr.vmem [resolvable:$true] %s671_s30  ;;  %s711_s5 = int_to_ptr.hbm [resolvable:$true] %s710_s5 }
  0x25   : > { %p3854_p11 = pneg %p4358_p10  ;;  %s4162_s27 = smov 256  }
  0x26   : > { %s4163_s28 = smov 16   ;;  %s4164_s23 = smov [#allocation6]  }
  0x27   : > { %p3855_p12 = pnand %p3871_p9, %p3854_p11  ;;  %s712_s6 = sshll.u32 %s4164_s23, 4  ;;  %s713_s6 = int_to_ptr.vmem [resolvable:$true] %s712_s6 }
  0x28   : > { %s4165_s1 = smov 128   ;;  %777 = sbr.rel (%p4358_p10) target bundleno = 4025 (0xfb9), region = 116 }
  0x29   : > { %s669_s0 = sshll.u32 %s5455_s9, 4  ;;  %s4166_s9 = smov 8   ;;  %s670_s0 = int_to_ptr.hbm [resolvable:$true] %s669_s0 }
  0x2a   : > { %3857 = dma.hbm_to_vmem [thread:$0]  (!%p3855_p12), %s670_s0, 24576, %s672_s30, [#allocation4], %s4162_s27, %s4162_s27, %s4163_s28  }
  0x2b   : > { %3860 = dma.hbm_to_vmem [thread:$0]  (!%p3855_p12), %s711_s5, 32768, %s713_s6, [#allocation7], %s4165_s1, %s4165_s1, %s4166_s9  }
  0x2d   : > { %4130 = dma.done.wait (%p3871_p9), [#allocation4], 24576  }
  0x2e   : > { %4132 = vsyncadd (%p3871_p9), [#allocation4], 4294942720 }
  0x2f   : > { %4134 = dma.done.wait (%p3871_p9), [#allocation7], 32768  }
  0x30   : > { %4136 = vsyncadd (%p3871_p9), [#allocation7], 4294934528  ;;  %p872_p13 = scmp.lt.s32.totalorder %s4328_s8, 1  ;;  %v892_v0 = vlaneseq  ;;  %v4167_v4 = vmov 0.0   ;;  %s5458_s4 = sld [smem:[#allocation23_spill]]  ;;  %vm927_vm3 = vcmask 261120  }
  0x31   : > { %s5459_s10 = sld [smem:[#allocation30_spill]]  ;;  %s5297_s1 = sand.u32 1, %s4151_s3  }
  0x32   : > { %s4384_s23 = scalar_select %p872_p13, %s4328_s8, 1  ;;  %v893_v1 = vshrl.u32 %v892_v0, 7  ;;  %v898_v2 = vand.u32 127, %v892_v0  ;;  %vm4386_vm0 = vcmp.lt.s32.totalorder %v892_v0, 256 }
  0x33   : > { %1625 = vst.msk [vmem:[#allocation2] ss:$8 sm:$0x3] %vm4386_vm0, %v4167_v4  ;;  %s5460_s28 = sld [smem:[#allocation32_spill]]  ;;  %s5431_s9 = scalar_lea.vmem [#allocation11], %s5297_s1 }
  0x34   : > { %s3835_s27 = sshll.u32 %s4384_s23, 5  ;;  %v896_v5 = vadd.s32 24, %v893_v1  ;;  %1628 = vst.msk [vmem:[#allocation2 + $0x20] ss:$8 sm:$0x3] %vm4386_vm0, %v4167_v4  ;;  %v894_v6 = vadd.s32 8, %v893_v1  ;;  %vm899_vm1 = vcmp.eq.s32.totalorder %v893_v1, %v898_v2 }
  0x35   : > { %1631 = vst.msk [vmem:[#allocation2 + $0x40] ss:$8 sm:$0x3] %vm4386_vm0, %v4167_v4  ;;  %v895_v7 = vadd.s32 16, %v893_v1  ;;  %v3751_v8 = vsel %vm899_vm1, 1.0, %v4167_v4  ;;  %s5462_s7 = sld [smem:[#allocation31_spill]] }
  0x36   : > { %s881_s29 = scalar_lea.vmem %s5458_s4, %s3835_s27  ;;  %vm902_vm2 = vcmp.eq.s32.totalorder %v896_v5, %v898_v2  ;;  %1634 = vst.msk [vmem:[#allocation2 + $0x60] ss:$8 sm:$0x3] %vm4386_vm0, %v4167_v4  ;;  %vm900_vm4 = vcmp.eq.s32.totalorder %v894_v6, %v898_v2  ;;  %s5463_s12 = sld [smem:[#allocation34_spill]] }
  0x37   : > { %v891_v9 = vld [vmem:[%s881_s29 + $0x18] sm:$0xff]  ;;  %v3754_v10 = vsel %vm902_vm2, 1.0, %v4167_v4  ;;  %1637 = vst.msk [vmem:[#allocation2 + $0x11] ss:$8 sm:$0x3] %vm4386_vm0, %v4167_v4  ;;  %v889_v11 = vld [vmem:[%s881_s29 + $0x8] sm:$0xff]  ;;  %vm901_vm5 = vcmp.eq.s32.totalorder %v895_v7, %v898_v2 }
  0x38   : > { %v914_v12 = vadd.f32 %v3754_v10, %v891_v9  ;;  %1640 = vst.msk [vmem:[#allocation2 + $0x31] ss:$8 sm:$0x3] %vm4386_vm0, %v4167_v4  ;;  %v3752_v13 = vsel %vm900_vm4, 1.0, %v4167_v4  ;;  %v890_v14 = vld [vmem:[%s881_s29 + $0x10] sm:$0xff]  ;;  %v3753_v15 = vsel %vm901_vm5, 1.0, %v4167_v4 }
  0x39   : > { %1643 = vst.msk [vmem:[#allocation2 + $0x51] ss:$8 sm:$0x3] %vm4386_vm0, %v4167_v4  ;;  %v912_v16 = vadd.f32 %v3752_v13, %v889_v11  ;;  %v913_v17 = vadd.f32 %v3753_v15, %v890_v14  ;;  %v888_v18 = vld [vmem:[%s881_s29] sm:$0xff]  ;;  %v983_v45 = vld [vmem:[%s5459_s10 + $0x18] sm:$0xff]  ;;  %v982_v58 = vld [vmem:[%s5459_s10 + $0x10] sm:$0xff]  ;;  %s5461_s4 = smov %s5460_s28 }
  0x3a   : > { %vm918_vm6 = vcmp.ge.f32.partialorder %v914_v12, 1.0  ;;  %1646 = vst.msk [vmem:[#allocation2 + $0x71] ss:$8 sm:$0x3] %vm4386_vm0, %v4167_v4  ;;  %v911_v19 = vadd.f32 %v3751_v8, %v888_v18  ;;  %v981_v62 = vld [vmem:[%s5459_s10 + $0x8] sm:$0xff]  ;;  %v1052_v63 = vld [vmem:[%s5460_s28 + $0x38] sm:$0xff] }
  0x3b   : > { %v4410_v20 = vsel %vm918_vm6, 1.0, %v4167_v4  ;;  %vm916_vm7 = vcmp.ge.f32.partialorder %v912_v16, 1.0  ;;  %vm917_vm8 = vcmp.ge.f32.partialorder %v913_v17, 1.0  ;;  %v1051_v0 = vld [vmem:[%s5461_s4 + $0x30] sm:$0xff]  ;;  %1074 = vmatpush.msra.mxu1 %v1052_v63  ;;  %v980_v3 = vld [vmem:[%s5459_s10] sm:$0xff]  ;;  %v1048_v8 = vld [vmem:[%s5461_s4 + $0x18] sm:$0xff] }
  0x3c   : > { %v937_v21 = vsel %vm927_vm3, %v4410_v20, 0.0  ;;  %v4414_v22 = vsel %vm916_vm7, 1.0, %v4167_v4  ;;  %vm915_vm9 = vcmp.ge.f32.partialorder %v911_v19, 1.0  ;;  %v4418_v24 = vsel %vm917_vm8, 1.0, %v4167_v4  ;;  %v1049_v6 = vld [vmem:[%s5461_s4 + $0x20] sm:$0xff]  ;;  %v1047_v9 = vld [vmem:[%s5461_s4 + $0x10] sm:$0xff] }
  0x3d   : > { %938 = vadd.xlane.f32.xlu0 %v937_v21  ;;  %v931_v23 = vsel %vm927_vm3, %v4414_v22, 0.0  ;;  %v4420_v25 = vsel %vm915_vm9, 1.0, %v4167_v4  ;;  %v934_v26 = vsel %vm927_vm3, %v4418_v24, 0.0  ;;  %v1050_v4 = vld [vmem:[%s5461_s4 + $0x28] sm:$0xff]  ;;  %1075 = vmatpush.msra.mxu1 %v1051_v0  ;;  %v1045_v11 = vld [vmem:[%s5461_s4] sm:$0xff]  ;;  %vm1053_vm7 = vcmask 523264  }
  0x3e   : > { %932 = vadd.xlane.f32.xlu1 %v931_v23  ;;  %v928_v27 = vsel %vm927_vm3, %v4420_v25, 0.0  ;;  %v1046_v10 = vld [vmem:[%s5461_s4 + $0x8] sm:$0xff]  ;;  %v3919_v12 = vld [vmem:[%s5462_s7] ss:$0 sm:$0xff]  ;;  %s5464_s11 = sld [smem:[#allocation33_spill]]  ;;  %s3834_s27 = sshll.u32 %s4384_s23, 6 }
  0x3f   : > { %1076 = vmatpush.msra.mxu1 %v1050_v4  ;;  %s5465_s29 = sld [smem:[#allocation22_spill]]  ;;  %vm1349_vm8 = vcmask 1046528   ;;  %vm1503_vm9 = vcmask 1045504  }
  0x40   : > { %s5466_s6 = sld [smem:[#allocation26_spill]] }
  0x41   : > { %1077 = vmatpush.msra.mxu1 %v1049_v6  ;;  %s5468_s0 = sld [smem:[#allocation29_spill]] }
  0x42   : > { %s5469_s4 = sld [smem:[#allocation24_spill]] }
  0x43   : > { %1078 = vmatpush.msra.mxu1 %v1048_v8  ;;  %s5470_s28 = sld [smem:[#allocation25_spill]] }
  0x45   : > { %935 = vadd.xlane.f32.xlu0 %v934_v26  ;;  %1079 = vmatpush.msra.mxu1 %v1047_v9  ;;  %s4544_s30 = scalar_lea.vmem %s5465_s29, %s3834_s27  ;;  %s3556_s27 = scalar_lea.hbm %s5415_s25, %s4328_s8 }
  0x46   : > { %929 = vadd.xlane.f32.xlu1 %v928_v27  ;;  %v3786_v9 = vld [vmem:[%s5466_s6 + $0x70] sm:$0xff] }
  0x47   : > { %1080 = vmatpush.msra.mxu1 %v1046_v10  ;;  %v3784_v10 = vld [vmem:[%s5466_s6 + $0x60] sm:$0xff] }
  0x49   : > { %1081 = vmatpush.msra.mxu1 %v1045_v11  ;;  %v4553_v11 = vld [vmem:[%s4544_s30] sm:$0xff]  ;;  %s887_s29 = scalar_lea.vmem %s5470_s28, %s4384_s23 }
  0x4b   : > { %1391 = vmatpush.msrb.mxu1 %v3786_v9 }
  0x4d   : > { %1392 = vmatpush.msrb.mxu1 %v3784_v10  ;;  %v1282_v10 = vld [vmem:[%s5404_s14 + $0x8] sm:$0xff] }
  0xb0   : > { %v939_v28 = vpop.xlane.xlu0 %938 }
  0xb1   : > { %3927 = vrsqrt.f32 %v939_v28  ;;  %v933_v29 = vpop.xlane.xlu1 %932  ;;  %vm976_vm11 = vweird.f32 %v939_v28 }
  0xb2   : > { %3929 = vrsqrt.f32 %v933_v29  ;;  %vm956_vm15 = vweird.f32 %v933_v29 }
  0xb7   : > { %v3928_v30 = vpop.eup %3927 }
  0xb8   : > { %v3930_v31 = vpop.eup %3929  ;;  %v971_v32 = vmul.f32 %v3928_v30, %v939_v28  ;;  %v936_v33 = vpop.xlane.xlu0 %935  ;;  %vm977_vm10 = vweird.f32 %v3928_v30 }
  0xb9   : > { %v951_v34 = vmul.f32 %v3930_v31, %v933_v29  ;;  %3931 = vrsqrt.f32 %v936_v33  ;;  %v930_v35 = vpop.xlane.xlu1 %929  ;;  %vm978_vm12 = vmor %vm976_vm11, %vm977_vm10  ;;  %vm957_vm13 = vweird.f32 %v3930_v31  ;;  %vm966_vm1 = vweird.f32 %v936_v33 }
  0xba   : > { %v972_v36 = vmul.f32 %v3928_v30, %v971_v32  ;;  %3933 = vrsqrt.f32 %v930_v35  ;;  %vm958_vm0 = vmor %vm956_vm15, %vm957_vm13  ;;  %vm946_vm5 = vweird.f32 %v930_v35  ;;  %vm1297_vm11 = vcmask 1041409  }
  0xbb   : > { %v952_v37 = vmul.f32 %v3930_v31, %v951_v34  ;;  %vm1301_vm13 = vcmask 1043459  }
  0xbc   : > { %v973_v38 = vmul.f32 0.5, %v972_v36 }
  0xbd   : > { %v953_v40 = vmul.f32 0.5, %v952_v37 }
  0xbe   : > { %v974_v39 = vsub.f32 1.5, %v973_v38  ;;  %v1151_v38 = vld [vmem:[%s5463_s12 + $0x38] sm:$0xff] }
  0xbf   : > { %v3932_v41 = vpop.eup %3931  ;;  %v954_v48 = vsub.f32 1.5, %v953_v40  ;;  %1172 = vmatpush.msra.mxu3 %v1151_v38  ;;  %v3804_v38 = vld [vmem:[%s5466_s6 + $0x80] sm:$0xff] }
  0xc0   : > { %v3934_v42 = vpop.eup %3933  ;;  %v975_v43 = vmul.f32 %v3928_v30, %v974_v39  ;;  %v961_v44 = vmul.f32 %v3932_v41, %v936_v33  ;;  %vm967_vm14 = vweird.f32 %v3932_v41  ;;  %v1150_v39 = vld [vmem:[%s5463_s12 + $0x30] sm:$0xff] }
  0xc1   : > { %v941_v46 = vmul.f32 %v3934_v42, %v930_v35  ;;  %v955_v54 = vmul.f32 %v3930_v31, %v954_v48  ;;  %vm947_vm2 = vweird.f32 %v3934_v42  ;;  %vm968_vm4 = vmor %vm966_vm1, %vm967_vm14  ;;  %1173 = vmatpush.msra.mxu3 %v1150_v39  ;;  %v1145_v48 = vld [vmem:[%s5463_s12 + $0x8] sm:$0xff]  ;;  %v1337_v39 = vld [vmem:[%s5466_s6 + $0x20] sm:$0xff] }
  0xc2   : > { %v4429_v47 = vsel %vm978_vm12, %v3928_v30, %v975_v43  ;;  %v962_v49 = vmul.f32 %v3932_v41, %v961_v44  ;;  %vm948_vm6 = vmor %vm946_vm5, %vm947_vm2  ;;  %v1148_v43 = vld [vmem:[%s5463_s12 + $0x20] sm:$0xff]  ;;  %vm1299_vm12 = vcmask 1042434  }
  0xc3   : > { %v942_v50 = vmul.f32 %v3934_v42, %v941_v46  ;;  %v987_v51 = vmul.f32 %v983_v45, %v4429_v47  ;;  %v4435_v60 = vsel %vm958_vm0, %v3930_v31, %v955_v54  ;;  %v1147_v45 = vld [vmem:[%s5463_s12 + $0x18] sm:$0xff]  ;;  %v1146_v46 = vld [vmem:[%s5463_s12 + $0x10] sm:$0xff] }
  0xc4   : > { %v963_v52 = vmul.f32 0.5, %v962_v49  ;;  %v985_v5 = vmul.f32 %v981_v62, %v4435_v60  ;;  %v1144_v49 = vld [vmem:[%s5463_s12] sm:$0xff] }
  0xc5   : > { %v943_v53 = vmul.f32 0.5, %v942_v50  ;;  %1012 = vmatpush.msra.mxu0 %v987_v51  ;;  %v3920_v50 = vld [vmem:[%s5464_s11] ss:$0 sm:$0xff]  ;;  %s4049_s11 = scalar_lea.hbm %s5415_s25, 2 }
  0xc6   : > { %v964_v55 = vsub.f32 1.5, %v963_v52 }
  0xc7   : > { %v944_v56 = vsub.f32 1.5, %v943_v53 }
  0xc8   : > { %v965_v57 = vmul.f32 %v3932_v41, %v964_v55 }
  0xc9   : > { %v945_v59 = vmul.f32 %v3934_v42, %v944_v56 }
  0xca   : > { %v4437_v61 = vsel %vm968_vm4, %v3932_v41, %v965_v57  ;;  %v1149_v41 = vld [vmem:[%s5463_s12 + $0x28] sm:$0xff] }
  0xcb   : > { %v986_v1 = vmul.f32 %v982_v58, %v4437_v61  ;;  %v4449_v2 = vsel %vm948_vm6, %v3934_v42, %v945_v59  ;;  %1174 = vmatpush.msra.mxu3 %v1149_v41 }
  0xcc   : > { %v984_v7 = vmul.f32 %v980_v3, %v4449_v2 }
  0xcd   : > { %1013 = vmatpush.msra.mxu0 %v986_v1  ;;  %1175 = vmatpush.msra.mxu3 %v1148_v43  ;;  %v4622_v43 = vld [vmem:[%s4544_s30 + $0x30] sm:$0xff] }
  0xcf   : > { %1014 = vmatpush.msra.mxu0 %v985_v5  ;;  %1176 = vmatpush.msra.mxu3 %v1147_v45  ;;  %v1359_v45 = vrot.slane %v4622_v43, 1 }
  0xd1   : > { %1015 = vmatpush.msra.mxu0 %v984_v7  ;;  %1177 = vmatpush.msra.mxu3 %v1146_v46 }
  0xd2   : > { %3759 = vmatmul.msk.f32.vlgmr.msra.gmra.mxu0 %vm927_vm3, %v4420_v25 }
  0xd3   : > { %1178 = vmatpush.msra.mxu3 %v1145_v48 }
  0xd5   : > { %1179 = vmatpush.msra.mxu3 %v1144_v49  ;;  %v1504_v49 = vrot.slane %v4553_v11, 2 }
  0xda   : > { %3760 = vmatmul.msk.f32.gmra.mxu0 %vm927_vm3, %v4414_v22 }
  0xe2   : > { %3761 = vmatmul.msk.f32.gmra.mxu0 %vm927_vm3, %v4418_v24 }
  0xea   : > { %3762 = vmatmul.msk.f32.gmra.mxu0 %vm927_vm3, %v4410_v20 }
 0x14f   : > { %v1017_v13 = vpop.f32.mrf.mxu0 }
 0x150   : > { %v1029_v14 = vmul.f32 %v1017_v13, %v4449_v2  ;;  %v3782_v13 = vld [vmem:[%s5466_s6 + $0x50] sm:$0xff] }
 0x151   : > { %1393 = vmatpush.msrb.mxu1 %v3782_v13 }
 0x152   : > { %v1037_v15 = vadd.f32 %v3919_v12, %v1029_v14  ;;  %v1350_v14 = vrot.slane %v4553_v11, 1 }
 0x154   : > { %v1041_v16 = vmax.f32 %v1037_v15, 0.0 }
 0x156   : > { %3763 = vmatmul.msk.f32.vlgmr.msra.gmra.mxu1 %vm1053_vm7, %v1041_v16  ;;  %v3780_v16 = vld [vmem:[%s5466_s6 + $0x40] sm:$0xff] }
 0x157   : > { %v1020_v17 = vpop.f32.mrf.mxu0  ;;  %1394 = vmatpush.msrb.mxu1 %v3780_v16 }
 0x158   : > { %v1030_v18 = vmul.f32 %v1020_v17, %v4435_v60 }
 0x15a   : > { %v1038_v19 = vadd.f32 %v3919_v12, %v1030_v18 }
 0x15c   : > { %v1042_v21 = vmax.f32 %v1038_v19, 0.0 }
 0x15e   : > { %3764 = vmatmul.msk.f32.gmra.mxu1 %vm1053_vm7, %v1042_v21  ;;  %v4571_v21 = vld [vmem:[%s4544_s30 + $0x10] sm:$0xff] }
 0x15f   : > { %v1023_v23 = vpop.f32.mrf.mxu0 }
 0x160   : > { %v1031_v26 = vmul.f32 %v1023_v23, %v4437_v61  ;;  %v1328_v23 = vld [vmem:[%s4544_s30 + $0x18] sm:$0x3] }
 0x162   : > { %v1039_v27 = vadd.f32 %v3919_v12, %v1031_v26  ;;  %v3810_v26 = vld [vmem:[%s5466_s6 + $0xb0] sm:$0xff] }
 0x163   : > { %1545 = vmatpush.msra.mxu1 %v3810_v26 }
 0x164   : > { %v1043_v28 = vmax.f32 %v1039_v27, 0.0 }
 0x166   : > { %3765 = vmatmul.msk.f32.gmra.mxu1 %vm1053_vm7, %v1043_v28  ;;  %v3808_v28 = vld [vmem:[%s5466_s6 + $0xa0] sm:$0xff] }
 0x167   : > { %v1026_v29 = vpop.f32.mrf.mxu0  ;;  %1546 = vmatpush.msra.mxu1 %v3808_v28  ;;  %v1855_v28 = vld [vmem:[#allocation3 + $0x2f0] sm:$0xff] }
 0x168   : > { %v1032_v30 = vmul.f32 %v1026_v29, %v4429_v47  ;;  %v1353_v29 = vrot.slane %v4571_v21, 1 }
 0x16a   : > { %v1040_v31 = vadd.f32 %v3919_v12, %v1032_v30  ;;  %v4556_v12 = vld [vmem:[%s4544_s30 + $0x8] sm:$0x3]  ;;  %v1354_v30 = vrot.slane %v1328_v23, 1 }
 0x16b   : > { %v1351_v15 = vrot.slane %v4556_v12, 1 }
 0x16c   : > { %v1044_v32 = vmax.f32 %v1040_v31, 0.0 }
 0x16d   : > { %v4567_v17 = vsel %vm1349_vm8, %v1350_v14, %v1351_v15  ;;  %v4168_v14 = vmov 8.0  }
 0x16e   : > { %3766 = vmatmul.msk.f32.gmra.mxu1 %vm1053_vm7, %v1044_v32  ;;  %v3806_v32 = vld [vmem:[%s5466_s6 + $0x90] sm:$0xff]  ;;  %3935 = vrcp.f32 %v4168_v14 }
 0x16f   : > { %1547 = vmatpush.msra.mxu1 %v3806_v32  ;;  %v1843_v14 = vld [vmem:[#allocation3 + $0x290] sm:$0xff] }
 0x171   : > { %1548 = vmatpush.msra.mxu1 %v3804_v38 }
 0x176   : > { %3788 = vmatmul.msk.f32.vlgmr.msrb.gmra.mxu1 %vm927_vm3, %v4567_v17 }
 0x1d3   : > { %v1083_v33 = vpop.f32.mrf.mxu1 }
 0x1d4   : > { %v1095_v44 = vmul.f32 %v1083_v33, %v4449_v2 }
 0x1db   : > { %v1086_v34 = vpop.f32.mrf.mxu1 }
 0x1dc   : > { %v1096_v42 = vmul.f32 %v1086_v34, %v4435_v60  ;;  %v4590_v34 = vsel %vm1349_vm8, %v1353_v29, %v1354_v30 }
 0x1dd   : > { %3789 = vmatmul.msk.f32.gmra.mxu1 %vm927_vm3, %v4590_v34 }
 0x1e3   : > { %v1089_v35 = vpop.f32.mrf.mxu1 }
 0x1e4   : > { %v1097_v40 = vmul.f32 %v1089_v35, %v4437_v61  ;;  %v1339_v35 = vld [vmem:[%s5466_s6 + $0x30] sm:$0xff] }
 0x1eb   : > { %v1092_v36 = vpop.f32.mrf.mxu1 }
 0x1ec   : > { %v1098_v37 = vmul.f32 %v1092_v36, %v4429_v47  ;;  %v4596_v36 = vld [vmem:[%s4544_s30 + $0x20] sm:$0xff] }
 0x1ee   : > { %1111 = vmatpush.msra.mxu2 %v1098_v37  ;;  %v1330_v37 = vld [vmem:[%s4544_s30 + $0x28] sm:$0x3] }
 0x1ef   : > { %v1357_v41 = vrot.slane %v1330_v37, 1 }
 0x1f0   : > { %1112 = vmatpush.msra.mxu2 %v1097_v40  ;;  %v1356_v40 = vrot.slane %v4596_v36, 1 }
 0x1f2   : > { %1113 = vmatpush.msra.mxu2 %v1096_v42  ;;  %v1335_v42 = vld [vmem:[%s5466_s6 + $0x10] sm:$0xff] }
 0x1f4   : > { %1114 = vmatpush.msra.mxu2 %v1095_v44  ;;  %v1332_v44 = vld [vmem:[%s4544_s30 + $0x38] sm:$0x3]  ;;  %s5467_s30 = sld [smem:[#allocation27_spill]] }
 0x1f5   : > { %3767 = vmatmul.msk.f32.vlgmr.msra.gmra.mxu2 %vm927_vm3, %v4420_v25  ;;  %v1360_v46 = vrot.slane %v1332_v44, 1 }
 0x1f7   : > { %v4633_v48 = vsel %vm1349_vm8, %v1359_v45, %v1360_v46  ;;  %v1853_v45 = vld [vmem:[#allocation3 + $0x2e0] sm:$0xff]  ;;  %v1338_v46 = vld [vmem:[%s5466_s6 + $0x28] sm:$0xff] }
 0x1fd   : > { %3768 = vmatmul.msk.f32.gmra.mxu2 %vm927_vm3, %v4414_v22 }
 0x205   : > { %3769 = vmatmul.msk.f32.gmra.mxu2 %vm927_vm3, %v4418_v24 }
 0x20d   : > { %3770 = vmatmul.msk.f32.gmra.mxu2 %vm927_vm3, %v4410_v20 }
 0x278   : > { %v1116_v51 = vpop.f32.mrf.mxu2 }
 0x279   : > { %v1128_v52 = vmul.f32 %v1116_v51, %v4449_v2  ;;  %v1508_v51 = vrot.slane %v1328_v23, 2  ;;  %v3785_v23 = vld [vmem:[%s5466_s6 + $0x68] sm:$0xff] }
 0x27b   : > { %v1136_v53 = vadd.f32 %v3920_v50, %v1128_v52 }
 0x27d   : > { %v1140_v54 = vmax.f32 %v1136_v53, 0.0  ;;  %v1510_v53 = vrot.slane %v4596_v36, 2 }
 0x27f   : > { %3771 = vmatmul.msk.f32.vlgmr.msra.gmra.mxu3 %vm1053_vm7, %v1140_v54  ;;  %v1511_v54 = vrot.slane %v1330_v37, 2 }
 0x280   : > { %v1119_v55 = vpop.f32.mrf.mxu2 }
 0x281   : > { %v1129_v56 = vmul.f32 %v1119_v55, %v4435_v60  ;;  %v4660_v55 = vsel %vm1503_vm9, %v1510_v53, %v1511_v54  ;;  %v1849_v54 = vld [vmem:[#allocation3 + $0x2c0] sm:$0xff] }
 0x283   : > { %v1137_v57 = vadd.f32 %v3920_v50, %v1129_v56  ;;  %v1513_v56 = vrot.slane %v4622_v43, 2 }
 0x285   : > { %v1141_v58 = vmax.f32 %v1137_v57, 0.0  ;;  %v1514_v57 = vrot.slane %v1332_v44, 2 }
 0x287   : > { %3772 = vmatmul.msk.f32.gmra.mxu3 %vm1053_vm7, %v1141_v58  ;;  %v4666_v58 = vsel %vm1503_vm9, %v1513_v56, %v1514_v57 }
 0x288   : > { %v1122_v59 = vpop.f32.mrf.mxu2 }
 0x289   : > { %v1130_v62 = vmul.f32 %v1122_v59, %v4437_v61  ;;  %v1288_v59 = vld [vmem:[%s5404_s14 + $0x38] sm:$0xff] }
 0x28a   : > { %1313 = vmatpush.msrb.mxu2 %v1288_v59 }
 0x28b   : > { %v1138_v63 = vadd.f32 %v3920_v50, %v1130_v62  ;;  %v4673_v62 = vpop.f32.mrf.mxu1 }
 0x28d   : > { %v1142_v0 = vmax.f32 %v1138_v63, 0.0  ;;  %v1287_v63 = vld [vmem:[%s5404_s14 + $0x30] sm:$0xff] }
 0x28e   : > { %1314 = vmatpush.msrb.mxu2 %v1287_v63  ;;  %v1334_v63 = vld [vmem:[%s5466_s6 + $0x8] sm:$0xff] }
 0x28f   : > { %3773 = vmatmul.msk.f32.gmra.mxu3 %vm1053_vm7, %v1142_v0  ;;  %v1286_v0 = vld [vmem:[%s5404_s14 + $0x28] sm:$0xff] }
 0x290   : > { %v1125_v1 = vpop.f32.mrf.mxu2  ;;  %1315 = vmatpush.msrb.mxu2 %v1286_v0 }
 0x291   : > { %v1131_v3 = vmul.f32 %v1125_v1, %v4429_v47  ;;  %v3921_v1 = vld [vmem:[%s5403_s13] ss:$0 sm:$0xff] }
 0x293   : > { %v1139_v4 = vadd.f32 %v3920_v50, %v1131_v3  ;;  %v1285_v3 = vld [vmem:[%s5404_s14 + $0x20] sm:$0xff]  ;;  %v4694_v9 = vpop.f32.mrf.mxu1 }
 0x294   : > { %1316 = vmatpush.msrb.mxu2 %v1285_v3 }
 0x295   : > { %v1143_v5 = vmax.f32 %v1139_v4, 0.0 }
 0x297   : > { %3774 = vmatmul.msk.f32.gmra.mxu3 %vm1053_vm7, %v1143_v5 }
 0x302   : > { %v1181_v6 = vpop.f32.mrf.mxu3 }
 0x303   : > { %v1193_v33 = vmul.f32 %v1181_v6, %v4449_v2  ;;  %v1284_v6 = vld [vmem:[%s5404_s14 + $0x18] sm:$0xff] }
 0x304   : > { %1317 = vmatpush.msrb.mxu2 %v1284_v6 }
 0x30a   : > { %v1184_v7 = vpop.f32.mrf.mxu3 }
 0x30b   : > { %v1194_v31 = vmul.f32 %v1184_v7, %v4435_v60  ;;  %v1283_v7 = vld [vmem:[%s5404_s14 + $0x10] sm:$0xff] }
 0x30c   : > { %1318 = vmatpush.msrb.mxu2 %v1283_v7 }
 0x30e   : > { %1319 = vmatpush.msrb.mxu2 %v1282_v10 }
 0x312   : > { %v1187_v8 = vpop.f32.mrf.mxu3 }
 0x313   : > { %v1195_v27 = vmul.f32 %v1187_v8, %v4437_v61 }
 0x31a   : > { %v1190_v18 = vpop.f32.mrf.mxu3 }
 0x31b   : > { %v1196_v19 = vmul.f32 %v1190_v18, %v4429_v47 }
 0x31d   : > { %1209 = vmatpush.msrb.mxu0 %v1196_v19  ;;  %3836 = vmatpush.msrb.mxu3 %v1196_v19  ;;  %v3787_v19 = vld [vmem:[%s5466_s6 + $0x78] sm:$0xff] }
 0x31f   : > { %1210 = vmatpush.msrb.mxu0 %v1195_v27  ;;  %3837 = vmatpush.msrb.mxu3 %v1195_v27 }
 0x321   : > { %1211 = vmatpush.msrb.mxu0 %v1194_v31  ;;  %3838 = vmatpush.msrb.mxu3 %v1194_v31 }
 0x323   : > { %1212 = vmatpush.msrb.mxu0 %v1193_v33  ;;  %3839 = vmatpush.msrb.mxu3 %v1193_v33  ;;  %v3781_v33 = vld [vmem:[%s5466_s6 + $0x48] sm:$0xff] }
 0x324   : > { %3775 = vmatmul.msk.f32.vlgmr.msrb.gmra.mxu0 %vm927_vm3, %v4420_v25  ;;  %3778 = vmatmul.msk.f32.vlgmr.msrb.gmra.mxu3 %vm927_vm3, %v4410_v20  ;;  %v1333_v20 = vld [vmem:[%s5466_s6] sm:$0xff]  ;;  %v4619_v25 = vsel %vm1349_vm8, %v1356_v40, %v1357_v41  ;;  %v1340_v41 = vld [vmem:[%s5466_s6 + $0x38] sm:$0xff] }
 0x325   : > { %1457 = vmatpush.msra.mxu3 %v1339_v35  ;;  %3790 = vmatmul.msk.f32.gmra.mxu1 %vm927_vm3, %v4619_v25  ;;  %v4719_v35 = vpop.eup %3935 }
 0x326   : > { %1486 = vmatpush.msra.mxu0 %v1340_v41  ;;  %vm1275_vm10 = vweird.f32 %v4719_v35 }
 0x327   : > { %1458 = vmatpush.msra.mxu3 %v1337_v39 }
 0x328   : > { %1487 = vmatpush.msra.mxu0 %v1338_v46 }
 0x329   : > { %1459 = vmatpush.msra.mxu3 %v1335_v42  ;;  %v1271_v42 = vmul.f32 8.0, %v4719_v35 }
 0x32b   : > { %1460 = vmatpush.msra.mxu3 %v1333_v20  ;;  %v1272_v0 = vsub.f32 1.0, %v1271_v42  ;;  %v1837_v42 = vld [vmem:[#allocation3 + $0x260] sm:$0xff] }
 0x32c   : > { %3776 = vmatmul.msk.f32.gmra.mxu0 %vm927_vm3, %v4414_v22  ;;  %3796 = vmatmul.msk.f32.vlgmr.msra.gmra.mxu3 %vm927_vm3, %v4553_v11  ;;  %v1505_v22 = vrot.slane %v4556_v12, 2 }
 0x32d   : > { %3791 = vmatmul.msk.f32.gmra.mxu1 %vm927_vm3, %v4633_v48  ;;  %1889 = vmatpush.msrb.mxu3 %v1855_v28 }
 0x32e   : > { %v4644_v50 = vsel %vm1503_vm9, %v1504_v49, %v1505_v22  ;;  %v1851_v22 = vld [vmem:[#allocation3 + $0x2d0] sm:$0xff] }
 0x32f   : > { %1890 = vmatpush.msrb.mxu3 %v1853_v45 }
 0x331   : > { %1891 = vmatpush.msrb.mxu3 %v1851_v22 }
 0x333   : > { %1892 = vmatpush.msrb.mxu3 %v1849_v54  ;;  %v1831_v54 = vld [vmem:[#allocation3 + $0x230] sm:$0xff] }
 0x334   : > { %3777 = vmatmul.msk.f32.gmra.mxu0 %vm927_vm3, %v4418_v24  ;;  %3797 = vmatmul.msk.f32.gmra.mxu3 %vm927_vm3, %v4571_v21  ;;  %v1507_v24 = vrot.slane %v4571_v21, 2 }
 0x335   : > { %3812 = vmatmul.msk.f32.vlgmr.msra.gmra.mxu1 %vm927_vm3, %v4644_v50 }
 0x336   : > { %v4652_v52 = vsel %vm1503_vm9, %v1507_v24, %v1508_v51  ;;  %v1336_v51 = vld [vmem:[%s5466_s6 + $0x18] sm:$0xff] }
 0x337   : > { %1488 = vmatpush.msra.mxu0 %v1336_v51 }
 0x339   : > { %1489 = vmatpush.msra.mxu0 %v1334_v63 }
 0x33c   : > { %3798 = vmatmul.msk.f32.gmra.mxu3 %vm927_vm3, %v4596_v36  ;;  %3800 = vmatmul.msk.f32.vlgmr.msra.gmra.mxu0 %vm927_vm3, %v4553_v11  ;;  %v1841_v11 = vld [vmem:[#allocation3 + $0x280] sm:$0xff] }
 0x33d   : > { %3813 = vmatmul.msk.f32.gmra.mxu1 %vm927_vm3, %v4652_v52 }
 0x344   : > { %3799 = vmatmul.msk.f32.gmra.mxu3 %vm927_vm3, %v4622_v43  ;;  %3801 = vmatmul.msk.f32.gmra.mxu0 %vm927_vm3, %v4571_v21 }
 0x345   : > { %3814 = vmatmul.msk.f32.gmra.mxu1 %vm927_vm3, %v4660_v55 }
 0x34c   : > { %3802 = vmatmul.msk.f32.gmra.mxu0 %vm927_vm3, %v4596_v36  ;;  %v3807_v36 = vld [vmem:[%s5466_s6 + $0x98] sm:$0xff] }
 0x34d   : > { %3815 = vmatmul.msk.f32.gmra.mxu1 %vm927_vm3, %v4666_v58 }
 0x354   : > { %3803 = vmatmul.msk.f32.gmra.mxu0 %vm927_vm3, %v4622_v43 }
 0x3a1   : > { %v1214_v4 = vpop.f32.mrf.mxu0 }
 0x3a2   : > { %v1226_v5 = vmul.f32 %v1214_v4, %v4449_v2  ;;  %v1281_v2 = vld [vmem:[%s5404_s14] sm:$0xff]  ;;  %v4714_v32 = vpop.f32.mrf.mxu1 }
 0x3a3   : > { %1320 = vmatpush.msrb.mxu2 %v1281_v2  ;;  %v1845_v2 = vld [vmem:[#allocation3 + $0x2a0] sm:$0xff] }
 0x3a4   : > { %v1234_v8 = vadd.f32 %v3921_v1, %v1226_v5 }
 0x3a5   : > { %1420 = vmatpush.msra.mxu2 %v3787_v19 }
 0x3a6   : > { %v1238_v12 = vmax.f32 %v1234_v8, 0.0 }
 0x3a7   : > { %v1223_v13 = vpop.f32.mrf.mxu3  ;;  %1421 = vmatpush.msra.mxu2 %v3785_v23 }
 0x3a8   : > { %v1229_v15 = vmul.f32 %v1223_v13, %v4429_v47  ;;  %v1242_v16 = vsel %vm1053_vm7, %v1238_v12, 0.0  ;;  %v3783_v47 = vld [vmem:[%s5466_s6 + $0x58] sm:$0xff]  ;;  %v4746_v13 = vld [vmem:[%s5467_s30] sm:$0x3] }
 0x3a9   : > { %v1217_v18 = vpop.f32.mrf.mxu0  ;;  %v1243_v29 = vrot.slane %v1242_v16, 4  ;;  %1422 = vmatpush.msra.mxu2 %v3783_v47  ;;  %v4750_v23 = vperm.slane %v4746_v13, 0 }
 0x3aa   : > { %v1237_v26 = vadd.f32 %v3921_v1, %v1229_v15  ;;  %v1227_v27 = vmul.f32 %v1217_v18, %v4435_v60  ;;  %v4734_v59 = vpop.f32.mrf.mxu1 }
 0x3ab   : > { %v1244_v39 = vadd.f32 %v1243_v29, %v1242_v16  ;;  %1423 = vmatpush.msra.mxu2 %v3781_v33 }
 0x3ac   : > { %v1241_v30 = vmax.f32 %v1237_v26, 0.0  ;;  %v1235_v31 = vadd.f32 %v3921_v1, %v1227_v27 }
 0x3ad   : > { %v1245_v56 = vrot.slane %v1244_v39, 2 }
 0x3ae   : > { %v1263_v60 = vsel %vm1053_vm7, %v1241_v30, 0.0  ;;  %v1239_v37 = vmax.f32 %v1235_v31, 0.0  ;;  %v1839_v30 = vld [vmem:[#allocation3 + $0x270] sm:$0xff] }
 0x3af   : > { %v1264_v38 = vrot.slane %v1263_v60, 4  ;;  %v1246_v7 = vadd.f32 %v1245_v56, %v1244_v39  ;;  %v1462_v12 = vpop.f32.mrf.mxu3 }
 0x3b0   : > { %v1249_v40 = vsel %vm1053_vm7, %v1239_v37, 0.0  ;;  %v1463_v18 = vadd.f32 %v1462_v12, %v4673_v62 }
 0x3b1   : > { %v1250_v20 = vrot.slane %v1249_v40, 4  ;;  %v1220_v44 = vpop.f32.mrf.mxu0  ;;  %v1265_v49 = vadd.f32 %v1264_v38, %v1263_v60  ;;  %v1247_v26 = vrot.slane %v1246_v7, 1 }
 0x3b2   : > { %v1228_v24 = vmul.f32 %v1220_v44, %v4437_v61  ;;  %v1847_v61 = vld [vmem:[#allocation3 + $0x2b0] sm:$0xff]  ;;  %v1550_v27 = vpop.f32.mrf.mxu1 }
 0x3b3   : > { %v1251_v53 = vadd.f32 %v1250_v20, %v1249_v40  ;;  %v1266_v4 = vrot.slane %v1265_v49, 2  ;;  %1893 = vmatpush.msrb.mxu3 %v1847_v61  ;;  %v1591_v29 = vadd.f32 %v1550_v27, %v1463_v18  ;;  %v1248_v37 = vadd.f32 %v1247_v26, %v1246_v7  ;;  %v1835_v20 = vld [vmem:[#allocation3 + $0x250] sm:$0xff] }
 0x3b4   : > { %v1236_v57 = vadd.f32 %v3921_v1, %v1228_v24  ;;  %v1273_v1 = vmul.f32 %v4719_v35, %v1272_v0  ;;  %v1833_v24 = vld [vmem:[#allocation3 + $0x240] sm:$0xff] }
 0x3b5   : > { %v1252_v3 = vrot.slane %v1251_v53, 2  ;;  %v1267_v15 = vadd.f32 %v1266_v4, %v1265_v49  ;;  %1894 = vmatpush.msrb.mxu3 %v1845_v2  ;;  %v1605_v60 = vadd.f32 %v4750_v23, %v1591_v29  ;;  %v3811_v4 = vld [vmem:[%s5466_s6 + $0xb8] sm:$0xff]  ;;  %v1722_v29 = vld [vmem:[#allocation3 + $0xd0] sm:$0xff] }
 0x3b6   : > { %v1240_v5 = vmax.f32 %v1236_v57, 0.0  ;;  %v1274_v28 = vadd.f32 %v4719_v35, %v1273_v1 }
 0x3b7   : > { %v1253_v6 = vadd.f32 %v1252_v3, %v1251_v53  ;;  %1895 = vmatpush.msrb.mxu3 %v1843_v14  ;;  %v1268_v31 = vrot.slane %v1267_v15, 1  ;;  %v1613_v40 = vmax.f32 %v1605_v60, 0.0  ;;  %v1465_v41 = vpop.f32.mrf.mxu3  ;;  %v1726_v14 = vld [vmem:[#allocation3 + $0xf0] sm:$0xff] }
 0x3b8   : > { %v1256_v8 = vsel %vm1053_vm7, %v1240_v5, 0.0  ;;  %v1276_v38 = vsel %vm1275_vm10, %v4719_v35, %v1274_v28  ;;  %v1466_v46 = vadd.f32 %v1465_v41, %v4694_v9  ;;  %v1829_v5 = vld [vmem:[#allocation3 + $0x220] sm:$0xff] }
 0x3b9   : > { %v1257_v10 = vrot.slane %v1256_v8, 4  ;;  %v1254_v16 = vrot.slane %v1253_v6, 1  ;;  %1896 = vmatpush.msrb.mxu3 %v1841_v11  ;;  %v1269_v45 = vadd.f32 %v1268_v31, %v1267_v15  ;;  %v1656_v49 = vrot.slane %v1613_v40, 7 }
 0x3ba   : > { %v1277_v51 = vmul.f32 %v1276_v38, %v1248_v37  ;;  %v1553_v53 = vpop.f32.mrf.mxu1 }
 0x3bb   : > { %v1258_v19 = vadd.f32 %v1257_v10, %v1256_v8  ;;  %v1255_v33 = vadd.f32 %v1254_v16, %v1253_v6  ;;  %1897 = vmatpush.msrb.mxu3 %v1839_v30  ;;  %1672 = vst [vmem:[#allocation2] sm:$0xfe] %v1656_v49  ;;  %v1593_v35 = vadd.f32 %v1553_v53, %v1466_v46  ;;  %v3809_v6 = vld [vmem:[%s5466_s6 + $0xa8] sm:$0xff]  ;;  %v1827_v8 = vld [vmem:[#allocation3 + $0x210] sm:$0xff]  ;;  %v1825_v10 = vld [vmem:[#allocation3 + $0x200] sm:$0xff] }
 0x3bc   : > { %v1280_v56 = vmul.f32 %v1276_v38, %v1269_v45  ;;  %1674 = vst [vmem:[#allocation2 + $0x10] sm:$0x1] %v1656_v49  ;;  %v1712_v45 = vld [vmem:[#allocation3 + $0x80] sm:$0xff]  ;;  %v1710_v49 = vld [vmem:[#allocation3 + $0x70] sm:$0xff] }
 0x3bd   : > { %v1259_v47 = vrot.slane %v1258_v19, 2  ;;  %v1278_v44 = vmul.f32 %v1276_v38, %v1255_v33  ;;  %1898 = vmatpush.msrb.mxu3 %v1837_v42  ;;  %v1607_v63 = vadd.f32 %v4750_v23, %v1593_v35  ;;  %v1720_v33 = vld [vmem:[#allocation3 + $0xc0] sm:$0xff]  ;;  %v1706_v53 = vld [vmem:[#allocation3 + $0x50] sm:$0xff] }
 0x3be   : > { %v1716_v42 = vld [vmem:[#allocation3 + $0xa0] sm:$0xff] }
 0x3bf   : > { %v1260_v62 = vadd.f32 %v1259_v47, %v1258_v19  ;;  %1899 = vmatpush.msrb.mxu3 %v1835_v20  ;;  %v1298_v57 = vsel %vm1297_vm11, %v1278_v44, %v1277_v51  ;;  %v1615_v3 = vmax.f32 %v1607_v63, 0.0  ;;  %v1468_v61 = vpop.f32.mrf.mxu3  ;;  %v1724_v47 = vld [vmem:[#allocation3 + $0xe0] sm:$0xff]  ;;  %v1714_v20 = vld [vmem:[#allocation3 + $0x90] sm:$0xff] }
 0x3c0   : > { %v1469_v7 = vadd.f32 %v1468_v61, %v4714_v32  ;;  %v3805_v32 = vld [vmem:[%s5466_s6 + $0x88] sm:$0xff]  ;;  %s3560_s6 = sshll.u32 %s3556_s27, 4  ;;  %s3561_s6 = int_to_ptr.hbm [resolvable:$true] %s3560_s6 }
 0x3c1   : > { %v1261_v39 = vrot.slane %v1260_v62, 1  ;;  %1900 = vmatpush.msrb.mxu3 %v1833_v24  ;;  %v1658_v1 = vrot.slane %v1615_v3, 7  ;;  %v1856_v3 = vld [vmem:[#allocation3 + $0x2f8] sm:$0xff]  ;;  %v1854_v61 = vld [vmem:[#allocation3 + $0x2e8] sm:$0xff] }
 0x3c2   : > { %v1556_v12 = vpop.f32.mrf.mxu1  ;;  %v1760_v2 = vld [vmem:[#allocation2] sm:$0xfe]  ;;  %1947 = vmatpush.msrb.mxu1 %v1856_v3 }
 0x3c3   : > { %v1262_v22 = vadd.f32 %v1261_v39, %v1260_v62  ;;  %1901 = vmatpush.msrb.mxu3 %v1831_v54  ;;  %1676 = vst [vmem:[#allocation2 + $0x20] sm:$0xfe] %v1658_v1  ;;  %v1595_v15 = vadd.f32 %v1556_v12, %v1469_v7  ;;  %v1762_v16 = vld [vmem:[#allocation2 + $0x10] sm:$0x1]  ;;  %v1792_v18 = vrot.slane %v1760_v2, 1  ;;  %v1850_v7 = vld [vmem:[#allocation3 + $0x2c8] sm:$0xff] }
 0x3c4   : > { %1678 = vst [vmem:[#allocation2 + $0x30] sm:$0x1] %v1658_v1  ;;  %v1793_v19 = vrot.slane %v1762_v16, 1  ;;  %v1718_v39 = vld [vmem:[#allocation3 + $0xb0] sm:$0xff]  ;;  %1948 = vmatpush.msrb.mxu1 %v1854_v61  ;;  %v1848_v1 = vld [vmem:[#allocation3 + $0x2b8] sm:$0xff]  ;;  %v2210_v12 = vld [vmem:[#allocation3 + $0x4c0] sm:$0xff] }
 0x3c5   : > { %v1279_v21 = vmul.f32 %v1276_v38, %v1262_v22  ;;  %1902 = vmatpush.msrb.mxu3 %v1829_v5  ;;  %v1609_v11 = vadd.f32 %v4750_v23, %v1595_v15  ;;  %v1852_v5 = vld [vmem:[#allocation3 + $0x2d8] sm:$0xff]  ;;  %v1842_v15 = vld [vmem:[#allocation3 + $0x288] sm:$0xff]  ;;  %v2398_v61 = vld [vmem:[%s5407_s17 + $0x10] sm:$0xff] }
 0x3c6   : > { %v4781_v26 = vsel %vm1349_vm8, %v1792_v18, %v1793_v19  ;;  %1949 = vmatpush.msrb.mxu1 %v1852_v5  ;;  %v1844_v2 = vld [vmem:[#allocation3 + $0x298] sm:$0xff]  ;;  %v2206_v18 = vld [vmem:[#allocation3 + $0x4a0] sm:$0xff]  ;;  %v1838_v19 = vld [vmem:[#allocation3 + $0x268] sm:$0xff] }
 0x3c7   : > { %v1300_v9 = vsel %vm1299_vm12, %v1279_v21, %v1298_v57  ;;  %1903 = vmatpush.msrb.mxu3 %v1827_v8  ;;  %v1617_v27 = vmax.f32 %v1609_v11, 0.0  ;;  %v1471_v28 = vpop.f32.mrf.mxu3  ;;  %v1704_v21 = vld [vmem:[#allocation3 + $0x40] sm:$0xff]  ;;  %v1702_v57 = vld [vmem:[#allocation3 + $0x30] sm:$0xff]  ;;  %v1709_v5 = vld [vmem:[#allocation3 + $0x68] sm:$0xff] }
 0x3c8   : > { %v1302_v0 = vsel %vm1301_vm13, %v1280_v56, %v1300_v9  ;;  %v1472_v30 = vadd.f32 %v1471_v28, %v4734_v59  ;;  %v4808_v8 = vld [vmem:[#allocation2] sm:$0xff]  ;;  %1950 = vmatpush.msrb.mxu1 %v1850_v7  ;;  %v2200_v28 = vld [vmem:[#allocation3 + $0x470] sm:$0xff] }
 0x3c9   : > { %3779 = vmatmul.msk.f32.vlgmr.msrb.gmra.mxu2 %vm1053_vm7, %v1302_v0  ;;  %1904 = vmatpush.msrb.mxu3 %v1825_v10  ;;  %v1660_v31 = vrot.slane %v1617_v27, 7  ;;  %v1698_v0 = vld [vmem:[#allocation3 + $0x10] sm:$0xff]  ;;  %v1846_v10 = vld [vmem:[#allocation3 + $0x2a8] sm:$0xff]  ;;  %v2202_v11 = vld [vmem:[#allocation3 + $0x480] sm:$0xff] }
 0x3ca   : > { %1574 = vmatpush.msrb.mxu2 %v3811_v4  ;;  %1905 = vmatmul.f32.vlgmr.msrb.gmra.mxu3 %v4781_v26  ;;  %v1559_v62 = vpop.f32.mrf.mxu1  ;;  %v1764_v60 = vld [vmem:[#allocation2 + $0x20] sm:$0xfe]  ;;  %v1836_v27 = vld [vmem:[#allocation3 + $0x258] sm:$0xff] }
 0x3cb   : > { %2005 = vmatpush.msra.mxu3 %v1726_v14  ;;  %1680 = vst [vmem:[#allocation2 + $0x40] sm:$0xfe] %v1660_v31  ;;  %v1597_v37 = vadd.f32 %v1559_v62, %v1472_v30  ;;  %v1766_v43 = vld [vmem:[#allocation2 + $0x30] sm:$0x1]  ;;  %v1798_v38 = vrot.slane %v1764_v60, 1  ;;  %v1696_v4 = vld [vmem:[#allocation3] sm:$0xff]  ;;  %1951 = vmatpush.msrb.mxu1 %v1848_v1 }
 0x3cc   : > { %1575 = vmatpush.msrb.mxu2 %v3809_v6  ;;  %1682 = vst [vmem:[#allocation2 + $0x50] sm:$0x1] %v1660_v31  ;;  %v2216_v6 = vld [vmem:[#allocation3 + $0x4f0] sm:$0xff]  ;;  %v4813_v16 = vld [vmem:[#allocation2 + $0x20] sm:$0xff]  ;;  %v1832_v31 = vld [vmem:[#allocation3 + $0x238] sm:$0xff] }
 0x3cd   : > { %2006 = vmatpush.msra.mxu3 %v1724_v47  ;;  %v1611_v40 = vadd.f32 %v4750_v23, %v1597_v37  ;;  %1952 = vmatpush.msrb.mxu1 %v1846_v10  ;;  %v2208_v14 = vld [vmem:[#allocation3 + $0x4b0] sm:$0xff]  ;;  %v1834_v47 = vld [vmem:[#allocation3 + $0x248] sm:$0xff]  ;;  %v2198_v30 = vld [vmem:[#allocation3 + $0x460] sm:$0xff] }
 0x3ce   : > { %1576 = vmatpush.msrb.mxu2 %v3807_v36  ;;  %v2212_v36 = vld [vmem:[#allocation3 + $0x4d0] sm:$0xff]  ;;  %v2194_v62 = vld [vmem:[#allocation3 + $0x440] sm:$0xff]  ;;  %v1828_v60 = vld [vmem:[#allocation3 + $0x218] sm:$0xff] }
 0x3cf   : > { %2007 = vmatpush.msra.mxu3 %v1722_v29  ;;  %v1619_v59 = vmax.f32 %v1611_v40, 0.0  ;;  %1953 = vmatpush.msrb.mxu1 %v1844_v2  ;;  %v2192_v37 = vld [vmem:[#allocation3 + $0x430] sm:$0xff]  ;;  %v1703_v2 = vld [vmem:[#allocation3 + $0x38] sm:$0xff] }
 0x3d0   : > { %1577 = vmatpush.msrb.mxu2 %v3805_v32  ;;  %v1840_v32 = vld [vmem:[#allocation3 + $0x278] sm:$0xff]  ;;  %v2123_v40 = vld [vmem:[#allocation2 + $0x10] sm:$0x3] }
 0x3d1   : > { %3792 = vmatmul.msk.f32.vlgmr.msra.gmra.mxu2 %vm927_vm3, %v4567_v17  ;;  %2008 = vmatpush.msra.mxu3 %v1720_v33  ;;  %v1799_v17 = vrot.slane %v1766_v43, 1  ;;  %v1662_v44 = vrot.slane %v1619_v59, 7  ;;  %v1830_v33 = vld [vmem:[#allocation3 + $0x228] sm:$0xff]  ;;  %v2188_v59 = vld [vmem:[#allocation3 + $0x410] sm:$0xff] }
 0x3d2   : > { %v1768_v46 = vld [vmem:[#allocation2 + $0x40] sm:$0xfe]  ;;  %1954 = vmatpush.msrb.mxu1 %v1842_v15  ;;  %v1826_v43 = vld [vmem:[#allocation3 + $0x208] sm:$0xff] }
 0x3d3   : > { %v4791_v41 = vsel %vm1349_vm8, %v1798_v38, %v1799_v17  ;;  %2009 = vmatpush.msra.mxu3 %v1718_v39  ;;  %1684 = vst [vmem:[#allocation2 + $0x60] sm:$0xfe] %v1662_v44  ;;  %v1770_v22 = vld [vmem:[#allocation2 + $0x50] sm:$0x1]  ;;  %v1804_v23 = vrot.slane %v1768_v46, 1  ;;  %v4818_v29 = vld [vmem:[#allocation2 + $0x40] sm:$0xff] }
 0x3d4   : > { %1908 = vmatmul.f32.gmra.mxu3 %v4791_v41  ;;  %1686 = vst [vmem:[#allocation2 + $0x70] sm:$0x1] %v1662_v44  ;;  %v1805_v24 = vrot.slane %v1770_v22, 1  ;;  %1955 = vmatpush.msrb.mxu1 %v1840_v32  ;;  %v2190_v39 = vld [vmem:[#allocation3 + $0x420] sm:$0xff]  ;;  %v2154_v44 = vrot.slane %v2123_v40, 2  ;;  %v1723_v46 = vld [vmem:[#allocation3 + $0xd8] sm:$0xff] }
 0x3d5   : > { %2010 = vmatpush.msra.mxu3 %v1716_v42  ;;  %v2121_v17 = vld [vmem:[#allocation2] sm:$0xfc]  ;;  %v1725_v42 = vld [vmem:[#allocation3 + $0xe8] sm:$0xff]  ;;  %v2403_v22 = vld [vmem:[%s5407_s17 + $0x38] sm:$0xff] }
 0x3d6   : > { %v4797_v51 = vsel %vm1349_vm8, %v1804_v23, %v1805_v24  ;;  %1956 = vmatpush.msrb.mxu1 %v1838_v19  ;;  %v1721_v23 = vld [vmem:[#allocation3 + $0xc8] sm:$0xff]  ;;  %v2402_v24 = vld [vmem:[%s5407_s17 + $0x30] sm:$0xff]  ;;  %v2217_v19 = vld [vmem:[#allocation3 + $0x4f8] sm:$0xff] }
 0x3d7   : > { %2011 = vmatpush.msra.mxu3 %v1714_v20  ;;  %v2153_v20 = vrot.slane %v2121_v17, 2  ;;  %v2131_v3 = vld [vmem:[#allocation2 + $0x50] sm:$0x3]  ;;  %v1888_v17 = vld [vmem:[#allocation3 + $0x3f8] sm:$0xff] }
 0x3d8   : > { %1957 = vmatpush.msrb.mxu1 %v1836_v27  ;;  %v2166_v7 = vrot.slane %v2131_v3, 2  ;;  %v2215_v27 = vld [vmem:[#allocation3 + $0x4e8] sm:$0xff]  ;;  %v2189_v40 = vld [vmem:[#allocation3 + $0x418] sm:$0xff]  ;;  %1976 = vmatpush.msra.mxu2 %v1888_v17  ;;  %v1865_v3 = vld [vmem:[#allocation3 + $0x340] sm:$0xff] }
 0x3d9   : > { %3793 = vmatmul.msk.f32.gmra.mxu2 %vm927_vm3, %v4590_v34  ;;  %2012 = vmatpush.msra.mxu3 %v1712_v45  ;;  %v1708_v34 = vld [vmem:[#allocation3 + $0x60] sm:$0xff] }
 0x3da   : > { %v1772_v35 = vld [vmem:[#allocation2 + $0x60] sm:$0xfe]  ;;  %1958 = vmatpush.msrb.mxu1 %v1834_v47  ;;  %v2211_v47 = vld [vmem:[#allocation3 + $0x4c8] sm:$0xff] }
 0x3db   : > { %2013 = vmatpush.msra.mxu3 %v1710_v49  ;;  %v1774_v54 = vld [vmem:[#allocation2 + $0x70] sm:$0x1]  ;;  %v1810_v56 = vrot.slane %v1772_v35, 1  ;;  %v4823_v38 = vld [vmem:[#allocation2 + $0x60] sm:$0xff] }
 0x3dc   : > { %1911 = vmatmul.f32.gmra.mxu3 %v4797_v51  ;;  %v1811_v9 = vrot.slane %v1774_v54, 1  ;;  %1959 = vmatpush.msrb.mxu1 %v1832_v31  ;;  %v2186_v45 = vld [vmem:[#allocation3 + $0x400] sm:$0xff]  ;;  %v2205_v31 = vld [vmem:[#allocation3 + $0x498] sm:$0xff] }
 0x3dd   : > { %2014 = vmatpush.msra.mxu3 %v1708_v34  ;;  %v2125_v49 = vld [vmem:[#allocation2 + $0x20] sm:$0xfc]  ;;  %v1719_v34 = vld [vmem:[#allocation3 + $0xb8] sm:$0xff] }
 0x3de   : > { %v4803_v63 = vsel %vm1349_vm8, %v1810_v56, %v1811_v9  ;;  %1960 = vmatpush.msrb.mxu1 %v1830_v33  ;;  %v2159_v35 = vrot.slane %v2125_v49, 2  ;;  %v2400_v56 = vld [vmem:[%s5407_s17 + $0x20] sm:$0xff]  ;;  %v2399_v9 = vld [vmem:[%s5407_s17 + $0x18] sm:$0xff] }
 0x3df   : > { %2015 = vmatpush.msra.mxu3 %v1706_v53  ;;  %v2401_v53 = vld [vmem:[%s5407_s17 + $0x28] sm:$0xff]  ;;  %v2133_v10 = vld [vmem:[#allocation2 + $0x60] sm:$0xfc]  ;;  %v2201_v33 = vld [vmem:[#allocation3 + $0x478] sm:$0xff] }
 0x3e0   : > { %1961 = vmatpush.msrb.mxu1 %v1828_v60  ;;  %v2197_v60 = vld [vmem:[#allocation3 + $0x458] sm:$0xff] }
 0x3e1   : > { %3794 = vmatmul.msk.f32.gmra.mxu2 %vm927_vm3, %v4619_v25  ;;  %2016 = vmatpush.msra.mxu3 %v1704_v21  ;;  %v1700_v25 = vld [vmem:[#allocation3 + $0x20] sm:$0xff]  ;;  %v1717_v21 = vld [vmem:[#allocation3 + $0xa8] sm:$0xff]  ;;  %v1880_v49 = vld [vmem:[#allocation3 + $0x3b8] sm:$0xff] }
 0x3e2   : > { %1962 = vmatpush.msrb.mxu1 %v1826_v43  ;;  %v2191_v43 = vld [vmem:[#allocation3 + $0x428] sm:$0xff] }
 0x3e3   : > { %2017 = vmatpush.msra.mxu3 %v1702_v57  ;;  %1963 = vmatmul.f32.vlgmr.msrb.gmra.mxu1 %v4781_v26  ;;  %v2127_v26 = vld [vmem:[#allocation2 + $0x30] sm:$0x3]  ;;  %v1715_v57 = vld [vmem:[#allocation3 + $0x98] sm:$0xff] }
 0x3e4   : > { %1914 = vmatmul.f32.gmra.mxu3 %v4803_v63  ;;  %v2160_v54 = vrot.slane %v2127_v26, 2  ;;  %v1877_v26 = vld [vmem:[#allocation3 + $0x3a0] sm:$0xff] }
 0x3e5   : > { %2018 = vmatpush.msra.mxu3 %v1700_v25 }
 0x3e6   : > { %v4850_v25 = vsel %vm1503_vm9, %v2159_v35, %v2160_v54  ;;  %v1874_v35 = vld [vmem:[#allocation3 + $0x388] sm:$0xff]  ;;  %v1871_v54 = vld [vmem:[#allocation3 + $0x370] sm:$0xff] }
 0x3e7   : > { %2019 = vmatpush.msra.mxu3 %v1698_v0  ;;  %v2129_v0 = vld [vmem:[#allocation2 + $0x40] sm:$0xfc] }
 0x3e9   : > { %3795 = vmatmul.msk.f32.gmra.mxu2 %vm927_vm3, %v4633_v48  ;;  %2020 = vmatpush.msra.mxu3 %v1696_v4  ;;  %v2214_v48 = vld [vmem:[#allocation3 + $0x4e0] sm:$0xff]  ;;  %v1711_v4 = vld [vmem:[#allocation3 + $0x78] sm:$0xff] }
 0x3eb   : > { %2250 = vmatpush.msrb.mxu3 %v2216_v6  ;;  %1966 = vmatmul.f32.gmra.mxu1 %v4791_v41  ;;  %v1713_v41 = vld [vmem:[#allocation3 + $0x88] sm:$0xff]  ;;  %v2165_v6 = vrot.slane %v2129_v0, 2  ;;  %v1868_v0 = vld [vmem:[#allocation3 + $0x358] sm:$0xff] }
 0x3ec   : > { %2021 = vmatmul.f32.vlgmr.msra.gmra.mxu3 %v4808_v8 }
 0x3ed   : > { %2251 = vmatpush.msrb.mxu3 %v2214_v48  ;;  %v1707_v48 = vld [vmem:[#allocation3 + $0x58] sm:$0xff]  ;;  %v4858_v1 = vsel %vm1503_vm9, %v2165_v6, %v2166_v7  ;;  %v1861_v6 = vld [vmem:[#allocation3 + $0x320] sm:$0xff]  ;;  %v1862_v7 = vld [vmem:[#allocation3 + $0x328] sm:$0xff] }
 0x3ef   : > { %2252 = vmatpush.msrb.mxu3 %v2212_v36  ;;  %v1705_v36 = vld [vmem:[#allocation3 + $0x48] sm:$0xff] }
 0x3f1   : > { %3816 = vmatmul.msk.f32.vlgmr.msrb.gmra.mxu2 %vm927_vm3, %v4644_v50  ;;  %2253 = vmatpush.msrb.mxu3 %v2210_v12  ;;  %v2204_v50 = vld [vmem:[#allocation3 + $0x490] sm:$0xff] }
 0x3f2   : > { %v2135_v12 = vld [vmem:[#allocation2 + $0x70] sm:$0x3] }
 0x3f3   : > { %2254 = vmatpush.msrb.mxu3 %v2208_v14  ;;  %1969 = vmatmul.f32.gmra.mxu1 %v4797_v51  ;;  %v1701_v51 = vld [vmem:[#allocation3 + $0x28] sm:$0xff]  ;;  %v2171_v14 = vrot.slane %v2133_v10, 2  ;;  %v2172_v15 = vrot.slane %v2135_v12, 2  ;;  %v1857_v10 = vld [vmem:[#allocation3 + $0x300] sm:$0xff] }
 0x3f4   : > { %2024 = vmatmul.f32.gmra.mxu3 %v4813_v16  ;;  %v1858_v12 = vld [vmem:[#allocation3 + $0x308] sm:$0xff] }
 0x3f5   : > { %2255 = vmatpush.msrb.mxu3 %v2206_v18  ;;  %v1699_v18 = vld [vmem:[#allocation3 + $0x18] sm:$0xff]  ;;  %v4863_v32 = vsel %vm1503_vm9, %v2171_v14, %v2172_v15  ;;  %v1491_v14 = vpop.f32.mrf.mxu0  ;;  %v1756_v15 = vld [vmem:[#allocation3 + $0x1e0] sm:$0xff] }
 0x3f7   : > { %2256 = vmatpush.msrb.mxu3 %v2204_v50  ;;  %v1697_v50 = vld [vmem:[#allocation3 + $0x8] sm:$0xff] }
 0x3f9   : > { %3817 = vmatmul.msk.f32.gmra.mxu2 %vm927_vm3, %v4652_v52  ;;  %2257 = vmatpush.msrb.mxu3 %v2202_v11  ;;  %v2196_v52 = vld [vmem:[#allocation3 + $0x450] sm:$0xff]  ;;  %v2396_v11 = vld [vmem:[%s5407_s17] sm:$0xff] }
 0x3fb   : > { %2258 = vmatpush.msrb.mxu3 %v2200_v28  ;;  %1972 = vmatmul.f32.gmra.mxu1 %v4803_v63  ;;  %v2397_v63 = vld [vmem:[%s5407_s17 + $0x8] sm:$0xff]  ;;  %v2213_v28 = vld [vmem:[#allocation3 + $0x4d8] sm:$0xff] }
 0x3fc   : > { %2027 = vmatmul.f32.gmra.mxu3 %v4818_v29 }
 0x3fd   : > { %2259 = vmatpush.msrb.mxu3 %v2198_v30  ;;  %v2207_v30 = vld [vmem:[#allocation3 + $0x4a8] sm:$0xff] }
 0x3ff   : > { %2260 = vmatpush.msrb.mxu3 %v2196_v52  ;;  %v2203_v52 = vld [vmem:[#allocation3 + $0x488] sm:$0xff] }
 0x401   : > { %3818 = vmatmul.msk.f32.gmra.mxu2 %vm927_vm3, %v4660_v55  ;;  %2261 = vmatpush.msrb.mxu3 %v2194_v62  ;;  %v1727_v55 = vld [vmem:[#allocation3 + $0xf8] sm:$0xff]  ;;  %v2199_v62 = vld [vmem:[#allocation3 + $0x468] sm:$0xff] }
 0x402   : > { %2063 = vmatpush.msra.mxu1 %v1727_v55  ;;  %v1885_v55 = vld [vmem:[#allocation3 + $0x3e0] sm:$0xff] }
 0x403   : > { %2262 = vmatpush.msrb.mxu3 %v2192_v37  ;;  %v2195_v37 = vld [vmem:[#allocation3 + $0x448] sm:$0xff] }
 0x404   : > { %2030 = vmatmul.f32.gmra.mxu3 %v4823_v38  ;;  %2064 = vmatpush.msra.mxu1 %v1725_v42  ;;  %v3922_v42 = vld [vmem:[%s5405_s15] ss:$0 sm:$0xff] }
 0x405   : > { %2263 = vmatpush.msrb.mxu3 %v2190_v39  ;;  %v1887_v39 = vld [vmem:[#allocation3 + $0x3f0] sm:$0xff] }
 0x406   : > { %2065 = vmatpush.msra.mxu1 %v1723_v46  ;;  %1918 = vmatpush.msrb.mxu0 %v1887_v39  ;;  %v1881_v46 = vld [vmem:[#allocation3 + $0x3c0] sm:$0xff] }
 0x407   : > { %2264 = vmatpush.msrb.mxu3 %v2188_v59  ;;  %v2187_v59 = vld [vmem:[#allocation3 + $0x408] sm:$0xff] }
 0x408   : > { %2066 = vmatpush.msra.mxu1 %v1721_v23  ;;  %1919 = vmatpush.msrb.mxu0 %v1885_v55  ;;  %v1879_v23 = vld [vmem:[#allocation3 + $0x3b0] sm:$0xff]  ;;  %v1740_v55 = vld [vmem:[#allocation3 + $0x160] sm:$0xff] }
 0x409   : > { %3819 = vmatmul.msk.f32.gmra.mxu2 %vm927_vm3, %v4666_v58  ;;  %2265 = vmatpush.msrb.mxu3 %v2186_v45  ;;  %v4833_v58 = vsel %vm1503_vm9, %v2153_v20, %v2154_v44  ;;  %v1883_v20 = vld [vmem:[#allocation3 + $0x3d0] sm:$0xff]  ;;  %v1884_v44 = vld [vmem:[#allocation3 + $0x3d8] sm:$0xff] }
 0x40a   : > { %2067 = vmatpush.msra.mxu1 %v1719_v34  ;;  %1920 = vmatpush.msrb.mxu0 %v1883_v20  ;;  %v1875_v34 = vld [vmem:[#allocation3 + $0x390] sm:$0xff]  ;;  %v1739_v20 = vld [vmem:[#allocation3 + $0x158] sm:$0xff] }
 0x40b   : > { %2419 = vmatpush.msra.mxu3 %v2403_v22  ;;  %v1882_v22 = vld [vmem:[#allocation3 + $0x3c8] sm:$0xff] }
 0x40c   : > { %2266 = vmatmul.f32.vlgmr.msrb.gmra.mxu3 %v4833_v58  ;;  %2068 = vmatpush.msra.mxu1 %v1717_v21  ;;  %v1873_v21 = vld [vmem:[#allocation3 + $0x380] sm:$0xff] }
 0x40d   : > { %2420 = vmatpush.msra.mxu3 %v2402_v24  ;;  %1921 = vmatpush.msrb.mxu0 %v1881_v46  ;;  %v1878_v24 = vld [vmem:[#allocation3 + $0x3a8] sm:$0xff]  ;;  %v1736_v46 = vld [vmem:[#allocation3 + $0x140] sm:$0xff] }
 0x40e   : > { %2069 = vmatpush.msra.mxu1 %v1715_v57  ;;  %v1869_v57 = vld [vmem:[#allocation3 + $0x360] sm:$0xff] }
 0x40f   : > { %2421 = vmatpush.msra.mxu3 %v2401_v53  ;;  %1922 = vmatpush.msrb.mxu0 %v1879_v23  ;;  %v1876_v53 = vld [vmem:[#allocation3 + $0x398] sm:$0xff] }
 0x410   : > { %2070 = vmatpush.msra.mxu1 %v1713_v41  ;;  %v1867_v41 = vld [vmem:[#allocation3 + $0x350] sm:$0xff] }
 0x411   : > { %2422 = vmatpush.msra.mxu3 %v2400_v56  ;;  %1923 = vmatpush.msrb.mxu0 %v1877_v26  ;;  %v1872_v56 = vld [vmem:[#allocation3 + $0x378] sm:$0xff] }
 0x412   : > { %2071 = vmatpush.msra.mxu1 %v1711_v4  ;;  %v1863_v4 = vld [vmem:[#allocation3 + $0x330] sm:$0xff] }
 0x413   : > { %2423 = vmatpush.msra.mxu3 %v2399_v9  ;;  %1924 = vmatpush.msrb.mxu0 %v1875_v34  ;;  %v1870_v9 = vld [vmem:[#allocation3 + $0x368] sm:$0xff]  ;;  %v1732_v34 = vld [vmem:[#allocation3 + $0x120] sm:$0xff] }
 0x414   : > { %2269 = vmatmul.f32.gmra.mxu3 %v4850_v25  ;;  %2072 = vmatpush.msra.mxu1 %v1709_v5  ;;  %v1864_v5 = vld [vmem:[#allocation3 + $0x338] sm:$0xff] }
 0x415   : > { %2424 = vmatpush.msra.mxu3 %v2398_v61  ;;  %1925 = vmatpush.msrb.mxu0 %v1873_v21  ;;  %v1866_v61 = vld [vmem:[#allocation3 + $0x348] sm:$0xff] }
 0x416   : > { %2073 = vmatpush.msra.mxu1 %v1707_v48 }
 0x417   : > { %2425 = vmatpush.msra.mxu3 %v2397_v63  ;;  %1926 = vmatpush.msrb.mxu0 %v1871_v54  ;;  %v1752_v63 = vld [vmem:[#allocation3 + $0x1c0] sm:$0xff]  ;;  %v1730_v54 = vld [vmem:[#allocation3 + $0x110] sm:$0xff] }
 0x418   : > { %2074 = vmatpush.msra.mxu1 %v1705_v36  ;;  %v1860_v36 = vld [vmem:[#allocation3 + $0x318] sm:$0xff] }
 0x419   : > { %2426 = vmatpush.msra.mxu3 %v2396_v11  ;;  %1927 = vmatpush.msrb.mxu0 %v1869_v57  ;;  %v1753_v11 = vld [vmem:[#allocation3 + $0x1c8] sm:$0xff] }
 0x41a   : > { %2075 = vmatpush.msra.mxu1 %v1703_v2  ;;  %v1758_v2 = vld [vmem:[#allocation3 + $0x1f0] sm:$0xff] }
 0x41b   : > { %1928 = vmatpush.msrb.mxu0 %v1867_v41 }
 0x41c   : > { %2272 = vmatmul.f32.gmra.mxu3 %v4858_v1  ;;  %2076 = vmatpush.msra.mxu1 %v1701_v51  ;;  %v1759_v51 = vld [vmem:[#allocation3 + $0x1f8] sm:$0xff] }
 0x41d   : > { %1929 = vmatpush.msrb.mxu0 %v1865_v3 }
 0x41e   : > { %2077 = vmatpush.msra.mxu1 %v1699_v18  ;;  %v1757_v18 = vld [vmem:[#allocation3 + $0x1e8] sm:$0xff] }
 0x41f   : > { %1930 = vmatpush.msrb.mxu0 %v1863_v4 }
 0x420   : > { %2078 = vmatpush.msra.mxu1 %v1697_v50  ;;  %v1754_v50 = vld [vmem:[#allocation3 + $0x1d0] sm:$0xff] }
 0x421   : > { %2079 = vmatmul.f32.vlgmr.msra.gmra.mxu1 %v4808_v8  ;;  %v2209_v8 = vld [vmem:[#allocation3 + $0x4b8] sm:$0xff]  ;;  %1931 = vmatpush.msrb.mxu0 %v1861_v6 }
 0x422   : > { %2308 = vmatpush.msrb.mxu1 %v2217_v19  ;;  %v1755_v19 = vld [vmem:[#allocation3 + $0x1d8] sm:$0xff] }
 0x424   : > { %2275 = vmatmul.f32.gmra.mxu3 %v4863_v32  ;;  %2309 = vmatpush.msrb.mxu1 %v2215_v27  ;;  %v1750_v27 = vld [vmem:[#allocation3 + $0x1b0] sm:$0xff] }
 0x426   : > { %2310 = vmatpush.msrb.mxu1 %v2213_v28  ;;  %v1751_v28 = vld [vmem:[#allocation3 + $0x1b8] sm:$0xff] }
 0x428   : > { %2311 = vmatpush.msrb.mxu1 %v2211_v47 }
 0x429   : > { %2082 = vmatmul.f32.gmra.mxu1 %v4813_v16  ;;  %v2193_v16 = vld [vmem:[#allocation3 + $0x438] sm:$0xff] }
 0x42a   : > { %2312 = vmatpush.msrb.mxu1 %v2209_v8  ;;  %v4894_v8 = vperm.slane %v4746_v13, 1  ;;  %v1742_v13 = vld [vmem:[#allocation3 + $0x170] sm:$0xff] }
 0x42c   : > { %2313 = vmatpush.msrb.mxu1 %v2207_v30  ;;  %v1748_v30 = vld [vmem:[#allocation3 + $0x1a0] sm:$0xff] }
 0x42e   : > { %2314 = vmatpush.msrb.mxu1 %v2205_v31  ;;  %v1749_v31 = vld [vmem:[#allocation3 + $0x1a8] sm:$0xff] }
 0x430   : > { %2315 = vmatpush.msrb.mxu1 %v2203_v52  ;;  %v1494_v52 = vpop.f32.mrf.mxu0 }
 0x431   : > { %2085 = vmatmul.f32.gmra.mxu1 %v4818_v29  ;;  %v1886_v29 = vld [vmem:[#allocation3 + $0x3e8] sm:$0xff] }
 0x432   : > { %2316 = vmatpush.msrb.mxu1 %v2201_v33  ;;  %1977 = vmatpush.msra.mxu2 %v1886_v29  ;;  %v1741_v29 = vld [vmem:[#allocation3 + $0x168] sm:$0xff] }
 0x434   : > { %2317 = vmatpush.msrb.mxu1 %v2199_v62  ;;  %1978 = vmatpush.msra.mxu2 %v1884_v44 }
 0x436   : > { %2318 = vmatpush.msrb.mxu1 %v2197_v60  ;;  %1979 = vmatpush.msra.mxu2 %v1882_v22  ;;  %v1746_v60 = vld [vmem:[#allocation3 + $0x190] sm:$0xff]  ;;  %v1737_v22 = vld [vmem:[#allocation3 + $0x148] sm:$0xff] }
 0x438   : > { %2319 = vmatpush.msrb.mxu1 %v2195_v37  ;;  %1980 = vmatpush.msra.mxu2 %v1880_v49  ;;  %v1747_v37 = vld [vmem:[#allocation3 + $0x198] sm:$0xff]  ;;  %v1497_v23 = vpop.f32.mrf.mxu0 }
 0x439   : > { %2088 = vmatmul.f32.gmra.mxu1 %v4823_v38 }
 0x43a   : > { %2320 = vmatpush.msrb.mxu1 %v2193_v16  ;;  %1981 = vmatpush.msra.mxu2 %v1878_v24  ;;  %v1744_v16 = vld [vmem:[#allocation3 + $0x180] sm:$0xff]  ;;  %v1734_v24 = vld [vmem:[#allocation3 + $0x130] sm:$0xff] }
 0x43c   : > { %2321 = vmatpush.msrb.mxu1 %v2191_v43  ;;  %1982 = vmatpush.msra.mxu2 %v1876_v53  ;;  %v1745_v43 = vld [vmem:[#allocation3 + $0x188] sm:$0xff] }
 0x43d   : > { %v1733_v53 = vld [vmem:[#allocation3 + $0x128] sm:$0xff] }
 0x43e   : > { %2322 = vmatpush.msrb.mxu1 %v2189_v40  ;;  %1983 = vmatpush.msra.mxu2 %v1874_v35  ;;  %v1743_v40 = vld [vmem:[#allocation3 + $0x178] sm:$0xff] }
 0x440   : > { %2323 = vmatpush.msrb.mxu1 %v2187_v59  ;;  %1984 = vmatpush.msra.mxu2 %v1872_v56  ;;  %v1731_v56 = vld [vmem:[#allocation3 + $0x118] sm:$0xff]  ;;  %v1500_v6 = vpop.f32.mrf.mxu0 }
 0x441   : > { %2324 = vmatmul.f32.vlgmr.msrb.gmra.mxu1 %v4833_v58 }
 0x442   : > { %1985 = vmatpush.msra.mxu2 %v1870_v9 }
 0x444   : > { %1986 = vmatpush.msra.mxu2 %v1868_v0 }
 0x446   : > { %1987 = vmatpush.msra.mxu2 %v1866_v61  ;;  %v1729_v61 = vld [vmem:[#allocation3 + $0x108] sm:$0xff] }
 0x448   : > { %1988 = vmatpush.msra.mxu2 %v1864_v5 }
 0x449   : > { %2327 = vmatmul.f32.gmra.mxu1 %v4850_v25 }
 0x44a   : > { %1989 = vmatpush.msra.mxu2 %v1862_v7 }
 0x44c   : > { %v1322_v38 = vpop.f32.mrf.mxu2  ;;  %1990 = vmatpush.msra.mxu2 %v1860_v36  ;;  %v2249_v36 = vld [vmem:[#allocation3 + $0x5f8] sm:$0xff] }
 0x44d   : > { %v1323_v45 = vadd.f32 %v3922_v42, %v1322_v38  ;;  %v1738_v38 = vld [vmem:[#allocation3 + $0x150] sm:$0xff] }
 0x44e   : > { %1991 = vmatpush.msra.mxu2 %v1858_v12  ;;  %v2247_v12 = vld [vmem:[#allocation3 + $0x5e8] sm:$0xff] }
 0x44f   : > { %3820 = vmatmul.msk.f32.vlgmr.msra.gmra.mxu3 %vm1053_vm7, %v1323_v45 }
 0x450   : > { %2092 = vmatpush.msrb.mxu2 %v1759_v51 }
 0x451   : > { %2330 = vmatmul.f32.gmra.mxu1 %v4858_v1  ;;  %v1859_v1 = vld [vmem:[#allocation3 + $0x310] sm:$0xff] }
 0x452   : > { %1932 = vmatpush.msrb.mxu0 %v1859_v1  ;;  %2093 = vmatpush.msrb.mxu2 %v1757_v18  ;;  %v2248_v1 = vld [vmem:[#allocation3 + $0x5f0] sm:$0xff] }
 0x454   : > { %v4882_v58 = vpop.f32.mrf.mxu2  ;;  %1933 = vmatpush.msrb.mxu0 %v1857_v10  ;;  %2094 = vmatpush.msrb.mxu2 %v1755_v19  ;;  %v2246_v10 = vld [vmem:[#allocation3 + $0x5e0] sm:$0xff] }
 0x455   : > { %v1492_v47 = vadd.f32 %v1491_v14, %v4882_v58  ;;  %v1735_v58 = vld [vmem:[#allocation3 + $0x138] sm:$0xff]  ;;  %v2244_v14 = vld [vmem:[#allocation3 + $0x5d0] sm:$0xff]  ;;  %v2242_v19 = vld [vmem:[#allocation3 + $0x5c0] sm:$0xff] }
 0x456   : > { %2034 = vmatpush.msra.mxu0 %v1758_v2  ;;  %2095 = vmatpush.msrb.mxu2 %v1753_v11 }
 0x458   : > { %2035 = vmatpush.msra.mxu0 %v1756_v15  ;;  %2096 = vmatpush.msrb.mxu2 %v1751_v28  ;;  %v2245_v15 = vld [vmem:[#allocation3 + $0x5d8] sm:$0xff]  ;;  %v2243_v28 = vld [vmem:[#allocation3 + $0x5c8] sm:$0xff] }
 0x459   : > { %2333 = vmatmul.f32.gmra.mxu1 %v4863_v32 }
 0x45a   : > { %2036 = vmatpush.msra.mxu0 %v1754_v50  ;;  %2097 = vmatpush.msrb.mxu2 %v1749_v31 }
 0x45c   : > { %v4885_v25 = vpop.f32.mrf.mxu2  ;;  %2037 = vmatpush.msra.mxu0 %v1752_v63  ;;  %2098 = vmatpush.msrb.mxu2 %v1747_v37 }
 0x45d   : > { %v1495_v59 = vadd.f32 %v1494_v52, %v4885_v25  ;;  %v1728_v25 = vld [vmem:[#allocation3 + $0x100] sm:$0xff]  ;;  %v2240_v52 = vld [vmem:[#allocation3 + $0x5b0] sm:$0xff] }
 0x45e   : > { %2038 = vmatpush.msra.mxu0 %v1750_v27  ;;  %2099 = vmatpush.msrb.mxu2 %v1745_v43  ;;  %v2237_v43 = vld [vmem:[#allocation3 + $0x598] sm:$0xff] }
 0x460   : > { %2039 = vmatpush.msra.mxu0 %v1748_v30  ;;  %2100 = vmatpush.msrb.mxu2 %v1743_v40  ;;  %v2235_v40 = vld [vmem:[#allocation3 + $0x588] sm:$0xff] }
 0x462   : > { %2040 = vmatpush.msra.mxu0 %v1746_v60  ;;  %2101 = vmatpush.msrb.mxu2 %v1741_v29  ;;  %v2239_v60 = vld [vmem:[#allocation3 + $0x5a8] sm:$0xff] }
 0x464   : > { %v4888_v48 = vpop.f32.mrf.mxu2  ;;  %2041 = vmatpush.msra.mxu0 %v1744_v16  ;;  %2102 = vmatpush.msrb.mxu2 %v1739_v20  ;;  %v2236_v16 = vld [vmem:[#allocation3 + $0x590] sm:$0xff]  ;;  %v2231_v20 = vld [vmem:[#allocation3 + $0x568] sm:$0xff] }
 0x465   : > { %v1498_v21 = vadd.f32 %v1497_v23, %v4888_v48 }
 0x466   : > { %2042 = vmatpush.msra.mxu0 %v1742_v13  ;;  %2103 = vmatpush.msrb.mxu2 %v1737_v22 }
 0x468   : > { %2043 = vmatpush.msra.mxu0 %v1740_v55  ;;  %2104 = vmatpush.msrb.mxu2 %v1735_v58 }
 0x46a   : > { %2044 = vmatpush.msra.mxu0 %v1738_v38  ;;  %2105 = vmatpush.msrb.mxu2 %v1733_v53  ;;  %v2230_v38 = vld [vmem:[#allocation3 + $0x560] sm:$0xff]  ;;  %v2225_v53 = vld [vmem:[#allocation3 + $0x538] sm:$0xff] }
 0x46c   : > { %v4890_v32 = vpop.f32.mrf.mxu2  ;;  %2045 = vmatpush.msra.mxu0 %v1736_v46  ;;  %2106 = vmatpush.msrb.mxu2 %v1731_v56  ;;  %v2221_v56 = vld [vmem:[#allocation3 + $0x518] sm:$0xff] }
 0x46d   : > { %v1501_v2 = vadd.f32 %v1500_v6, %v4890_v32 }
 0x46e   : > { %2046 = vmatpush.msra.mxu0 %v1734_v24  ;;  %2107 = vmatpush.msrb.mxu2 %v1729_v61 }
 0x470   : > { %2047 = vmatpush.msra.mxu0 %v1732_v34  ;;  %v2224_v34 = vld [vmem:[#allocation3 + $0x530] sm:$0xff] }
 0x472   : > { %2048 = vmatpush.msra.mxu0 %v1730_v54  ;;  %v2220_v54 = vld [vmem:[#allocation3 + $0x510] sm:$0xff] }
 0x474   : > { %v1579_v33 = vpop.f32.mrf.mxu2  ;;  %2049 = vmatpush.msra.mxu0 %v1728_v25 }
 0x475   : > { %v1592_v62 = vadd.f32 %v1579_v33, %v1492_v47  ;;  %v2241_v33 = vld [vmem:[#allocation3 + $0x5b8] sm:$0xff] }
 0x477   : > { %v1606_v39 = vadd.f32 %v4894_v8, %v1592_v62  ;;  %v2238_v62 = vld [vmem:[#allocation3 + $0x5a0] sm:$0xff] }
 0x479   : > { %v1614_v17 = vmax.f32 %v1606_v39, 0.0 }
 0x47b   : > { %v1657_v42 = vrot.slane %v1614_v17, 7 }
 0x47c   : > { %v1582_v44 = vpop.f32.mrf.mxu2 }
 0x47d   : > { %1673 = vst [vmem:[#allocation2 + $0x8] sm:$0xfe] %v1657_v42  ;;  %v1594_v45 = vadd.f32 %v1582_v44, %v1495_v59  ;;  %v2232_v59 = vld [vmem:[#allocation3 + $0x570] sm:$0xff] }
 0x47e   : > { %1675 = vst [vmem:[#allocation2 + $0x18] sm:$0x1] %v1657_v42  ;;  %v2233_v42 = vld [vmem:[#allocation3 + $0x578] sm:$0xff]  ;;  %v2228_v44 = vld [vmem:[#allocation3 + $0x550] sm:$0xff] }
 0x47f   : > { %v1608_v49 = vadd.f32 %v4894_v8, %v1594_v45  ;;  %v2229_v45 = vld [vmem:[#allocation3 + $0x558] sm:$0xff] }
 0x481   : > { %v1616_v26 = vmax.f32 %v1608_v49, 0.0  ;;  %v2226_v49 = vld [vmem:[#allocation3 + $0x540] sm:$0xff] }
 0x483   : > { %v1659_v35 = vrot.slane %v1616_v26, 7  ;;  %v2227_v26 = vld [vmem:[#allocation3 + $0x548] sm:$0xff] }
 0x484   : > { %v1585_v57 = vpop.f32.mrf.mxu2  ;;  %v1761_v9 = vld [vmem:[#allocation2 + $0x8] sm:$0xfe] }
 0x485   : > { %1677 = vst [vmem:[#allocation2 + $0x28] sm:$0xfe] %v1659_v35  ;;  %v1596_v41 = vadd.f32 %v1585_v57, %v1498_v21  ;;  %v1763_v0 = vld [vmem:[#allocation2 + $0x18] sm:$0x1]  ;;  %v1795_v3 = vrot.slane %v1761_v9, 1  ;;  %v2222_v21 = vld [vmem:[#allocation3 + $0x520] sm:$0xff] }
 0x486   : > { %1679 = vst [vmem:[#allocation2 + $0x38] sm:$0x1] %v1659_v35  ;;  %v1796_v4 = vrot.slane %v1763_v0, 1  ;;  %v2223_v35 = vld [vmem:[#allocation3 + $0x528] sm:$0xff]  ;;  %v2218_v57 = vld [vmem:[#allocation3 + $0x500] sm:$0xff] }
 0x487   : > { %v1610_v5 = vadd.f32 %v4894_v8, %v1596_v41  ;;  %v2219_v9 = vld [vmem:[#allocation3 + $0x508] sm:$0xff] }
 0x488   : > { %v1797_v7 = vsel %vm1349_vm8, %v1795_v3, %v1796_v4  ;;  %v1689_v25 = vld [vmem:[#allocation2 + $0x8] sm:$0xff]  ;;  %v2124_v4 = vld [vmem:[#allocation2 + $0x18] sm:$0x3] }
 0x489   : > { %v1618_v48 = vmax.f32 %v1610_v5, 0.0  ;;  %1934 = vmatmul.f32.vlgmr.msrb.gmra.mxu0 %v1797_v7  ;;  %1992 = vmatmul.f32.vlgmr.msra.gmra.mxu2 %v1797_v7  ;;  %v2122_v61 = vld [vmem:[#allocation2 + $0x8] sm:$0xfc]  ;;  %v2157_v6 = vrot.slane %v2124_v4, 2 }
 0x48a   : > { %2279 = vmatpush.msrb.mxu0 %v2248_v1  ;;  %2337 = vmatpush.msra.mxu2 %v2249_v36  ;;  %v2156_v5 = vrot.slane %v2122_v61, 2  ;;  %v2534_v61 = vld [vmem:[#allocation6 + $0x138] sm:$0xff] }
 0x48b   : > { %v1661_v51 = vrot.slane %v1618_v48, 7 }
 0x48c   : > { %v1588_v18 = vpop.f32.mrf.mxu2  ;;  %v1765_v50 = vld [vmem:[#allocation2 + $0x28] sm:$0xfe]  ;;  %2280 = vmatpush.msrb.mxu0 %v2246_v10  ;;  %2338 = vmatpush.msra.mxu2 %v2247_v12  ;;  %v2158_v7 = vsel %vm1503_vm9, %v2156_v5, %v2157_v6  ;;  %v2553_v5 = vld [vmem:[#allocation6 + $0x1d0] sm:$0xff] }
 0x48d   : > { %1681 = vst [vmem:[#allocation2 + $0x48] sm:$0xfe] %v1661_v51  ;;  %v1598_v63 = vadd.f32 %v1588_v18, %v1501_v2  ;;  %v1767_v11 = vld [vmem:[#allocation2 + $0x38] sm:$0x1]  ;;  %v1801_v27 = vrot.slane %v1765_v50, 1  ;;  %v1691_v41 = vld [vmem:[#allocation2 + $0x28] sm:$0xff] }
 0x48e   : > { %1683 = vst [vmem:[#allocation2 + $0x58] sm:$0x1] %v1661_v51  ;;  %v1802_v47 = vrot.slane %v1767_v11, 1  ;;  %2281 = vmatpush.msrb.mxu0 %v2244_v14  ;;  %2339 = vmatpush.msra.mxu2 %v2245_v15  ;;  %v2126_v48 = vld [vmem:[#allocation2 + $0x28] sm:$0xfc] }
 0x48f   : > { %v1612_v30 = vadd.f32 %v4894_v8, %v1598_v63  ;;  %v2234_v8 = vld [vmem:[#allocation3 + $0x580] sm:$0xff]  ;;  %v2128_v1 = vld [vmem:[#allocation2 + $0x38] sm:$0x3]  ;;  %v2162_v36 = vrot.slane %v2126_v48, 2  ;;  %v2437_v48 = vld [vmem:[#allocation6 + $0x30] sm:$0xff] }
 0x490   : > { %v1803_v32 = vsel %vm1349_vm8, %v1801_v27, %v1802_v47  ;;  %2282 = vmatpush.msrb.mxu0 %v2242_v19  ;;  %2340 = vmatpush.msra.mxu2 %v2243_v28  ;;  %v2163_v10 = vrot.slane %v2128_v1, 2  ;;  %v4911_v28 = vpop.f32.mrf.mxu3  ;;  %v4913_v47 = vpop.f32.mrf.mxu1  ;;  %v2456_v1 = vld [vmem:[#allocation6 + $0xc8] sm:$0xff] }
 0x491   : > { %v1620_v31 = vmax.f32 %v1612_v30, 0.0  ;;  %1937 = vmatmul.f32.gmra.mxu0 %v1803_v32  ;;  %1995 = vmatmul.f32.gmra.mxu2 %v1803_v32 }
 0x492   : > { %2283 = vmatpush.msrb.mxu0 %v2240_v52  ;;  %2341 = vmatpush.msra.mxu2 %v2241_v33  ;;  %v2164_v12 = vsel %vm1503_vm9, %v2162_v36, %v2163_v10  ;;  %v2533_v36 = vld [vmem:[#allocation6 + $0x130] sm:$0xff]  ;;  %v2552_v10 = vld [vmem:[#allocation6 + $0x1c8] sm:$0xff] }
 0x493   : > { %v1663_v37 = vrot.slane %v1620_v31, 7 }
 0x494   : > { %v1769_v39 = vld [vmem:[#allocation2 + $0x48] sm:$0xfe]  ;;  %2284 = vmatpush.msrb.mxu0 %v2238_v62  ;;  %2342 = vmatpush.msra.mxu2 %v2239_v60  ;;  %v2446_v60 = vld [vmem:[#allocation6 + $0x78] sm:$0xff] }
 0x495   : > { %1685 = vst [vmem:[#allocation2 + $0x68] sm:$0xfe] %v1663_v37  ;;  %v1771_v17 = vld [vmem:[#allocation2 + $0x58] sm:$0x1]  ;;  %v1807_v13 = vrot.slane %v1769_v39, 1  ;;  %v1693_v0 = vld [vmem:[#allocation2 + $0x48] sm:$0xff] }
 0x496   : > { %1687 = vst [vmem:[#allocation2 + $0x78] sm:$0x1] %v1663_v37  ;;  %v1808_v55 = vrot.slane %v1771_v17, 1  ;;  %2285 = vmatpush.msrb.mxu0 %v2236_v16  ;;  %2343 = vmatpush.msra.mxu2 %v2237_v43  ;;  %v2130_v2 = vld [vmem:[#allocation2 + $0x48] sm:$0xfc]  ;;  %v2542_v37 = vld [vmem:[#allocation6 + $0x178] sm:$0xff] }
 0x497   : > { %v2132_v51 = vld [vmem:[#allocation2 + $0x58] sm:$0x3]  ;;  %v2168_v14 = vrot.slane %v2130_v2, 2  ;;  %v2445_v39 = vld [vmem:[#allocation6 + $0x70] sm:$0xff]  ;;  %v2444_v17 = vld [vmem:[#allocation6 + $0x68] sm:$0xff] }
 0x498   : > { %v1809_v29 = vsel %vm1349_vm8, %v1807_v13, %v1808_v55  ;;  %2286 = vmatpush.msrb.mxu0 %v2234_v8  ;;  %2344 = vmatpush.msra.mxu2 %v2235_v40  ;;  %v2169_v15 = vrot.slane %v2132_v51, 2  ;;  %v4915_v30 = vpop.f32.mrf.mxu3  ;;  %v4917_v32 = vpop.f32.mrf.mxu1  ;;  %v2541_v8 = vld [vmem:[#allocation6 + $0x170] sm:$0xff]  ;;  %v2540_v13 = vld [vmem:[#allocation6 + $0x168] sm:$0xff]  ;;  %v2443_v40 = vld [vmem:[#allocation6 + $0x60] sm:$0xff] }
 0x499   : > { %1940 = vmatmul.f32.gmra.mxu0 %v1809_v29  ;;  %1998 = vmatmul.f32.gmra.mxu2 %v1809_v29  ;;  %v2462_v55 = vld [vmem:[#allocation6 + $0xf8] sm:$0xff]  ;;  %v2539_v29 = vld [vmem:[#allocation6 + $0x160] sm:$0xff]  ;;  %v2532_v51 = vld [vmem:[#allocation6 + $0x128] sm:$0xff] }
 0x49a   : > { %2287 = vmatpush.msrb.mxu0 %v2232_v59  ;;  %2345 = vmatpush.msra.mxu2 %v2233_v42  ;;  %v2170_v18 = vsel %vm1503_vm9, %v2168_v14, %v2169_v15  ;;  %v2558_v59 = vld [vmem:[#allocation6 + $0x1f8] sm:$0xff]  ;;  %v2455_v2 = vld [vmem:[#allocation6 + $0xc0] sm:$0xff] }
 0x49b   : > { %2505 = vmatpush.msra.mxu1 %v2462_v55  ;;  %2593 = vmatpush.msrb.mxu3 %v2558_v59  ;;  %v2551_v14 = vld [vmem:[#allocation6 + $0x1c0] sm:$0xff]  ;;  %v2432_v55 = vld [vmem:[#allocation6 + $0x8] sm:$0xff] }
 0x49c   : > { %v1773_v46 = vld [vmem:[#allocation2 + $0x68] sm:$0xfe]  ;;  %2288 = vmatpush.msrb.mxu0 %v2230_v38  ;;  %2346 = vmatpush.msra.mxu2 %v2231_v20  ;;  %v2442_v20 = vld [vmem:[#allocation6 + $0x58] sm:$0xff]  ;;  %v2435_v15 = vld [vmem:[#allocation6 + $0x20] sm:$0xff] }
 0x49d   : > { %v1775_v22 = vld [vmem:[#allocation2 + $0x78] sm:$0x1]  ;;  %v1813_v23 = vrot.slane %v1773_v46, 1  ;;  %v1695_v3 = vld [vmem:[#allocation2 + $0x68] sm:$0xff]  ;;  %v2557_v46 = vld [vmem:[#allocation6 + $0x1f0] sm:$0xff] }
 0x49e   : > { %v1814_v24 = vrot.slane %v1775_v22, 1  ;;  %2289 = vmatpush.msrb.mxu0 %v2228_v44  ;;  %2347 = vmatpush.msra.mxu2 %v2229_v45  ;;  %v2134_v50 = vld [vmem:[#allocation2 + $0x68] sm:$0xfc]  ;;  %v2136_v19 = vld [vmem:[#allocation2 + $0x78] sm:$0x3]  ;;  %v2461_v44 = vld [vmem:[#allocation6 + $0xf0] sm:$0xff] }
 0x49f   : > { %v2174_v63 = vrot.slane %v2134_v50, 2  ;;  %v2175_v11 = vrot.slane %v2136_v19, 2  ;;  %v2538_v45 = vld [vmem:[#allocation6 + $0x158] sm:$0xff]  ;;  %2506 = vmatpush.msra.mxu1 %v2461_v44  ;;  %2594 = vmatpush.msrb.mxu3 %v2557_v46  ;;  %v2531_v50 = vld [vmem:[#allocation6 + $0x120] sm:$0xff]  ;;  %v2528_v59 = vld [vmem:[#allocation6 + $0x108] sm:$0xff] }
 0x4a0   : > { %v1815_v58 = vsel %vm1349_vm8, %v1813_v23, %v1814_v24  ;;  %2290 = vmatpush.msrb.mxu0 %v2226_v49  ;;  %2348 = vmatpush.msra.mxu2 %v2227_v26  ;;  %v1912_v31 = vpop.f32.mrf.mxu3  ;;  %v4921_v33 = vpop.f32.mrf.mxu1  ;;  %v2441_v23 = vld [vmem:[#allocation6 + $0x50] sm:$0xff]  ;;  %v2460_v49 = vld [vmem:[#allocation6 + $0xe8] sm:$0xff]  ;;  %v2550_v19 = vld [vmem:[#allocation6 + $0x1b8] sm:$0xff] }
 0x4a1   : > { %1943 = vmatmul.f32.gmra.mxu0 %v1815_v58  ;;  %2001 = vmatmul.f32.gmra.mxu2 %v1815_v58  ;;  %v2176_v27 = vsel %vm1503_vm9, %v2174_v63, %v2175_v11  ;;  %v2537_v26 = vld [vmem:[#allocation6 + $0x150] sm:$0xff]  ;;  %v2556_v58 = vld [vmem:[#allocation6 + $0x1e8] sm:$0xff]  ;;  %v2431_v44 = vld [vmem:[#allocation6] sm:$0xff] }
 0x4a2   : > { %2291 = vmatpush.msrb.mxu0 %v2224_v34  ;;  %2349 = vmatpush.msra.mxu2 %v2225_v53  ;;  %v2440_v34 = vld [vmem:[#allocation6 + $0x48] sm:$0xff]  ;;  %v2459_v53 = vld [vmem:[#allocation6 + $0xe0] sm:$0xff] }
 0x4a3   : > { %2507 = vmatpush.msra.mxu1 %v2460_v49  ;;  %2595 = vmatpush.msrb.mxu3 %v2556_v58  ;;  %v2527_v46 = vld [vmem:[#allocation6 + $0x100] sm:$0xff]  ;;  %v2718_v49 = vld [vmem:[#allocation6 + $0x378] sm:$0xff] }
 0x4a4   : > { %2292 = vmatpush.msrb.mxu0 %v2222_v21  ;;  %2350 = vmatpush.msra.mxu2 %v2223_v35  ;;  %v2536_v35 = vld [vmem:[#allocation6 + $0x148] sm:$0xff] }
 0x4a5   : > { %2508 = vmatpush.msra.mxu1 %v2459_v53  ;;  %v2545_v53 = vld [vmem:[#allocation6 + $0x190] sm:$0xff] }
 0x4a6   : > { %2293 = vmatpush.msrb.mxu0 %v2220_v54  ;;  %2351 = vmatpush.msra.mxu2 %v2221_v56  ;;  %v2555_v54 = vld [vmem:[#allocation6 + $0x1e0] sm:$0xff] }
 0x4a7   : > { %v2439_v56 = vld [vmem:[#allocation6 + $0x40] sm:$0xff]  ;;  %2596 = vmatpush.msrb.mxu3 %v2555_v54  ;;  %v2717_v54 = vld [vmem:[#allocation6 + $0x370] sm:$0xff] }
 0x4a8   : > { %2294 = vmatpush.msrb.mxu0 %v2218_v57  ;;  %2352 = vmatpush.msra.mxu2 %v2219_v9  ;;  %v4925_v16 = vpop.f32.mrf.mxu3  ;;  %v4929_v42 = vpop.f32.mrf.mxu1  ;;  %v2458_v57 = vld [vmem:[#allocation6 + $0xd8] sm:$0xff]  ;;  %v2535_v9 = vld [vmem:[#allocation6 + $0x140] sm:$0xff] }
 0x4a9   : > { %2050 = vmatmul.f32.vlgmr.msra.gmra.mxu0 %v1689_v25  ;;  %2108 = vmatmul.f32.vlgmr.msrb.gmra.mxu2 %v1689_v25  ;;  %v2554_v25 = vld [vmem:[#allocation6 + $0x1d8] sm:$0xff] }
 0x4aa   : > { %2485 = vmatpush.msra.mxu0 %v2446_v60  ;;  %2573 = vmatpush.msrb.mxu2 %v2542_v37  ;;  %v2549_v60 = vld [vmem:[#allocation6 + $0x1b0] sm:$0xff] }
 0x4ab   : > { %2509 = vmatpush.msra.mxu1 %v2458_v57  ;;  %2597 = vmatpush.msrb.mxu3 %v2554_v25  ;;  %v2448_v57 = vld [vmem:[#allocation6 + $0x88] sm:$0xff] }
 0x4ac   : > { %2486 = vmatpush.msra.mxu0 %v2445_v39  ;;  %2574 = vmatpush.msrb.mxu2 %v2541_v8  ;;  %v2433_v39 = vld [vmem:[#allocation6 + $0x10] sm:$0xff]  ;;  %v2452_v8 = vld [vmem:[#allocation6 + $0xa8] sm:$0xff] }
 0x4ad   : > { %2598 = vmatpush.msrb.mxu3 %v2553_v5  ;;  %v2628_v25 = vld [vmem:[#allocation6 + $0x268] sm:$0xff]  ;;  %v2646_v5 = vld [vmem:[#allocation6 + $0x2f8] sm:$0xff] }
 0x4ae   : > { %2487 = vmatpush.msra.mxu0 %v2444_v17  ;;  %2575 = vmatpush.msrb.mxu2 %v2540_v13  ;;  %v2529_v17 = vld [vmem:[#allocation6 + $0x110] sm:$0xff]  ;;  %v2548_v13 = vld [vmem:[#allocation6 + $0x1a8] sm:$0xff] }
 0x4af   : > { %2599 = vmatpush.msrb.mxu3 %v2552_v10  ;;  %v2626_v10 = vld [vmem:[#allocation6 + $0x258] sm:$0xff] }
 0x4b0   : > { %2488 = vmatpush.msra.mxu0 %v2443_v40  ;;  %2576 = vmatpush.msrb.mxu2 %v2539_v29  ;;  %v4935_v21 = vpop.f32.mrf.mxu3  ;;  %v4940_v6 = vpop.f32.mrf.mxu1  ;;  %v2451_v29 = vld [vmem:[#allocation6 + $0xa0] sm:$0xff] }
 0x4b1   : > { %2053 = vmatmul.f32.gmra.mxu0 %v1691_v41  ;;  %2111 = vmatmul.f32.gmra.mxu2 %v1691_v41 }
 0x4b2   : > { %2489 = vmatpush.msra.mxu0 %v2442_v20  ;;  %2577 = vmatpush.msrb.mxu2 %v2538_v45  ;;  %v2547_v20 = vld [vmem:[#allocation6 + $0x1a0] sm:$0xff]  ;;  %v2450_v45 = vld [vmem:[#allocation6 + $0x98] sm:$0xff] }
 0x4b3   : > { %2600 = vmatpush.msrb.mxu3 %v2551_v14  ;;  %v2733_v14 = vld [vmem:[#allocation6 + $0x3f0] sm:$0xff] }
 0x4b4   : > { %2490 = vmatpush.msra.mxu0 %v2441_v23  ;;  %2578 = vmatpush.msrb.mxu2 %v2537_v26  ;;  %v2630_v23 = vld [vmem:[#allocation6 + $0x278] sm:$0xff] }
 0x4b5   : > { %2601 = vmatpush.msrb.mxu3 %v2550_v19 }
 0x4b6   : > { %2491 = vmatpush.msra.mxu0 %v2440_v34  ;;  %2579 = vmatpush.msrb.mxu2 %v2536_v35  ;;  %v2449_v34 = vld [vmem:[#allocation6 + $0x90] sm:$0xff] }
 0x4b7   : > { %2602 = vmatpush.msrb.mxu3 %v2549_v60  ;;  %v2629_v35 = vld [vmem:[#allocation6 + $0x270] sm:$0xff]  ;;  %v2643_v60 = vld [vmem:[#allocation6 + $0x2e0] sm:$0xff] }
 0x4b8   : > { %2492 = vmatpush.msra.mxu0 %v2439_v56  ;;  %2580 = vmatpush.msrb.mxu2 %v2535_v9  ;;  %v4944_v63 = vpop.f32.mrf.mxu3  ;;  %v4950_v40 = vpop.f32.mrf.mxu1  ;;  %v2544_v9 = vld [vmem:[#allocation6 + $0x188] sm:$0xff] }
 0x4b9   : > { %2056 = vmatmul.f32.gmra.mxu0 %v1693_v0  ;;  %2114 = vmatmul.f32.gmra.mxu2 %v1693_v0  ;;  %v2438_v0 = vld [vmem:[#allocation6 + $0x38] sm:$0xff] }
 0x4ba   : > { %2493 = vmatpush.msra.mxu0 %v2438_v0  ;;  %2581 = vmatpush.msrb.mxu2 %v2534_v61  ;;  %v2447_v0 = vld [vmem:[#allocation6 + $0x80] sm:$0xff] }
 0x4bb   : > { %2603 = vmatpush.msrb.mxu3 %v2548_v13  ;;  %v2627_v61 = vld [vmem:[#allocation6 + $0x260] sm:$0xff]  ;;  %v2642_v13 = vld [vmem:[#allocation6 + $0x2d8] sm:$0xff] }
 0x4bc   : > { %2494 = vmatpush.msra.mxu0 %v2437_v48  ;;  %2582 = vmatpush.msrb.mxu2 %v2533_v36  ;;  %v2715_v48 = vld [vmem:[#allocation6 + $0x360] sm:$0xff]  ;;  %v2734_v36 = vld [vmem:[#allocation6 + $0x3f8] sm:$0xff] }
 0x4bd   : > { %2604 = vmatpush.msrb.mxu3 %v2547_v20  ;;  %v2641_v20 = vld [vmem:[#allocation6 + $0x2d0] sm:$0xff] }
 0x4be   : > { %2583 = vmatpush.msrb.mxu2 %v2532_v51 }
 0x4c0   : > { %2584 = vmatpush.msrb.mxu2 %v2531_v50  ;;  %v4952_v26 = vpop.f32.mrf.mxu3  ;;  %v2713_v50 = vld [vmem:[#allocation6 + $0x350] sm:$0xff] }
 0x4c1   : > { %2059 = vmatmul.f32.gmra.mxu0 %v1695_v3  ;;  %2117 = vmatmul.f32.gmra.mxu2 %v1695_v3  ;;  %v2457_v3 = vld [vmem:[#allocation6 + $0xd0] sm:$0xff] }
 0x4c2   : > { %2510 = vmatpush.msra.mxu1 %v2457_v3  ;;  %v2543_v3 = vld [vmem:[#allocation6 + $0x180] sm:$0xff] }
 0x4c4   : > { %2511 = vmatpush.msra.mxu1 %v2456_v1  ;;  %v4958_v1 = vpop.f32.mrf.mxu1 }
 0x4c6   : > { %2512 = vmatpush.msra.mxu1 %v2455_v2  ;;  %v2714_v2 = vld [vmem:[#allocation6 + $0x358] sm:$0xff] }
 0x4c8   : > { %v4962_v19 = vpop.f32.mrf.mxu3 }
 0x4c9   : > { %2295 = vmatmul.f32.vlgmr.msrb.gmra.mxu0 %v2158_v7  ;;  %2353 = vmatmul.f32.vlgmr.msra.gmra.mxu2 %v2158_v7 }
 0x4d1   : > { %2298 = vmatmul.f32.gmra.mxu0 %v2164_v12  ;;  %2356 = vmatmul.f32.gmra.mxu2 %v2164_v12  ;;  %v2436_v12 = vld [vmem:[#allocation6 + $0x28] sm:$0xff] }
 0x4d2   : > { %2495 = vmatpush.msra.mxu0 %v2436_v12  ;;  %v2645_v12 = vld [vmem:[#allocation6 + $0x2f0] sm:$0xff] }
 0x4d4   : > { %2496 = vmatpush.msra.mxu0 %v2435_v15  ;;  %v2625_v15 = vld [vmem:[#allocation6 + $0x250] sm:$0xff] }
 0x4d9   : > { %2301 = vmatmul.f32.gmra.mxu0 %v2170_v18  ;;  %2359 = vmatmul.f32.gmra.mxu2 %v2170_v18  ;;  %v2454_v18 = vld [vmem:[#allocation6 + $0xb8] sm:$0xff] }
 0x4da   : > { %2513 = vmatpush.msra.mxu1 %v2454_v18  ;;  %v2644_v18 = vld [vmem:[#allocation6 + $0x2e8] sm:$0xff] }
 0x4e1   : > { %2304 = vmatmul.f32.gmra.mxu0 %v2176_v27  ;;  %2362 = vmatmul.f32.gmra.mxu2 %v2176_v27  ;;  %v2434_v27 = vld [vmem:[#allocation6 + $0x18] sm:$0xff] }
 0x4e2   : > { %2497 = vmatpush.msra.mxu0 %v2434_v27 }
 0x4e4   : > { %2498 = vmatpush.msra.mxu0 %v2433_v39  ;;  %v2712_v39 = vld [vmem:[#allocation6 + $0x348] sm:$0xff] }
 0x4e6   : > { %2499 = vmatpush.msra.mxu0 %v2432_v55  ;;  %v2711_v55 = vld [vmem:[#allocation6 + $0x340] sm:$0xff] }
 0x4e8   : > { %2500 = vmatpush.msra.mxu0 %v2431_v44  ;;  %v2710_v44 = vld [vmem:[#allocation6 + $0x338] sm:$0xff] }
 0x4ea   : > { %2661 = vmatpush.msrb.mxu0 %v2630_v23  ;;  %v2621_v23 = vld [vmem:[#allocation6 + $0x230] sm:$0xff] }
 0x4ec   : > { %2662 = vmatpush.msrb.mxu0 %v2629_v35  ;;  %v2728_v35 = vld [vmem:[#allocation6 + $0x3c8] sm:$0xff] }
 0x4ee   : > { %2663 = vmatpush.msrb.mxu0 %v2628_v25  ;;  %v2267_v25 = vpop.f32.mrf.mxu3 }
 0x4f0   : > { %2664 = vmatpush.msrb.mxu0 %v2627_v61  ;;  %v2638_v61 = vld [vmem:[#allocation6 + $0x2b8] sm:$0xff] }
 0x4f2   : > { %2665 = vmatpush.msrb.mxu0 %v2626_v10  ;;  %v2637_v10 = vld [vmem:[#allocation6 + $0x2b0] sm:$0xff] }
 0x4f4   : > { %2666 = vmatpush.msrb.mxu0 %v2625_v15  ;;  %v2617_v15 = vld [vmem:[#allocation6 + $0x210] sm:$0xff] }
 0x506   : > { %v4919_v52 = vpop.f32.mrf.mxu0 }
 0x50c   : > { %v4923_v62 = vpop.f32.mrf.mxu2 }
 0x50e   : > { %v4927_v43 = vpop.f32.mrf.mxu0 }
 0x514   : > { %v4931_v38 = vpop.f32.mrf.mxu2 }
 0x516   : > { %v1941_v22 = vpop.f32.mrf.mxu0 }
 0x517   : > { %v4933_v24 = vadd.f32 %v1941_v22, %v1912_v31  ;;  %v2453_v31 = vld [vmem:[#allocation6 + $0xb0] sm:$0xff]  ;;  %v2546_v22 = vld [vmem:[#allocation6 + $0x198] sm:$0xff] }
 0x518   : > { %2514 = vmatpush.msra.mxu1 %v2453_v31  ;;  %2605 = vmatpush.msrb.mxu3 %v2546_v22  ;;  %v2732_v31 = vld [vmem:[#allocation6 + $0x3e8] sm:$0xff]  ;;  %v2729_v22 = vld [vmem:[#allocation6 + $0x3d0] sm:$0xff] }
 0x51a   : > { %2515 = vmatpush.msra.mxu1 %v2452_v8  ;;  %2606 = vmatpush.msrb.mxu3 %v2545_v53  ;;  %v2731_v8 = vld [vmem:[#allocation6 + $0x3e0] sm:$0xff] }
 0x51c   : > { %v1999_v41 = vpop.f32.mrf.mxu2  ;;  %2516 = vmatpush.msra.mxu1 %v2451_v29  ;;  %2607 = vmatpush.msrb.mxu3 %v2544_v9  ;;  %v2730_v29 = vld [vmem:[#allocation6 + $0x3d8] sm:$0xff]  ;;  %v2708_v9 = vld [vmem:[#allocation6 + $0x328] sm:$0xff] }
 0x51d   : > { %v4938_v4 = vadd.f32 %v1999_v41, %v4921_v33  ;;  %v2530_v33 = vld [vmem:[#allocation6 + $0x118] sm:$0xff]  ;;  %v2716_v41 = vld [vmem:[#allocation6 + $0x368] sm:$0xff] }
 0x51e   : > { %v4942_v7 = vpop.f32.mrf.mxu0  ;;  %2585 = vmatpush.msrb.mxu2 %v2530_v33  ;;  %2517 = vmatpush.msra.mxu1 %v2450_v45  ;;  %v2624_v33 = vld [vmem:[#allocation6 + $0x248] sm:$0xff]  ;;  %v4966_v45 = vpop.f32.mrf.mxu1 }
 0x51f   : > { %2608 = vmatpush.msrb.mxu3 %v2543_v3  ;;  %2667 = vmatpush.msrb.mxu0 %v2624_v33  ;;  %v2619_v3 = vld [vmem:[#allocation6 + $0x220] sm:$0xff] }
 0x520   : > { %2586 = vmatpush.msrb.mxu2 %v2529_v17  ;;  %2518 = vmatpush.msra.mxu1 %v2449_v34  ;;  %v2623_v17 = vld [vmem:[#allocation6 + $0x240] sm:$0xff]  ;;  %v2709_v34 = vld [vmem:[#allocation6 + $0x330] sm:$0xff] }
 0x521   : > { %2769 = vmatpush.msra.mxu3 %v2734_v36  ;;  %2668 = vmatpush.msrb.mxu0 %v2623_v17  ;;  %v2618_v36 = vld [vmem:[#allocation6 + $0x218] sm:$0xff] }
 0x522   : > { %2587 = vmatpush.msrb.mxu2 %v2528_v59  ;;  %2519 = vmatpush.msra.mxu1 %v2448_v57  ;;  %v2622_v59 = vld [vmem:[#allocation6 + $0x238] sm:$0xff]  ;;  %v2639_v57 = vld [vmem:[#allocation6 + $0x2c0] sm:$0xff] }
 0x523   : > { %2770 = vmatpush.msra.mxu3 %v2733_v14  ;;  %2669 = vmatpush.msrb.mxu0 %v2622_v59  ;;  %v2374_v14 = vld [vmem:[%s5468_s0] sm:$0x3]  ;;  %s884_s0 = scalar_lea.vmem %s5469_s4, %s4384_s23  ;;  %s4169_s4 = smov 64  }
 0x524   : > { %v4946_v11 = vpop.f32.mrf.mxu2  ;;  %2588 = vmatpush.msrb.mxu2 %v2527_v46  ;;  %2520 = vmatpush.msra.mxu1 %v2447_v0  ;;  %v1936_v0 = vadd.f32 %v4919_v52, %v4911_v28  ;;  %v2725_v28 = vld [vmem:[#allocation6 + $0x3b0] sm:$0xff]  ;;  %v2723_v59 = vld [vmem:[#allocation6 + $0x3a0] sm:$0xff]  ;;  %s4171_s23 = smov 96  }
 0x525   : > { %2771 = vmatpush.msra.mxu3 %v2732_v31  ;;  %2670 = vmatpush.msrb.mxu0 %v2621_v23  ;;  %v2722_v23 = vld [vmem:[#allocation6 + $0x398] sm:$0xff] }
 0x526   : > { %v4948_v37 = vpop.f32.mrf.mxu0  ;;  %2749 = vmatpush.msra.mxu2 %v2718_v49  ;;  %2681 = vmatpush.msrb.mxu1 %v2646_v5  ;;  %v2640_v49 = vld [vmem:[#allocation6 + $0x2c8] sm:$0xff]  ;;  %v2707_v5 = vld [vmem:[#allocation6 + $0x320] sm:$0xff]  ;;  %v2023_v52 = vadd.f32 %v4935_v21, %v1936_v0  ;;  %v2325_v31 = vpop.f32.mrf.mxu1 }
 0x527   : > { %2772 = vmatpush.msra.mxu3 %v2731_v8  ;;  %v2635_v21 = vld [vmem:[#allocation6 + $0x2a0] sm:$0xff]  ;;  %v2720_v0 = vld [vmem:[#allocation6 + $0x388] sm:$0xff] }
 0x528   : > { %2750 = vmatpush.msra.mxu2 %v2717_v54  ;;  %2682 = vmatpush.msrb.mxu1 %v2645_v12  ;;  %v2620_v54 = vld [vmem:[#allocation6 + $0x228] sm:$0xff]  ;;  %v2706_v12 = vld [vmem:[#allocation6 + $0x318] sm:$0xff]  ;;  %v2052_v8 = vadd.f32 %v4948_v37, %v2023_v52  ;;  %v2703_v37 = vld [vmem:[#allocation6 + $0x300] sm:$0xff] }
 0x529   : > { %2773 = vmatpush.msra.mxu3 %v2730_v29  ;;  %2671 = vmatpush.msrb.mxu0 %v2620_v54  ;;  %v4983_v29 = vperm.slane %v2374_v14, 0  ;;  %v1997_v54 = vadd.f32 %v4931_v38, %v4917_v32  ;;  %v2003_v32 = vadd.f32 %v4946_v11, %v4929_v42  ;;  %v2087_v42 = vadd.f32 %v4958_v1, %v4938_v4 }
 0x52a   : > { %2751 = vmatpush.msra.mxu2 %v2716_v41  ;;  %2683 = vmatpush.msrb.mxu1 %v2644_v18  ;;  %v2727_v41 = vld [vmem:[#allocation6 + $0x3c0] sm:$0xff]  ;;  %v2636_v18 = vld [vmem:[#allocation6 + $0x2a8] sm:$0xff] }
 0x52b   : > { %2774 = vmatpush.msra.mxu3 %v2729_v22  ;;  %2672 = vmatpush.msrb.mxu0 %v2619_v3  ;;  %v2270_v22 = vpop.f32.mrf.mxu3  ;;  %v1945_v3 = vadd.f32 %v4942_v7, %v4925_v16  ;;  %v2029_v16 = vadd.f32 %v4952_v26, %v4933_v24 }
 0x52c   : > { %v4954_v58 = vpop.f32.mrf.mxu2  ;;  %2752 = vmatpush.msra.mxu2 %v2715_v48  ;;  %2684 = vmatpush.msrb.mxu1 %v2643_v60  ;;  %v2726_v48 = vld [vmem:[#allocation6 + $0x3b8] sm:$0xff]  ;;  %v2724_v60 = vld [vmem:[#allocation6 + $0x3a8] sm:$0xff] }
 0x52d   : > { %2775 = vmatpush.msra.mxu3 %v2728_v35  ;;  %2673 = vmatpush.msrb.mxu0 %v2618_v36  ;;  %v2721_v35 = vld [vmem:[#allocation6 + $0x390] sm:$0xff] }
 0x52e   : > { %v4956_v56 = vpop.f32.mrf.mxu0  ;;  %2753 = vmatpush.msra.mxu2 %v2714_v2  ;;  %2685 = vmatpush.msrb.mxu1 %v2642_v13  ;;  %v2616_v13 = vld [vmem:[#allocation6 + $0x208] sm:$0xff]  ;;  %v2328_v36 = vpop.f32.mrf.mxu1 }
 0x52f   : > { %2776 = vmatpush.msra.mxu3 %v2727_v41  ;;  %2674 = vmatpush.msrb.mxu0 %v2617_v15  ;;  %v4993_v41 = vperm.slane %v2374_v14, 1  ;;  %v2032_v14 = vadd.f32 %v4962_v19, %v1945_v3 }
 0x530   : > { %2754 = vmatpush.msra.mxu2 %v2713_v50  ;;  %2686 = vmatpush.msrb.mxu1 %v2641_v20  ;;  %v2705_v50 = vld [vmem:[#allocation6 + $0x310] sm:$0xff]  ;;  %v1939_v20 = vadd.f32 %v4927_v43, %v4915_v30 }
 0x531   : > { %2777 = vmatpush.msra.mxu3 %v2726_v48  ;;  %2675 = vmatpush.msrb.mxu0 %v2616_v13  ;;  %v2719_v48 = vld [vmem:[#allocation6 + $0x380] sm:$0xff] }
 0x532   : > { %2755 = vmatpush.msra.mxu2 %v2712_v39  ;;  %2687 = vmatpush.msrb.mxu1 %v2640_v49  ;;  %v1994_v39 = vadd.f32 %v4923_v62, %v4913_v47  ;;  %v2615_v47 = vld [vmem:[#allocation6 + $0x200] sm:$0xff]  ;;  %v2634_v62 = vld [vmem:[#allocation6 + $0x298] sm:$0xff] }
 0x533   : > { %2778 = vmatpush.msra.mxu3 %v2725_v28  ;;  %2676 = vmatpush.msrb.mxu0 %v2615_v47  ;;  %v2090_v28 = vadd.f32 %v4966_v45, %v2003_v32  ;;  %v2273_v4 = vpop.f32.mrf.mxu3 }
 0x534   : > { %v4960_v51 = vpop.f32.mrf.mxu2  ;;  %2756 = vmatpush.msra.mxu2 %v2711_v55  ;;  %2688 = vmatpush.msrb.mxu1 %v2639_v57  ;;  %v2704_v55 = vld [vmem:[#allocation6 + $0x308] sm:$0xff]  ;;  %v2081_v49 = vadd.f32 %v4940_v6, %v1994_v39 }
 0x535   : > { %2779 = vmatpush.msra.mxu3 %v2724_v60  ;;  %v2632_v6 = vld [vmem:[#allocation6 + $0x288] sm:$0xff] }
 0x536   : > { %v4964_v27 = vpop.f32.mrf.mxu0  ;;  %2757 = vmatpush.msra.mxu2 %v2710_v44  ;;  %2689 = vmatpush.msrb.mxu1 %v2638_v61  ;;  %v2110_v57 = vadd.f32 %v4954_v58, %v2081_v49 }
 0x537   : > { %2780 = vmatpush.msra.mxu3 %v2723_v59 }
 0x538   : > { %2758 = vmatpush.msra.mxu2 %v2709_v34  ;;  %2690 = vmatpush.msrb.mxu1 %v2637_v10  ;;  %v2633_v34 = vld [vmem:[#allocation6 + $0x290] sm:$0xff]  ;;  %v2084_v10 = vadd.f32 %v4950_v40, %v1997_v54  ;;  %v2058_v40 = vadd.f32 %v4964_v27, %v2029_v16 }
 0x539   : > { %2781 = vmatpush.msra.mxu3 %v2722_v23 }
 0x53a   : > { %2759 = vmatpush.msra.mxu2 %v2708_v9  ;;  %2691 = vmatpush.msrb.mxu1 %v2636_v18  ;;  %v2026_v9 = vadd.f32 %v4944_v63, %v1939_v20  ;;  %v2631_v63 = vld [vmem:[#allocation6 + $0x280] sm:$0xff] }
 0x53b   : > { %2782 = vmatpush.msra.mxu3 %v2721_v35 }
 0x53c   : > { %v4968_v46 = vpop.f32.mrf.mxu2  ;;  %2760 = vmatpush.msra.mxu2 %v2707_v5  ;;  %2692 = vmatpush.msrb.mxu1 %v2635_v21  ;;  %v2055_v61 = vadd.f32 %v4956_v56, %v2026_v9  ;;  %v2113_v56 = vadd.f32 %v4960_v51, %v2084_v10 }
 0x53d   : > { %2783 = vmatpush.msra.mxu3 %v2720_v0  ;;  %v2116_v52 = vadd.f32 %v4968_v46, %v2087_v42 }
 0x53e   : > { %v4970_v53 = vpop.f32.mrf.mxu0  ;;  %2761 = vmatpush.msra.mxu2 %v2706_v12  ;;  %2693 = vmatpush.msrb.mxu1 %v2634_v62 }
 0x53f   : > { %2784 = vmatpush.msra.mxu3 %v2719_v48  ;;  %v2061_v26 = vadd.f32 %v4970_v53, %v2032_v14 }
 0x540   : > { %2762 = vmatpush.msra.mxu2 %v2705_v50  ;;  %2694 = vmatpush.msrb.mxu1 %v2633_v34 }
 0x542   : > { %2763 = vmatpush.msra.mxu2 %v2704_v55  ;;  %2695 = vmatpush.msrb.mxu1 %v2632_v6 }
 0x544   : > { %v4974_v2 = vpop.f32.mrf.mxu2  ;;  %2764 = vmatpush.msra.mxu2 %v2703_v37  ;;  %2696 = vmatpush.msrb.mxu1 %v2631_v63 }
 0x545   : > { %v5018_v1 = vadd.f32 %v4974_v2, %v2090_v28 }
 0x546   : > { %v2296_v33 = vpop.f32.mrf.mxu0 }
 0x547   : > { %v2297_v17 = vadd.f32 %v2296_v33, %v2267_v25 }
 0x549   : > { %v2366_v44 = vadd.f32 %v2297_v17, %v2052_v8 }
 0x54b   : > { %v2380_v30 = vadd.f32 %v4983_v29, %v2366_v44 }
 0x54c   : > { %v2354_v43 = vpop.f32.mrf.mxu2 }
 0x54d   : > { %v2355_v25 = vadd.f32 %v2354_v43, %v2325_v31  ;;  %v5001_v12 = vmax.f32 %v2380_v30, 0.0 }
 0x54e   : > { %v2299_v38 = vpop.f32.mrf.mxu0 }
 0x54f   : > { %v2367_v5 = vadd.f32 %v2355_v25, %v2110_v57  ;;  %v2300_v58 = vadd.f32 %v2299_v38, %v2270_v22  ;;  %v2559_v19 = vrot.slane %v5001_v12, 1  ;;  %v2647_v45 = vrot.slane %v5001_v12, 2  ;;  %v2331_v22 = vpop.f32.mrf.mxu1 }
 0x550   : > { %v2735_v46 = vrot.slane %v5001_v12, 3  ;;  %v2823_v50 = vrot.slane %v5001_v12, 4  ;;  %v2913_v53 = vrot.slane %v5001_v12, 5  ;;  %v3003_v2 = vrot.slane %v5001_v12, 6 }
 0x551   : > { %v2381_v7 = vadd.f32 %v4993_v41, %v2367_v5  ;;  %v2368_v11 = vadd.f32 %v2300_v58, %v2055_v61  ;;  %v3093_v60 = vrot.slane %v5001_v12, 7  ;;  %v2276_v58 = vpop.f32.mrf.mxu3 }
 0x553   : > { %v5013_v15 = vmax.f32 %v2381_v7, 0.0  ;;  %v2382_v24 = vadd.f32 %v4983_v29, %v2368_v11 }
 0x554   : > { %v2357_v51 = vpop.f32.mrf.mxu2 }
 0x555   : > { %v5022_v18 = vmax.f32 %v2382_v24, 0.0  ;;  %v2358_v27 = vadd.f32 %v2357_v51, %v2328_v36  ;;  %v2565_v33 = vrot.slane %v5013_v15, 1  ;;  %v2653_v59 = vrot.slane %v5013_v15, 2 }
 0x556   : > { %v2302_v31 = vpop.f32.mrf.mxu0  ;;  %v2741_v43 = vrot.slane %v5013_v15, 3  ;;  %v2830_v25 = vrot.slane %v5013_v15, 4  ;;  %v2920_v6 = vrot.slane %v5013_v15, 5 }
 0x557   : > { %v2369_v39 = vadd.f32 %v2358_v27, %v2113_v56  ;;  %v2303_v8 = vadd.f32 %v2302_v31, %v2273_v4  ;;  %v2471_v17 = vrot.slane %v5022_v18, 7  ;;  %v2560_v13 = vsel %vm1297_vm11, %v5022_v18, %v2559_v19 }
 0x558   : > { %v2648_v21 = vrot.slane %v5022_v18, 1  ;;  %v2736_v55 = vrot.slane %v5022_v18, 2  ;;  %v2824_v20 = vrot.slane %v5022_v18, 3  ;;  %v2914_v37 = vrot.slane %v5022_v18, 4 }
 0x559   : > { %v2383_v44 = vadd.f32 %v4993_v41, %v2369_v39  ;;  %v2370_v47 = vadd.f32 %v2303_v8, %v2058_v40  ;;  %v2472_v62 = vsel %vm1297_vm11, %v2471_v17, %v5001_v12  ;;  %v3004_v35 = vrot.slane %v5022_v18, 5 }
 0x55a   : > { %v2649_v23 = vsel %vm1297_vm11, %v2648_v21, %v2647_v45  ;;  %v2737_v49 = vsel %vm1297_vm11, %v2736_v55, %v2735_v46  ;;  %v2825_v34 = vsel %vm1297_vm11, %v2824_v20, %v2823_v50  ;;  %v2915_v57 = vsel %vm1297_vm11, %v2914_v37, %v2913_v53  ;;  %v2334_v53 = vpop.f32.mrf.mxu1 }
 0x55b   : > { %v5045_v54 = vmax.f32 %v2383_v44, 0.0  ;;  %v2384_v30 = vadd.f32 %v4983_v29, %v2370_v47  ;;  %v5053_v0 = vsel %vm1297_vm11, %v3004_v35, %v3003_v2  ;;  %v3094_v3 = vrot.slane %v5022_v18, 6 }
 0x55c   : > { %v2360_v9 = vpop.f32.mrf.mxu2 }
 0x55d   : > { %v5056_v32 = vmax.f32 %v2384_v30, 0.0  ;;  %v2361_v38 = vadd.f32 %v2360_v9, %v2331_v22  ;;  %v2477_v61 = vrot.slane %v5045_v54, 7  ;;  %v2566_v5 = vsel %vm1297_vm11, %v5045_v54, %v2565_v33  ;;  %v2895_v9 = vld [vmem:[#allocation6 + $0x570] sm:$0xff] }
 0x55e   : > { %v2305_v63 = vpop.f32.mrf.mxu0  ;;  %v2654_v48 = vrot.slane %v5045_v54, 1  ;;  %v2742_v36 = vrot.slane %v5045_v54, 2  ;;  %v2831_v10 = vrot.slane %v5045_v54, 3  ;;  %v2921_v16 = vrot.slane %v5045_v54, 4 }
 0x55f   : > { %v2371_v42 = vadd.f32 %v2361_v38, %v2116_v52  ;;  %v2306_v7 = vadd.f32 %v2305_v63, %v2276_v58  ;;  %v2473_v11 = vrot.slane %v5056_v32, 6  ;;  %v2561_v56 = vrot.slane %v5056_v32, 7 }
 0x560   : > { %v2478_v14 = vsel %vm1297_vm11, %v2477_v61, %v5013_v15  ;;  %v5071_v28 = vsel %vm1299_vm12, %v5056_v32, %v2649_v23  ;;  %v2738_v40 = vrot.slane %v5056_v32, 1  ;;  %v2655_v24 = vsel %vm1297_vm11, %v2654_v48, %v2653_v59  ;;  %v2806_v23 = vld [vmem:[#allocation6 + $0x478] sm:$0xff]  ;;  %v2804_v61 = vld [vmem:[#allocation6 + $0x468] sm:$0xff] }
 0x561   : > { %v2385_v4 = vadd.f32 %v4993_v41, %v2371_v42  ;;  %v2372_v51 = vadd.f32 %v2306_v7, %v2061_v26  ;;  %v2474_v52 = vsel %vm1299_vm12, %v2473_v11, %v2472_v62  ;;  %v2562_v19 = vsel %vm1299_vm12, %v2561_v56, %v2560_v13  ;;  %v2822_v42 = vld [vmem:[#allocation6 + $0x4f8] sm:$0xff] }
 0x562   : > { %v5079_v45 = vsel %vm1299_vm12, %v2738_v40, %v2737_v49  ;;  %v2743_v18 = vsel %vm1297_vm11, %v2742_v36, %v2741_v43  ;;  %v2826_v27 = vrot.slane %v5056_v32, 2  ;;  %v2916_v46 = vrot.slane %v5056_v32, 3  ;;  %v2896_v49 = vld [vmem:[#allocation6 + $0x578] sm:$0xff] }
 0x563   : > { %v5084_v50 = vmax.f32 %v2385_v4, 0.0  ;;  %v2386_v31 = vadd.f32 %v4983_v29, %v2372_v51  ;;  %v2832_v33 = vsel %vm1297_vm11, %v2831_v10, %v2830_v25  ;;  %v2922_v26 = vsel %vm1297_vm11, %v2921_v16, %v2920_v6  ;;  %v2803_v16 = vld [vmem:[#allocation6 + $0x460] sm:$0xff]  ;;  %v2912_v40 = vld [vmem:[#allocation6 + $0x5f8] sm:$0xff] }
 0x564   : > { %v2363_v2 = vpop.f32.mrf.mxu2  ;;  %v5090_v39 = vsel %vm1299_vm12, %v2826_v27, %v2825_v34  ;;  %v5093_v8 = vsel %vm1299_vm12, %v2916_v46, %v2915_v57  ;;  %v3006_v17 = vrot.slane %v5056_v32, 4  ;;  %v3095_v13 = vsel %vm1297_vm11, %v3094_v3, %v3093_v60  ;;  %v2821_v27 = vld [vmem:[#allocation6 + $0x4f0] sm:$0xff] }
 0x565   : > { %v5099_v21 = vmax.f32 %v2386_v31, 0.0  ;;  %v2364_v29 = vadd.f32 %v2363_v2, %v2334_v53  ;;  %v2479_v55 = vrot.slane %v5084_v50, 6  ;;  %v2567_v59 = vrot.slane %v5084_v50, 7  ;;  %v2892_v2 = vld [vmem:[#allocation6 + $0x558] sm:$0xff] }
 0x566   : > { %v5105_v20 = vsel %vm1299_vm12, %v5084_v50, %v2655_v24  ;;  %v2744_v44 = vrot.slane %v5084_v50, 1  ;;  %v2833_v47 = vrot.slane %v5084_v50, 2  ;;  %v2923_v62 = vrot.slane %v5084_v50, 3 }
 0x567   : > { %v2373_v12 = vadd.f32 %v2364_v29, %v5018_v1  ;;  %v2475_v60 = vrot.slane %v5099_v21, 5  ;;  %v2563_v37 = vrot.slane %v5099_v21, 6  ;;  %v2480_v22 = vsel %vm1299_vm12, %v2479_v55, %v2478_v14  ;;  %v2805_v1 = vld [vmem:[#allocation6 + $0x470] sm:$0xff]  ;;  %v2893_v14 = vld [vmem:[#allocation6 + $0x560] sm:$0xff]  ;;  %v2820_v29 = vld [vmem:[#allocation6 + $0x4e8] sm:$0xff] }
 0x568   : > { %v2568_v34 = vsel %vm1299_vm12, %v2567_v59, %v2566_v5  ;;  %v5116_v35 = vsel %vm1299_vm12, %v2744_v44, %v2743_v18  ;;  %v5122_v25 = vsel %vm1299_vm12, %v2833_v47, %v2832_v33  ;;  %v5125_v6 = vsel %vm1299_vm12, %v2923_v62, %v2922_v26  ;;  %v2894_v5 = vld [vmem:[#allocation6 + $0x568] sm:$0xff]  ;;  %v2802_v18 = vld [vmem:[#allocation6 + $0x458] sm:$0xff]  ;;  %v2819_v47 = vld [vmem:[#allocation6 + $0x4e0] sm:$0xff] }
 0x569   : > { %v2387_v30 = vadd.f32 %v4993_v41, %v2373_v12  ;;  %v2476_v43 = vsel %vm1301_vm13, %v2475_v60, %v2474_v52  ;;  %v2564_v57 = vsel %vm1301_vm13, %v2563_v37, %v2562_v19  ;;  %v3007_v41 = vsel %vm1299_vm12, %v3006_v17, %v5053_v0  ;;  %v2911_v17 = vld [vmem:[#allocation6 + $0x5f0] sm:$0xff]  ;;  %v2910_v59 = vld [vmem:[#allocation6 + $0x5e8] sm:$0xff]  ;;  %v2909_v37 = vld [vmem:[#allocation6 + $0x5e0] sm:$0xff] }
 0x56a   : > { %2501 = vmatmul.f32.vlgmr.msra.gmra.mxu0 %v2476_v43  ;;  %2589 = vmatmul.f32.vlgmr.msrb.gmra.mxu2 %v2564_v57  ;;  %v3008_v38 = vrot.slane %v5099_v21, 3  ;;  %v3096_v58 = vrot.slane %v5056_v32, 5  ;;  %v3098_v63 = vrot.slane %v5099_v21, 4  ;;  %v3011_v10 = vrot.slane %v5045_v54, 5  ;;  %v2890_v60 = vld [vmem:[#allocation6 + $0x548] sm:$0xff]  ;;  %v2908_v43 = vld [vmem:[#allocation6 + $0x5d8] sm:$0xff] }
 0x56b   : > { %v5127_v3 = vmax.f32 %v2387_v30, 0.0  ;;  %2839 = vmatpush.msra.mxu0 %v2806_v23  ;;  %2929 = vmatpush.msrb.mxu2 %v2896_v49  ;;  %v2651_v0 = vrot.slane %v5099_v21, 7  ;;  %v3010_v24 = vrot.slane %v5013_v15, 6  ;;  %v3013_v4 = vrot.slane %v5084_v50, 4  ;;  %v2818_v23 = vld [vmem:[#allocation6 + $0x4d8] sm:$0xff]  ;;  %v2889_v30 = vld [vmem:[#allocation6 + $0x540] sm:$0xff] }
 0x56c   : > { %v5139_v7 = vsel %vm1301_vm13, %v3008_v38, %v3007_v41  ;;  %v3097_v11 = vsel %vm1299_vm12, %v3096_v58, %v3095_v13  ;;  %v3100_v19 = vrot.slane %v5013_v15, 7  ;;  %v3101_v31 = vrot.slane %v5045_v54, 6  ;;  %v2801_v54 = vld [vmem:[#allocation6 + $0x450] sm:$0xff]  ;;  %v2798_v57 = vld [vmem:[#allocation6 + $0x438] sm:$0xff]  ;;  %v2815_v58 = vld [vmem:[#allocation6 + $0x4c0] sm:$0xff] }
 0x56d   : > { %2840 = vmatpush.msra.mxu0 %v2805_v1  ;;  %2930 = vmatpush.msrb.mxu2 %v2895_v9  ;;  %v2481_v48 = vrot.slane %v5127_v3, 5  ;;  %v2569_v36 = vrot.slane %v5127_v3, 6  ;;  %v5147_v51 = vsel %vm1301_vm13, %v3098_v63, %v3097_v11  ;;  %v3015_v52 = vrot.slane %v5127_v3, 3  ;;  %v2817_v1 = vld [vmem:[#allocation6 + $0x4d0] sm:$0xff]  ;;  %v2888_v9 = vld [vmem:[#allocation6 + $0x538] sm:$0xff]  ;;  %v2886_v63 = vld [vmem:[#allocation6 + $0x528] sm:$0xff] }
 0x56e   : > { %v3012_v46 = vsel %vm1297_vm11, %v3011_v10, %v3010_v24  ;;  %v3103_v33 = vrot.slane %v5084_v50, 5  ;;  %v3105_v26 = vrot.slane %v5127_v3, 4  ;;  %v2652_v53 = vsel %vm1301_vm13, %v2651_v0, %v5071_v28  ;;  %v2891_v28 = vld [vmem:[#allocation6 + $0x550] sm:$0xff]  ;;  %v2814_v10 = vld [vmem:[#allocation6 + $0x4b8] sm:$0xff] }
 0x56f   : > { %2841 = vmatpush.msra.mxu0 %v2804_v61  ;;  %2931 = vmatpush.msrb.mxu2 %v2894_v5  ;;  %v2482_v32 = vsel %vm1301_vm13, %v2481_v48, %v2480_v22  ;;  %v2570_v56 = vsel %vm1301_vm13, %v2569_v36, %v2568_v34  ;;  %v2740_v15 = vsel %vm1301_vm13, %v5099_v21, %v5079_v45  ;;  %v2800_v45 = vld [vmem:[#allocation6 + $0x448] sm:$0xff]  ;;  %v2657_v62 = vrot.slane %v5127_v3, 7  ;;  %v2799_v22 = vld [vmem:[#allocation6 + $0x440] sm:$0xff]  ;;  %v2907_v41 = vld [vmem:[#allocation6 + $0x5d0] sm:$0xff] }
 0x570   : > { %2521 = vmatmul.f32.vlgmr.msra.gmra.mxu1 %v2482_v32  ;;  %2609 = vmatmul.f32.vlgmr.msrb.gmra.mxu3 %v2570_v56  ;;  %v3014_v13 = vsel %vm1299_vm12, %v3013_v4, %v3012_v46  ;;  %v3102_v55 = vsel %vm1297_vm11, %v3101_v31, %v3100_v19  ;;  %v2746_v34 = vsel %vm1301_vm13, %v5127_v3, %v5116_v35  ;;  %v2797_v38 = vld [vmem:[#allocation6 + $0x430] sm:$0xff]  ;;  %v2816_v61 = vld [vmem:[#allocation6 + $0x4c8] sm:$0xff]  ;;  %v2905_v48 = vld [vmem:[#allocation6 + $0x5c0] sm:$0xff]  ;;  %vm3472_vm11 = vcmask 1040384  }
 0x571   : > { %2842 = vmatpush.msra.mxu0 %v2803_v16  ;;  %2859 = vmatpush.msra.mxu1 %v2822_v42  ;;  %v5162_v50 = vsel %vm1301_vm13, %v3015_v52, %v3014_v13  ;;  %v3104_v44 = vsel %vm1299_vm12, %v3103_v33, %v3102_v55  ;;  %v2658_v49 = vsel %vm1301_vm13, %v2657_v62, %v5105_v20  ;;  %v2887_v20 = vld [vmem:[#allocation6 + $0x530] sm:$0xff]  ;;  %v2906_v5 = vld [vmem:[#allocation6 + $0x5c8] sm:$0xff]  ;;  %v2795_v36 = vld [vmem:[#allocation6 + $0x420] sm:$0xff]  ;;  %v2828_v33 = vrot.slane %v5099_v21, 1 }
 0x572   : > { %2932 = vmatpush.msrb.mxu2 %v2893_v14  ;;  %2949 = vmatpush.msrb.mxu3 %v2912_v40  ;;  %v5168_v12 = vsel %vm1301_vm13, %v3105_v26, %v3104_v44  ;;  %v2796_v35 = vld [vmem:[#allocation6 + $0x428] sm:$0xff]  ;;  %v2885_v16 = vld [vmem:[#allocation6 + $0x520] sm:$0xff]  ;;  %v2904_v42 = vld [vmem:[#allocation6 + $0x5b8] sm:$0xff]  ;;  %v2918_v26 = vrot.slane %v5099_v21, 2  ;;  %v2835_v62 = vrot.slane %v5127_v3, 1  ;;  %vm3474_vm12 = vcmask 1041408  }
 0x573   : > { %2677 = vmatmul.f32.vlgmr.msrb.gmra.mxu0 %v2652_v53  ;;  %2765 = vmatmul.f32.vlgmr.msra.gmra.mxu2 %v2740_v15  ;;  %v2794_v0 = vld [vmem:[#allocation6 + $0x418] sm:$0xff]  ;;  %v2813_v11 = vld [vmem:[#allocation6 + $0x4b0] sm:$0xff]  ;;  %v2812_v40 = vld [vmem:[#allocation6 + $0x4a8] sm:$0xff]  ;;  %v2829_v13 = vsel %vm1301_vm13, %v2828_v33, %v5090_v39  ;;  %v2925_v39 = vrot.slane %v5127_v3, 2 }
 0x574   : > { %2843 = vmatpush.msra.mxu0 %v2802_v18  ;;  %2860 = vmatpush.msra.mxu1 %v2821_v27  ;;  %v2884_v32 = vld [vmem:[#allocation6 + $0x518] sm:$0xff]  ;;  %v2903_v56 = vld [vmem:[#allocation6 + $0x5b0] sm:$0xff]  ;;  %v2902_v4 = vld [vmem:[#allocation6 + $0x5a8] sm:$0xff] }
 0x575   : > { %2933 = vmatpush.msrb.mxu2 %v2892_v2  ;;  %2950 = vmatpush.msrb.mxu3 %v2911_v17  ;;  %v2793_v14 = vld [vmem:[#allocation6 + $0x410] sm:$0xff]  ;;  %v2792_v52 = vld [vmem:[#allocation6 + $0x408] sm:$0xff]  ;;  %v2811_v19 = vld [vmem:[#allocation6 + $0x4a0] sm:$0xff] }
 0x576   : > { %2844 = vmatpush.msra.mxu0 %v2801_v54  ;;  %2861 = vmatpush.msra.mxu1 %v2820_v29  ;;  %v2883_v24 = vld [vmem:[#allocation6 + $0x510] sm:$0xff]  ;;  %v2882_v18 = vld [vmem:[#allocation6 + $0x508] sm:$0xff]  ;;  %v2901_v27 = vld [vmem:[#allocation6 + $0x5a0] sm:$0xff]  ;;  %v2919_v54 = vsel %vm1301_vm13, %v2918_v26, %v5093_v8 }
 0x577   : > { %2934 = vmatpush.msrb.mxu2 %v2891_v28  ;;  %2951 = vmatpush.msrb.mxu3 %v2910_v59  ;;  %v2791_v46 = vld [vmem:[#allocation6 + $0x400] sm:$0xff]  ;;  %v2810_v31 = vld [vmem:[#allocation6 + $0x498] sm:$0xff]  ;;  %v2809_v29 = vld [vmem:[#allocation6 + $0x490] sm:$0xff] }
 0x578   : > { %2845 = vmatpush.msra.mxu0 %v2800_v45  ;;  %2862 = vmatpush.msra.mxu1 %v2819_v47  ;;  %v2881_v53 = vld [vmem:[#allocation6 + $0x500] sm:$0xff]  ;;  %v2900_v15 = vld [vmem:[#allocation6 + $0x598] sm:$0xff]  ;;  %v2899_v21 = vld [vmem:[#allocation6 + $0x590] sm:$0xff] }
 0x579   : > { %2935 = vmatpush.msrb.mxu2 %v2890_v60  ;;  %2952 = vmatpush.msrb.mxu3 %v2909_v37  ;;  %v2986_v2 = vld [vmem:[#allocation6 + $0x678] sm:$0xff]  ;;  %v2985_v55 = vld [vmem:[#allocation6 + $0x670] sm:$0xff]  ;;  %v2808_v59 = vld [vmem:[#allocation6 + $0x488] sm:$0xff] }
 0x57a   : > { %2697 = vmatmul.f32.vlgmr.msrb.gmra.mxu1 %v2658_v49  ;;  %2785 = vmatmul.f32.vlgmr.msra.gmra.mxu3 %v2746_v34  ;;  %v3076_v17 = vld [vmem:[#allocation6 + $0x778] sm:$0xff]  ;;  %v3075_v28 = vld [vmem:[#allocation6 + $0x770] sm:$0xff]  ;;  %v2898_v44 = vld [vmem:[#allocation6 + $0x588] sm:$0xff]  ;;  %v2926_v49 = vsel %vm1301_vm13, %v2925_v39, %v5125_v6 }
 0x57b   : > { %2846 = vmatpush.msra.mxu0 %v2799_v22  ;;  %2863 = vmatpush.msra.mxu1 %v2818_v23  ;;  %v2984_v45 = vld [vmem:[#allocation6 + $0x668] sm:$0xff]  ;;  %v2807_v8 = vld [vmem:[#allocation6 + $0x480] sm:$0xff]  ;;  %v3002_v22 = vld [vmem:[#allocation6 + $0x6f8] sm:$0xff]  ;;  %v2836_v23 = vsel %vm1301_vm13, %v2835_v62, %v5122_v25 }
 0x57c   : > { %2936 = vmatpush.msrb.mxu2 %v2889_v30  ;;  %2953 = vmatpush.msrb.mxu3 %v2908_v43  ;;  %v3074_v47 = vld [vmem:[#allocation6 + $0x768] sm:$0xff]  ;;  %v2897_v60 = vld [vmem:[#allocation6 + $0x580] sm:$0xff]  ;;  %v3092_v3 = vld [vmem:[#allocation6 + $0x7f8] sm:$0xff] }
 0x57d   : > { %2847 = vmatpush.msra.mxu0 %v2798_v57  ;;  %2864 = vmatpush.msra.mxu1 %v2817_v1  ;;  %v2983_v37 = vld [vmem:[#allocation6 + $0x660] sm:$0xff]  ;;  %v2982_v30 = vld [vmem:[#allocation6 + $0x658] sm:$0xff]  ;;  %v3001_v43 = vld [vmem:[#allocation6 + $0x6f0] sm:$0xff] }
 0x57e   : > { %2937 = vmatpush.msrb.mxu2 %v2888_v9  ;;  %2954 = vmatpush.msrb.mxu3 %v2907_v41  ;;  %v3073_v34 = vld [vmem:[#allocation6 + $0x760] sm:$0xff]  ;;  %v3072_v57 = vld [vmem:[#allocation6 + $0x758] sm:$0xff]  ;;  %v3091_v1 = vld [vmem:[#allocation6 + $0x7f0] sm:$0xff] }
 0x57f   : > { %2848 = vmatpush.msra.mxu0 %v2797_v38  ;;  %2865 = vmatpush.msra.mxu1 %v2816_v61  ;;  %v2981_v9 = vld [vmem:[#allocation6 + $0x650] sm:$0xff]  ;;  %v3000_v41 = vld [vmem:[#allocation6 + $0x6e8] sm:$0xff]  ;;  %v2999_v61 = vld [vmem:[#allocation6 + $0x6e0] sm:$0xff] }
 0x580   : > { %2938 = vmatpush.msrb.mxu2 %v2887_v20  ;;  %2955 = vmatpush.msrb.mxu3 %v2906_v5  ;;  %v3071_v25 = vld [vmem:[#allocation6 + $0x750] sm:$0xff]  ;;  %v3090_v38 = vld [vmem:[#allocation6 + $0x7e8] sm:$0xff]  ;;  %v3089_v5 = vld [vmem:[#allocation6 + $0x7e0] sm:$0xff] }
 0x581   : > { %2849 = vmatpush.msra.mxu0 %v2796_v35  ;;  %2866 = vmatpush.msra.mxu1 %v2815_v58  ;;  %v2980_v6 = vld [vmem:[#allocation6 + $0x648] sm:$0xff]  ;;  %v2979_v35 = vld [vmem:[#allocation6 + $0x640] sm:$0xff]  ;;  %v2998_v58 = vld [vmem:[#allocation6 + $0x6d8] sm:$0xff] }
 0x582   : > { %2939 = vmatpush.msrb.mxu2 %v2886_v63  ;;  %2956 = vmatpush.msrb.mxu3 %v2905_v48  ;;  %v3070_v20 = vld [vmem:[#allocation6 + $0x748] sm:$0xff]  ;;  %v3069_v63 = vld [vmem:[#allocation6 + $0x740] sm:$0xff]  ;;  %v3088_v48 = vld [vmem:[#allocation6 + $0x7d8] sm:$0xff] }
 0x583   : > { %2850 = vmatpush.msra.mxu0 %v2795_v36  ;;  %2867 = vmatpush.msra.mxu1 %v2814_v10  ;;  %v2978_v36 = vld [vmem:[#allocation6 + $0x638] sm:$0xff]  ;;  %v2997_v10 = vld [vmem:[#allocation6 + $0x6d0] sm:$0xff]  ;;  %v2988_v62 = vld [vmem:[#allocation6 + $0x688] sm:$0xff] }
 0x584   : > { %2940 = vmatpush.msrb.mxu2 %v2885_v16  ;;  %2957 = vmatpush.msrb.mxu3 %v2904_v42  ;;  %v3068_v16 = vld [vmem:[#allocation6 + $0x738] sm:$0xff]  ;;  %v3087_v42 = vld [vmem:[#allocation6 + $0x7d0] sm:$0xff]  ;;  %v3078_v39 = vld [vmem:[#allocation6 + $0x788] sm:$0xff] }
 0x585   : > { %2851 = vmatpush.msra.mxu0 %v2794_v0  ;;  %2868 = vmatpush.msra.mxu1 %v2813_v11  ;;  %v2977_v0 = vld [vmem:[#allocation6 + $0x630] sm:$0xff]  ;;  %v2996_v11 = vld [vmem:[#allocation6 + $0x6c8] sm:$0xff]  ;;  %v3064_v33 = vld [vmem:[#allocation6 + $0x718] sm:$0xff] }
 0x586   : > { %2941 = vmatpush.msrb.mxu2 %v2884_v32  ;;  %2958 = vmatpush.msrb.mxu3 %v2903_v56  ;;  %v3067_v32 = vld [vmem:[#allocation6 + $0x730] sm:$0xff]  ;;  %v3086_v56 = vld [vmem:[#allocation6 + $0x7c8] sm:$0xff] }
 0x587   : > { %2852 = vmatpush.msra.mxu0 %v2793_v14  ;;  %2869 = vmatpush.msra.mxu1 %v2812_v40  ;;  %v2976_v14 = vld [vmem:[#allocation6 + $0x628] sm:$0xff]  ;;  %v2995_v40 = vld [vmem:[#allocation6 + $0x6c0] sm:$0xff]  ;;  %v3083_v26 = vld [vmem:[#allocation6 + $0x7b0] sm:$0xff] }
 0x588   : > { %2942 = vmatpush.msrb.mxu2 %v2883_v24  ;;  %2959 = vmatpush.msrb.mxu3 %v2902_v4  ;;  %v3066_v24 = vld [vmem:[#allocation6 + $0x728] sm:$0xff]  ;;  %v3085_v4 = vld [vmem:[#allocation6 + $0x7c0] sm:$0xff] }
 0x589   : > { %2853 = vmatpush.msra.mxu0 %v2792_v52  ;;  %2870 = vmatpush.msra.mxu1 %v2811_v19  ;;  %v2975_v52 = vld [vmem:[#allocation6 + $0x620] sm:$0xff]  ;;  %v2994_v19 = vld [vmem:[#allocation6 + $0x6b8] sm:$0xff] }
 0x58a   : > { %2943 = vmatpush.msrb.mxu2 %v2882_v18  ;;  %2960 = vmatpush.msrb.mxu3 %v2901_v27  ;;  %v3065_v18 = vld [vmem:[#allocation6 + $0x720] sm:$0xff]  ;;  %v3084_v27 = vld [vmem:[#allocation6 + $0x7b8] sm:$0xff] }
 0x58b   : > { %2854 = vmatpush.msra.mxu0 %v2791_v46  ;;  %2871 = vmatpush.msra.mxu1 %v2810_v31  ;;  %v2974_v46 = vld [vmem:[#allocation6 + $0x618] sm:$0xff]  ;;  %v2993_v31 = vld [vmem:[#allocation6 + $0x6b0] sm:$0xff] }
 0x58c   : > { %2944 = vmatpush.msrb.mxu2 %v2881_v53  ;;  %2961 = vmatpush.msrb.mxu3 %v2900_v15  ;;  %v2973_v53 = vld [vmem:[#allocation6 + $0x610] sm:$0xff]  ;;  %v2992_v15 = vld [vmem:[#allocation6 + $0x6a8] sm:$0xff] }
 0x58d   : > { %2855 = vmatmul.f32.vlgmr.msra.gmra.mxu0 %v2829_v13  ;;  %2945 = vmatmul.f32.vlgmr.msrb.gmra.mxu2 %v2919_v54  ;;  %v2972_v13 = vld [vmem:[#allocation6 + $0x608] sm:$0xff]  ;;  %v2991_v54 = vld [vmem:[#allocation6 + $0x6a0] sm:$0xff] }
 0x58e   : > { %3019 = vmatpush.msrb.mxu0 %v2986_v2  ;;  %3109 = vmatpush.msra.mxu2 %v3076_v17  ;;  %v3063_v2 = vld [vmem:[#allocation6 + $0x710] sm:$0xff]  ;;  %v3082_v17 = vld [vmem:[#allocation6 + $0x7a8] sm:$0xff] }
 0x58f   : > { %2872 = vmatpush.msra.mxu1 %v2809_v29  ;;  %2962 = vmatpush.msrb.mxu3 %v2899_v21  ;;  %v3062_v29 = vld [vmem:[#allocation6 + $0x708] sm:$0xff]  ;;  %v3081_v21 = vld [vmem:[#allocation6 + $0x7a0] sm:$0xff] }
 0x590   : > { %3020 = vmatpush.msrb.mxu0 %v2985_v55  ;;  %3110 = vmatpush.msra.mxu2 %v3075_v28  ;;  %v2971_v55 = vld [vmem:[#allocation6 + $0x600] sm:$0xff]  ;;  %v2990_v28 = vld [vmem:[#allocation6 + $0x698] sm:$0xff] }
 0x591   : > { %2873 = vmatpush.msra.mxu1 %v2808_v59  ;;  %2963 = vmatpush.msrb.mxu3 %v2898_v44  ;;  %v3061_v59 = vld [vmem:[#allocation6 + $0x700] sm:$0xff]  ;;  %v3080_v44 = vld [vmem:[#allocation6 + $0x798] sm:$0xff] }
 0x592   : > { %3021 = vmatpush.msrb.mxu0 %v2984_v45  ;;  %3111 = vmatpush.msra.mxu2 %v3074_v47  ;;  %v2989_v45 = vld [vmem:[#allocation6 + $0x690] sm:$0xff] }
 0x593   : > { %2874 = vmatpush.msra.mxu1 %v2807_v8  ;;  %2964 = vmatpush.msrb.mxu3 %v2897_v60  ;;  %v3079_v47 = vld [vmem:[#allocation6 + $0x790] sm:$0xff]  ;;  %v2987_v8 = vld [vmem:[#allocation6 + $0x680] sm:$0xff] }
 0x594   : > { %2875 = vmatmul.f32.vlgmr.msra.gmra.mxu1 %v2836_v23  ;;  %2965 = vmatmul.f32.vlgmr.msrb.gmra.mxu3 %v2926_v49  ;;  %v3077_v60 = vld [vmem:[#allocation6 + $0x780] sm:$0xff]  ;;  %v3160_v23 = vld [vmem:[%s5409_s19 + $0x48] sm:$0xff] }
 0x595   : > { %3022 = vmatpush.msrb.mxu0 %v2983_v37  ;;  %3039 = vmatpush.msrb.mxu1 %v3002_v22  ;;  %v3164_v37 = vld [vmem:[%s5409_s19 + $0x68] sm:$0xff]  ;;  %v3161_v22 = vld [vmem:[%s5409_s19 + $0x50] sm:$0xff]  ;;  %v3159_v49 = vld [vmem:[%s5409_s19 + $0x40] sm:$0xff] }
 0x596   : > { %3112 = vmatpush.msra.mxu2 %v3073_v34  ;;  %3129 = vmatpush.msra.mxu3 %v3092_v3  ;;  %v3158_v34 = vld [vmem:[%s5409_s19 + $0x38] sm:$0xff]  ;;  %v3157_v3 = vld [vmem:[%s5409_s19 + $0x30] sm:$0xff] }
 0x597   : > { %3023 = vmatpush.msrb.mxu0 %v2982_v30  ;;  %3040 = vmatpush.msrb.mxu1 %v3001_v43  ;;  %v3156_v30 = vld [vmem:[%s5409_s19 + $0x28] sm:$0xff]  ;;  %v2428_v43 = vpop.f32.mrf.mxu3 }
 0x598   : > { %3113 = vmatpush.msra.mxu2 %v3072_v57  ;;  %3130 = vmatpush.msra.mxu3 %v3091_v1  ;;  %v3155_v57 = vld [vmem:[%s5409_s19 + $0x20] sm:$0xff] }
 0x599   : > { %3024 = vmatpush.msrb.mxu0 %v2981_v9  ;;  %3041 = vmatpush.msrb.mxu1 %v3000_v41  ;;  %v3154_v41 = vld [vmem:[%s5409_s19 + $0x18] sm:$0xff] }
 0x59a   : > { %3114 = vmatpush.msra.mxu2 %v3071_v25  ;;  %3131 = vmatpush.msra.mxu3 %v3090_v38  ;;  %v3153_v25 = vld [vmem:[%s5409_s19 + $0x10] sm:$0xff]  ;;  %v3196_v38 = vld [vmem:[%s5410_s20 + $0x18] sm:$0xff] }
 0x59b   : > { %3025 = vmatpush.msrb.mxu0 %v2980_v6  ;;  %3042 = vmatpush.msrb.mxu1 %v2999_v61 }
 0x59c   : > { %3115 = vmatpush.msra.mxu2 %v3070_v20  ;;  %3132 = vmatpush.msra.mxu3 %v3089_v5  ;;  %v3195_v20 = vld [vmem:[%s5410_s20 + $0x10] sm:$0xff]  ;;  %v3152_v5 = vld [vmem:[%s5409_s19 + $0x8] sm:$0xff] }
 0x59d   : > { %3026 = vmatpush.msrb.mxu0 %v2979_v35  ;;  %3043 = vmatpush.msrb.mxu1 %v2998_v58  ;;  %v3194_v35 = vld [vmem:[%s5410_s20 + $0x8] sm:$0xff]  ;;  %v3151_v58 = vld [vmem:[%s5409_s19] sm:$0xff] }
 0x59e   : > { %3116 = vmatpush.msra.mxu2 %v3069_v63  ;;  %3133 = vmatpush.msra.mxu3 %v3088_v48  ;;  %v3193_v63 = vld [vmem:[%s5410_s20] sm:$0xff] }
 0x59f   : > { %3027 = vmatpush.msrb.mxu0 %v2978_v36  ;;  %3044 = vmatpush.msrb.mxu1 %v2997_v10  ;;  %v3191_v36 = vld [vmem:[%s884_s0] sm:$0x1]  ;;  %s4170_s0 = smov 32  }
 0x5a0   : > { %3117 = vmatpush.msra.mxu2 %v3068_v16  ;;  %3134 = vmatpush.msra.mxu3 %v3087_v42  ;;  %v3923_v16 = vld [vmem:[%s5408_s18] ss:$0 sm:$0xff] }
 0x5a1   : > { %3028 = vmatpush.msrb.mxu0 %v2977_v0  ;;  %3045 = vmatpush.msrb.mxu1 %v2996_v11 }
 0x5a2   : > { %3118 = vmatpush.msra.mxu2 %v3067_v32  ;;  %3135 = vmatpush.msra.mxu3 %v3086_v56  ;;  %v2429_v32 = vadd.f32 %v3923_v16, %v2428_v43 }
 0x5a3   : > { %3029 = vmatpush.msrb.mxu0 %v2976_v14  ;;  %3046 = vmatpush.msrb.mxu1 %v2995_v40 }
 0x5a4   : > { %3119 = vmatpush.msra.mxu2 %v3066_v24  ;;  %3136 = vmatpush.msra.mxu3 %v3085_v4 }
 0x5a5   : > { %3030 = vmatpush.msrb.mxu0 %v2975_v52  ;;  %3047 = vmatpush.msrb.mxu1 %v2994_v19 }
 0x5a6   : > { %3120 = vmatpush.msra.mxu2 %v3065_v18  ;;  %3137 = vmatpush.msra.mxu3 %v3084_v27 }
 0x5a7   : > { %3031 = vmatpush.msrb.mxu0 %v2974_v46  ;;  %3048 = vmatpush.msrb.mxu1 %v2993_v31 }
 0x5a8   : > { %3121 = vmatpush.msra.mxu2 %v3064_v33  ;;  %3138 = vmatpush.msra.mxu3 %v3083_v26 }
 0x5a9   : > { %3032 = vmatpush.msrb.mxu0 %v2973_v53  ;;  %3049 = vmatpush.msrb.mxu1 %v2992_v15 }
 0x5aa   : > { %3122 = vmatpush.msra.mxu2 %v3063_v2  ;;  %3139 = vmatpush.msra.mxu3 %v3082_v17 }
 0x5ab   : > { %3033 = vmatpush.msrb.mxu0 %v2972_v13  ;;  %3050 = vmatpush.msrb.mxu1 %v2991_v54 }
 0x5ac   : > { %3123 = vmatpush.msra.mxu2 %v3062_v29  ;;  %3140 = vmatpush.msra.mxu3 %v3081_v21 }
 0x5ad   : > { %3034 = vmatpush.msrb.mxu0 %v2971_v55  ;;  %3051 = vmatpush.msrb.mxu1 %v2990_v28 }
 0x5ae   : > { %3124 = vmatpush.msra.mxu2 %v3061_v59  ;;  %3141 = vmatpush.msra.mxu3 %v3080_v44  ;;  %v3924_v44 = vld [vmem:[%s5411_s21] ss:$0 sm:$0xff] }
 0x5af   : > { %3035 = vmatmul.f32.vlgmr.msrb.gmra.mxu0 %v5139_v7  ;;  %3125 = vmatmul.f32.vlgmr.msra.gmra.mxu2 %v5147_v51  ;;  %v3166_v7 = vld [vmem:[%s5409_s19 + $0x78] sm:$0xff]  ;;  %v3165_v51 = vld [vmem:[%s5409_s19 + $0x70] sm:$0xff] }
 0x5b0   : > { %3052 = vmatpush.msrb.mxu1 %v2989_v45  ;;  %3142 = vmatpush.msra.mxu3 %v3079_v47 }
 0x5b1   : > { %3171 = vmatpush.msra.mxu0 %v3166_v7  ;;  %3280 = vmatpush.msrb.mxu2 %v3196_v38 }
 0x5b2   : > { %3053 = vmatpush.msrb.mxu1 %v2988_v62  ;;  %3143 = vmatpush.msra.mxu3 %v3078_v39 }
 0x5b3   : > { %3172 = vmatpush.msra.mxu0 %v3165_v51  ;;  %3281 = vmatpush.msrb.mxu2 %v3195_v20 }
 0x5b4   : > { %3054 = vmatpush.msrb.mxu1 %v2987_v8  ;;  %3144 = vmatpush.msra.mxu3 %v3077_v60  ;;  %v3925_v60 = vld [vmem:[%s887_s29] ss:$0 sm:$0xff]  ;;  %s4043_s29 = sshra.s32 %s3561_s6, 4  ;;  %s4044_s29 = int_to_ptr.hbm [resolvable:$true] %s4043_s29 }
 0x5b5   : > { %3055 = vmatmul.f32.vlgmr.msrb.gmra.mxu1 %v5162_v50  ;;  %3145 = vmatmul.f32.vlgmr.msra.gmra.mxu3 %v5168_v12  ;;  %v3163_v50 = vld [vmem:[%s5409_s19 + $0x60] sm:$0xff]  ;;  %v3162_v12 = vld [vmem:[%s5409_s19 + $0x58] sm:$0xff]  ;;  %s4045_s30 = scalar_lea.hbm %s4044_s29, 1  ;;  %p4050_p3 = scmp.lt.s32.totalorder %s4044_s29, %s5415_s25 }
 0x5b6   : > { %3173 = vmatpush.msra.mxu0 %v3164_v37  ;;  %3212 = vmatpush.msra.mxu1 %v3196_v38  ;;  %p4046_p0 = scmp.ne.s32.totalorder %s4044_s29, %s4045_s30  ;;  %p4051_p4 = scmp.lt.s32.totalorder %s4049_s11, %s4045_s30 }
 0x5b7   : > { %3350 = vmatpush.msrb.mxu3 %v3196_v38  ;;  %3282 = vmatpush.msrb.mxu2 %v3194_v35 }
 0x5b8   : > { %3174 = vmatpush.msra.mxu0 %v3163_v50  ;;  %3213 = vmatpush.msra.mxu1 %v3195_v20  ;;  %p4047_p1 = pnand %p4046_p0, %p4347_p5  ;;  %p4052_p7 = por %p4051_p4, %p4050_p3 }
 0x5b9   : > { %3351 = vmatpush.msrb.mxu3 %v3195_v20  ;;  %3283 = vmatpush.msrb.mxu2 %v3193_v63 }
 0x5ba   : > { %3175 = vmatpush.msra.mxu0 %v3162_v12  ;;  %3214 = vmatpush.msra.mxu1 %v3194_v35  ;;  %p4048_p2 = pneg %p4047_p1 }
 0x5bb   : > { %3352 = vmatpush.msrb.mxu3 %v3194_v35 }
 0x5bc   : > { %3176 = vmatpush.msra.mxu0 %v3161_v22  ;;  %3215 = vmatpush.msra.mxu1 %v3193_v63  ;;  %p4053_p8 = pnand %p4052_p7, %p4048_p2 }
 0x5bd   : > { %3821 = vmatmul.msk.f32.vlgmr.msra.gmra.mxu1 %vm927_vm3, %v3191_v36  ;;  %3353 = vmatpush.msrb.mxu3 %v3193_v63 }
 0x5be   : > { %3177 = vmatpush.msra.mxu0 %v3160_v23  ;;  %3420 = vmatpush.msrb.mxu1 %v3196_v38 }
 0x5c0   : > { %3178 = vmatpush.msra.mxu0 %v3159_v49  ;;  %3421 = vmatpush.msrb.mxu1 %v3195_v20 }
 0x5c2   : > { %3179 = vmatpush.msra.mxu0 %v3158_v34  ;;  %3422 = vmatpush.msrb.mxu1 %v3194_v35 }
 0x5c4   : > { %3180 = vmatpush.msra.mxu0 %v3157_v3  ;;  %3423 = vmatpush.msrb.mxu1 %v3193_v63 }
 0x5c6   : > { %3181 = vmatpush.msra.mxu0 %v3156_v30 }
 0x5c8   : > { %3182 = vmatpush.msra.mxu0 %v3155_v57 }
 0x5ca   : > { %3183 = vmatpush.msra.mxu0 %v3154_v41 }
 0x5cc   : > { %3184 = vmatpush.msra.mxu0 %v3153_v25 }
 0x5ce   : > { %3185 = vmatpush.msra.mxu0 %v3152_v5 }
 0x5d0   : > { %3186 = vmatpush.msra.mxu0 %v3151_v58 }
 0x5e7   : > { %v2502_v9 = vpop.f32.mrf.mxu0 }
 0x5ed   : > { %v2522_v1 = vpop.f32.mrf.mxu1  ;;  %v2590_v6 = vpop.f32.mrf.mxu2 }
 0x5ee   : > { %v2523_v42 = vadd.f32 %v2522_v1, %v2502_v9 }
 0x5f0   : > { %v2678_v10 = vpop.f32.mrf.mxu0  ;;  %v2525_v40 = vadd.f32 %v2523_v42, %v2429_v32 }
 0x5f3   : > { %v2610_v61 = vpop.f32.mrf.mxu3 }
 0x5f4   : > { %v2611_v56 = vadd.f32 %v2610_v61, %v2590_v6 }
 0x5f6   : > { %v2766_v0 = vpop.f32.mrf.mxu2  ;;  %v2613_v4 = vadd.f32 %v2611_v56, %v2525_v40 }
 0x5f7   : > { %v2698_v48 = vpop.f32.mrf.mxu1 }
 0x5f8   : > { %v2699_v52 = vadd.f32 %v2698_v48, %v2678_v10 }
 0x5fa   : > { %v2701_v46 = vadd.f32 %v2699_v52, %v2613_v4 }
 0x5fd   : > { %v2786_v11 = vpop.f32.mrf.mxu3 }
 0x5fe   : > { %v2787_v19 = vadd.f32 %v2786_v11, %v2766_v0 }
 0x600   : > { %v2789_v26 = vadd.f32 %v2787_v19, %v2701_v46 }
 0x60a   : > { %v2856_v24 = vpop.f32.mrf.mxu0 }
 0x610   : > { %v2946_v18 = vpop.f32.mrf.mxu2 }
 0x611   : > { %v2876_v14 = vpop.f32.mrf.mxu1 }
 0x612   : > { %v2877_v31 = vadd.f32 %v2876_v14, %v2856_v24 }
 0x614   : > { %v2879_v2 = vadd.f32 %v2877_v31, %v2789_v26 }
 0x617   : > { %v2966_v27 = vpop.f32.mrf.mxu3 }
 0x618   : > { %v2967_v53 = vadd.f32 %v2966_v27, %v2946_v18 }
 0x61a   : > { %v2969_v13 = vadd.f32 %v2967_v53, %v2879_v2 }
 0x62c   : > { %v3036_v15 = vpop.f32.mrf.mxu0 }
 0x632   : > { %v3056_v33 = vpop.f32.mrf.mxu1  ;;  %v3126_v54 = vpop.f32.mrf.mxu2 }
 0x633   : > { %v3057_v17 = vadd.f32 %v3056_v33, %v3036_v15 }
 0x635   : > { %v3059_v21 = vadd.f32 %v3057_v17, %v2969_v13 }
 0x638   : > { %v3146_v29 = vpop.f32.mrf.mxu3 }
 0x639   : > { %v3147_v55 = vadd.f32 %v3146_v29, %v3126_v54 }
 0x63a   : > { %v3217_v47 = vpop.f32.mrf.mxu1 }
 0x63b   : > { %v3149_v28 = vadd.f32 %v3147_v55, %v3059_v21 }
 0x63d   : > { %v3150_v59 = vmax.f32 %v3149_v28, 0.0 }
 0x63f   : > { %3187 = vmatmul.f32.vlgmr.msra.gmra.mxu0 %v3150_v59 }
 0x6bc   : > { %v3188_v45 = vpop.f32.mrf.mxu0 }
 0x6bd   : > { %v5266_v62 = vadd.f32 %v3924_v44, %v3188_v45 }
 0x6bf   : > { %v3220_v39 = vadd.f32 %v3217_v47, %v5266_v62 }
 0x6c1   : > { %3937 = vtanh.f32 %v3220_v39  ;;  %v3822_v7 = vmul.f32 -1.442695, %v3220_v39 }
 0x6c3   : > { %3939 = vpow2.f32 %v3822_v7 }
 0x6c7   : > { %v3938_v8 = vpop.eup %3937 }
 0x6c8   : > { %3248 = vrot.lane.b32.xlu2 %v3938_v8, %s4169_s4 }
 0x6c9   : > { %v3940_v51 = vpop.eup %3939 }
 0x6ca   : > { %v3224_v37 = vadd.f32 1.0, %v3940_v51 }
 0x6cc   : > { %3941 = vrcp.f32 %v3224_v37  ;;  %v3236_v34 = vand.u32 2147483648, %v3224_v37  ;;  %vm3230_vm15 = vweird.f32 %v3224_v37  ;;  %v3234_v3 = vand.u32 2147483647, %v3224_v37 }
 0x6ce   : > { %v3237_v43 = vor.u32 1.1754944e-38, %v3236_v34  ;;  %vm3235_vm1 = vcmp.eq.f32.partialorder %v3234_v3, 8.507059e+37 }
 0x6d0   : > { %3243 = vrot.lane.b32.xlu2 %v3925_v60, %s4170_s0 }
 0x6d2   : > { %v3942_v50 = vpop.eup %3941 }
 0x6d3   : > { %v3226_v12 = vmul.f32 %v3942_v50, %v3224_v37  ;;  %vm3231_vm14 = vweird.f32 %v3942_v50 }
 0x6d4   : > { %vm3232_vm0 = vmor %vm3230_vm15, %vm3231_vm14 }
 0x6d5   : > { %v3227_v22 = vsub.f32 1.0, %v3226_v12 }
 0x6d7   : > { %v3228_v23 = vmul.f32 %v3942_v50, %v3227_v22 }
 0x6d9   : > { %v3229_v49 = vadd.f32 %v3942_v50, %v3228_v23 }
 0x6db   : > { %v3233_v30 = vsel %vm3232_vm0, %v3942_v50, %v3229_v49 }
 0x6dc   : > { %v3238_v1 = vsel %vm3235_vm1, %v3237_v43, %v3233_v30  ;;  %vm3476_vm1 = vcmask 1042432  }
 0x722   : > { %v3249_v57 = vpop.permute.xlu2 %3248 }
 0x723   : > { %v3251_v9 = vmul.f32 %v3249_v57, %v3238_v1 }
 0x725   : > { %3253 = vrot.lane.b32.xlu0 %v3251_v9, %s4170_s0 }
 0x72a   : > { %v3244_v41 = vpop.permute.xlu2 %3243 }
 0x72b   : > { %v3246_v25 = vmul.f32 %v3244_v41, %v3238_v1 }
 0x797   : > { %v3254_v38 = vpop.permute.xlu0 %3253 }
 0x798   : > { %v3256_v6 = vadd.f32 %v3254_v38, %v3246_v25 }
 0x79a   : > { %3943 = vtanh.f32 %v3256_v6  ;;  %v3313_v46 = vrot.slane %v3256_v6, 7 }
 0x7a0   : > { %v3944_v61 = vpop.eup %3943 }
 0x7a1   : > { %3259 = vrot.lane.b32.xlu1 %v3944_v61, %s4169_s4 }
 0x813   : > { %v3260_v20 = vpop.permute.xlu1 %3259 }
 0x814   : > { %v5273_v5 = vmul.f32 %v3260_v20, %v3238_v1 }
 0x816   : > { %3264 = vrot.lane.b32.xlu2 %v5273_v5, %s4170_s0 }
 0x870   : > { %v3265_v35 = vpop.permute.xlu2 %3264 }
 0x871   : > { %3823 = vmatmul.msk.f32.vlgmr.msrb.gmra.mxu2 %vm927_vm3, %v3265_v35 }
 0x8f4   : > { %v3285_v58 = vpop.f32.mrf.mxu2 }
 0x8f5   : > { %v3289_v63 = vrot.slane %v3285_v58, 7 }
 0x8f7   : > { %v3291_v48 = vadd.f32 %v3289_v63, %v5266_v62 }
 0x8f9   : > { %3945 = vtanh.f32 %v3291_v48  ;;  %v3824_v10 = vmul.f32 -1.442695, %v3291_v48 }
 0x8fb   : > { %3947 = vpow2.f32 %v3824_v10 }
 0x8ff   : > { %v3946_v36 = vpop.eup %3945 }
 0x900   : > { %3317 = vrot.lane.b32.xlu2 %v3946_v36, %s4169_s4 }
 0x901   : > { %v3948_v16 = vpop.eup %3947 }
 0x902   : > { %v3295_v42 = vadd.f32 1.0, %v3948_v16 }
 0x904   : > { %3949 = vrcp.f32 %v3295_v42  ;;  %v3307_v40 = vand.u32 2147483648, %v3295_v42  ;;  %vm3301_vm4 = vweird.f32 %v3295_v42  ;;  %v3305_v24 = vand.u32 2147483647, %v3295_v42 }
 0x906   : > { %v3308_v52 = vor.u32 1.1754944e-38, %v3307_v40  ;;  %vm3306_vm6 = vcmp.eq.f32.partialorder %v3305_v24, 8.507059e+37 }
 0x90a   : > { %v3950_v0 = vpop.eup %3949 }
 0x90b   : > { %v3297_v11 = vmul.f32 %v3950_v0, %v3295_v42  ;;  %vm3302_vm2 = vweird.f32 %v3950_v0 }
 0x90c   : > { %vm3303_vm5 = vmor %vm3301_vm4, %vm3302_vm2  ;;  %vm3517_vm2 = vcmask 257027  }
 0x90d   : > { %v3298_v32 = vsub.f32 1.0, %v3297_v11 }
 0x90f   : > { %v3299_v56 = vmul.f32 %v3950_v0, %v3298_v32 }
 0x911   : > { %v3300_v14 = vadd.f32 %v3950_v0, %v3299_v56 }
 0x913   : > { %v3304_v4 = vsel %vm3303_vm5, %v3950_v0, %v3300_v14 }
 0x914   : > { %v3309_v18 = vsel %vm3306_vm6, %v3308_v52, %v3304_v4 }
 0x915   : > { %v3315_v31 = vmul.f32 %v3313_v46, %v3309_v18 }
 0x95a   : > { %v3318_v19 = vpop.permute.xlu2 %3317 }
 0x95b   : > { %v3320_v27 = vmul.f32 %v3318_v19, %v3309_v18 }
 0x95d   : > { %3322 = vrot.lane.b32.xlu2 %v3320_v27, %s4170_s0 }
 0x9b7   : > { %v3323_v33 = vpop.permute.xlu2 %3322 }
 0x9b8   : > { %v3325_v26 = vadd.f32 %v3323_v33, %v3315_v31 }
 0x9ba   : > { %3951 = vtanh.f32 %v3325_v26  ;;  %v3383_v49 = vrot.slane %v3325_v26, 7  ;;  %v3481_v26 = vld [vmem:[%s5412_s22 + $0x18] sm:$0xff] }
 0x9bb   : > { %3503 = vmatpush.msra.mxu2 %v3481_v26 }
 0x9c0   : > { %v3952_v53 = vpop.eup %3951 }
 0x9c1   : > { %3328 = vrot.lane.b32.xlu0 %v3952_v53, %s4169_s4  ;;  %v3480_v53 = vld [vmem:[%s5412_s22 + $0x10] sm:$0xff] }
 0x9c2   : > { %3504 = vmatpush.msra.mxu2 %v3480_v53 }
 0xa33   : > { %v3329_v15 = vpop.permute.xlu0 %3328 }
 0xa34   : > { %v3331_v2 = vmul.f32 %v3329_v15, %v3309_v18  ;;  %v3479_v15 = vld [vmem:[%s5412_s22 + $0x8] sm:$0xff] }
 0xa35   : > { %3505 = vmatpush.msra.mxu2 %v3479_v15 }
 0xa36   : > { %v3333_v17 = vrot.slane %v3331_v2, 1  ;;  %v3473_v9 = vsel %vm3472_vm11, %v5273_v5, %v3331_v2  ;;  %v3478_v2 = vld [vmem:[%s5412_s22] sm:$0xff] }
 0xa37   : > { %3506 = vmatpush.msra.mxu2 %v3478_v2 }
 0xa38   : > { %3334 = vrot.lane.b32.xlu2 %v3333_v17, %s4170_s0 }
 0xa92   : > { %v3335_v13 = vpop.permute.xlu2 %3334 }
 0xa93   : > { %3825 = vmatmul.msk.f32.vlgmr.msrb.gmra.mxu3 %vm927_vm3, %v3335_v13 }
 0xb16   : > { %v3355_v54 = vpop.f32.mrf.mxu3 }
 0xb17   : > { %v3359_v29 = vrot.slane %v3355_v54, 6 }
 0xb19   : > { %v3361_v21 = vadd.f32 %v3359_v29, %v5266_v62 }
 0xb1b   : > { %3953 = vtanh.f32 %v3361_v21  ;;  %v3826_v28 = vmul.f32 -1.442695, %v3361_v21 }
 0xb1d   : > { %3955 = vpow2.f32 %v3826_v28 }
 0xb21   : > { %v3954_v55 = vpop.eup %3953 }
 0xb22   : > { %3387 = vrot.lane.b32.xlu1 %v3954_v55, %s4169_s4 }
 0xb23   : > { %v3956_v59 = vpop.eup %3955 }
 0xb24   : > { %v3365_v44 = vadd.f32 1.0, %v3956_v59 }
 0xb26   : > { %3957 = vrcp.f32 %v3365_v44  ;;  %v3377_v7 = vand.u32 2147483648, %v3365_v44  ;;  %vm3371_vm8 = vweird.f32 %v3365_v44  ;;  %v3375_v51 = vand.u32 2147483647, %v3365_v44 }
 0xb28   : > { %v3378_v50 = vor.u32 1.1754944e-38, %v3377_v7  ;;  %vm3376_vm10 = vcmp.eq.f32.partialorder %v3375_v51, 8.507059e+37 }
 0xb2c   : > { %v3958_v45 = vpop.eup %3957 }
 0xb2d   : > { %v3367_v47 = vmul.f32 %v3958_v45, %v3365_v44  ;;  %vm3372_vm7 = vweird.f32 %v3958_v45 }
 0xb2e   : > { %vm3373_vm9 = vmor %vm3371_vm8, %vm3372_vm7 }
 0xb2f   : > { %v3368_v39 = vsub.f32 1.0, %v3367_v47 }
 0xb31   : > { %v3369_v8 = vmul.f32 %v3958_v45, %v3368_v39 }
 0xb33   : > { %v3370_v60 = vadd.f32 %v3958_v45, %v3369_v8 }
 0xb35   : > { %v3374_v37 = vsel %vm3373_vm9, %v3958_v45, %v3370_v60 }
 0xb36   : > { %v3379_v22 = vsel %vm3376_vm10, %v3378_v50, %v3374_v37 }
 0xb37   : > { %v3385_v34 = vmul.f32 %v3383_v49, %v3379_v22 }
 0xb94   : > { %v3388_v12 = vpop.permute.xlu1 %3387 }
 0xb95   : > { %v3390_v23 = vmul.f32 %v3388_v12, %v3379_v22 }
 0xb97   : > { %3392 = vrot.lane.b32.xlu0 %v3390_v23, %s4170_s0 }
 0xc09   : > { %v3393_v3 = vpop.permute.xlu0 %3392 }
 0xc0a   : > { %v3395_v30 = vadd.f32 %v3393_v3, %v3385_v34 }
 0xc0c   : > { %3959 = vtanh.f32 %v3395_v30  ;;  %v3453_v24 = vrot.slane %v3395_v30, 7 }
 0xc12   : > { %v3960_v43 = vpop.eup %3959 }
 0xc13   : > { %3398 = vrot.lane.b32.xlu2 %v3960_v43, %s4169_s4 }
 0xc6d   : > { %v3399_v57 = vpop.permute.xlu2 %3398 }
 0xc6e   : > { %v3401_v1 = vmul.f32 %v3399_v57, %v3379_v22 }
 0xc70   : > { %v3403_v41 = vrot.slane %v3401_v1, 2  ;;  %v3475_v25 = vsel %vm3474_vm12, %v3473_v9, %v3401_v1 }
 0xc72   : > { %3404 = vrot.lane.b32.xlu1 %v3403_v41, %s4170_s0 }
 0xce4   : > { %v3405_v38 = vpop.permute.xlu1 %3404 }
 0xce5   : > { %3827 = vmatmul.msk.f32.vlgmr.msrb.gmra.mxu1 %vm927_vm3, %v3405_v38 }
 0xd62   : > { %v3425_v6 = vpop.f32.mrf.mxu1 }
 0xd63   : > { %v3429_v61 = vrot.slane %v3425_v6, 5 }
 0xd65   : > { %v3431_v20 = vadd.f32 %v3429_v61, %v5266_v62 }
 0xd67   : > { %3961 = vtanh.f32 %v3431_v20  ;;  %v3828_v58 = vmul.f32 -1.442695, %v3431_v20 }
 0xd69   : > { %3963 = vpow2.f32 %v3828_v58 }
 0xd6d   : > { %v3962_v35 = vpop.eup %3961 }
 0xd6e   : > { %3457 = vrot.lane.b32.xlu0 %v3962_v35, %s4169_s4 }
 0xd6f   : > { %v3964_v63 = vpop.eup %3963 }
 0xd70   : > { %v3435_v48 = vadd.f32 1.0, %v3964_v63 }
 0xd72   : > { %3965 = vrcp.f32 %v3435_v48  ;;  %v3447_v0 = vand.u32 2147483648, %v3435_v48  ;;  %vm3441_vm14 = vweird.f32 %v3435_v48  ;;  %v3445_v11 = vand.u32 2147483647, %v3435_v48 }
 0xd74   : > { %v3448_v32 = vor.u32 1.1754944e-38, %v3447_v0  ;;  %vm3446_vm0 = vcmp.eq.f32.partialorder %v3445_v11, 8.507059e+37 }
 0xd78   : > { %v3966_v5 = vpop.eup %3965 }
 0xd79   : > { %v3437_v36 = vmul.f32 %v3966_v5, %v3435_v48  ;;  %vm3442_vm13 = vweird.f32 %v3966_v5 }
 0xd7a   : > { %vm3443_vm15 = vmor %vm3441_vm14, %vm3442_vm13 }
 0xd7b   : > { %v3438_v10 = vsub.f32 1.0, %v3437_v36 }
 0xd7d   : > { %v3439_v16 = vmul.f32 %v3966_v5, %v3438_v10 }
 0xd7f   : > { %v3440_v42 = vadd.f32 %v3966_v5, %v3439_v16 }
 0xd81   : > { %v3444_v62 = vsel %vm3443_vm15, %v3966_v5, %v3440_v42 }
 0xd82   : > { %v3449_v14 = vsel %vm3446_vm0, %v3448_v32, %v3444_v62 }
 0xd83   : > { %v3455_v4 = vmul.f32 %v3453_v24, %v3449_v14 }
 0xde0   : > { %v3458_v56 = vpop.permute.xlu0 %3457 }
 0xde1   : > { %v3460_v40 = vmul.f32 %v3458_v56, %v3449_v14 }
 0xde3   : > { %3462 = vrot.lane.b32.xlu2 %v3460_v40, %s4170_s0 }
 0xe3d   : > { %v3463_v52 = vpop.permute.xlu2 %3462 }
 0xe3e   : > { %v3465_v19 = vadd.f32 %v3463_v52, %v3455_v4 }
 0xe40   : > { %3967 = vtanh.f32 %v3465_v19 }
 0xe46   : > { %v3968_v18 = vpop.eup %3967 }
 0xe47   : > { %3468 = vrot.lane.b32.xlu1 %v3968_v18, %s4169_s4  ;;  %s865_s4 = scalar_lea.vmem [#allocation9], %s5297_s1 }
 0xe48   : > { %s3558_s10 = sshll.u32 %s865_s4, 4  ;;  %s3559_s10 = int_to_ptr.vmem [resolvable:$true] %s3558_s10 }
 0xe4f   : > { %3520 = vrot.lane.b32.xlu1 %v3465_v19, %s4171_s23 }
 0xeb9   : > { %v3469_v27 = vpop.permute.xlu1 %3468 }
 0xeba   : > { %v3471_v46 = vmul.f32 %v3469_v27, %v3449_v14 }
 0xebc   : > { %3514 = vrot.lane.b32.xlu2 %v3471_v46, %s4170_s0  ;;  %v3477_v31 = vsel %vm3476_vm1, %v3475_v25, %v3471_v46 }
 0xebd   : > { %3487 = vrot.lane.b32.xlu0 %v3477_v31, %s4170_s0  ;;  %s3529_s0 = sand.u32 1, %s4328_s8  }
 0xebe   : > { %s5322_s28 = scalar_lea.sflag [#allocation10], %s3529_s0 }
 0xec1   : > { %v3521_v33 = vpop.permute.xlu1 %3520 }
 0xec2   : > { %3523 = vst.msk [vmem:[%s5431_s9 - $0x3] sm:$0x8] %vm3517_vm2, %v3521_v33 }
 0xf16   : > { %v3515_v17 = vpop.permute.xlu2 %3514 }
 0xf17   : > { %3518 = vst.msk [vmem:[%s865_s4 - $0x3] sm:$0x8] %vm3517_vm2, %v3515_v17 }
 0xf2f   : > { %v3488_v13 = vpop.permute.xlu0 %3487 }
 0xf30   : > { %3829 = vmatmul.msk.f32.vlgmr.msra.gmra.mxu2 %vm927_vm3, %v3488_v13 }
 0xf31   : > { %4056 = shalt.err (!%p4053_p8)
}
 0xf32   : > { %3849 = dma.vmem_to_hbm [thread:$0]  (%p4347_p5), %s3559_s10, 16, %s3561_s6, %s5322_s28  }
 0xf33   : > { %s5471_s4 = scalar_lea.vmem [#allocation11], %s5297_s1  ;;  %s3569_s27 = scalar_lea.hbm %s5416_s26, %s4328_s8 }
 0xf34   : > { %s3571_s0 = sshll.u32 %s5471_s4, 4  ;;  %s3573_s12 = sshll.u32 %s3569_s27, 4  ;;  %s3572_s0 = int_to_ptr.vmem [resolvable:$true] %s3571_s0  ;;  %s3574_s12 = int_to_ptr.hbm [resolvable:$true] %s3573_s12 }
 0xf35   : > { %s4071_s11 = sshra.s32 %s3574_s12, 4  ;;  %s4077_s10 = scalar_lea.hbm %s5416_s26, 2  ;;  %s4072_s11 = int_to_ptr.hbm [resolvable:$true] %s4071_s11 }
 0xf36   : > { %s4073_s29 = scalar_lea.hbm %s4072_s11, 1  ;;  %p4078_p12 = scmp.lt.s32.totalorder %s4072_s11, %s5416_s26 }
 0xf37   : > { %p4074_p9 = scmp.ne.s32.totalorder %s4072_s11, %s4073_s29  ;;  %p4079_p13 = scmp.lt.s32.totalorder %s4077_s10, %s4073_s29 }
 0xf39   : > { %p4075_p10 = pnand %p4074_p9, %p4347_p5  ;;  %p4080_p0 = por %p4079_p13, %p4078_p12 }
 0xf3b   : > { %p4076_p11 = pneg %p4075_p10 }
 0xf3d   : > { %p4081_p1 = pnand %p4080_p0, %p4076_p11 }
 0xf3f   : > { %4084 = shalt.err (!%p4081_p1)
}
 0xf40   : > { %3850 = dma.vmem_to_hbm [thread:$0]  (%p4347_p5), %s3572_s0, 16, %s3574_s12, %s5322_s28   ;;  %vm3511_vm3 = vcmask 44032  }
 0xf41   : > { %s3746_s4 = sshll.u32 %s5297_s1, 2  ;;  %s3831_s7 = sshll.u32 %s4328_s8, 2 }
 0xf42   : > { %s3543_s30 = scalar_lea.hbm %s5414_s24, %s3831_s7  ;;  %s5472_s11 = sld [smem:[#allocation35_spill]] }
 0xf43   : > { %s859_s29 = scalar_lea.vmem [#allocation8], %s3746_s4  ;;  %s3547_s23 = sshll.u32 %s3543_s30, 4  ;;  %s3548_s23 = int_to_ptr.hbm [resolvable:$true] %s3547_s23 }
 0xf44   : > { %s3545_s10 = sshll.u32 %s859_s29, 4  ;;  %s3525_s28 = scalar_lea.sflag [#allocation5], %s5297_s1  ;;  %s3546_s10 = int_to_ptr.vmem [resolvable:$true] %s3545_s10 }
 0xf45   : > { %s4099_s8 = sshra.s32 %s3548_s23, 4  ;;  %s4105_s4 = scalar_lea.hbm %s5414_s24, 8  ;;  %s4100_s8 = int_to_ptr.hbm [resolvable:$true] %s4099_s8 }
 0xf46   : > { %s4101_s0 = scalar_lea.hbm %s4100_s8, 4  ;;  %p4106_p7 = scmp.lt.s32.totalorder %s4100_s8, %s5414_s24 }
 0xf47   : > { %p4102_p2 = scmp.ne.s32.totalorder %s4100_s8, %s4101_s0  ;;  %p4107_p8 = scmp.lt.s32.totalorder %s4105_s4, %s4101_s0 }
 0xf48   : > { %v3926_v54 = vld [vmem:[%s5472_s11] ss:$0 sm:$0xff] }
 0xf49   : > { %p4103_p3 = pnand %p4102_p2, %p4347_p5  ;;  %p4108_p9 = por %p4107_p8, %p4106_p7 }
 0xf4b   : > { %p4104_p4 = pneg %p4103_p3 }
 0xf4d   : > { %p4109_p10 = pnand %p4108_p9, %p4104_p4 }
 0xfb3   : > { %v3508_v29 = vpop.f32.mrf.mxu2 }
 0xfb4   : > { %v3509_v21 = vadd.f32 %v3926_v54, %v3508_v29 }
 0xfb6   : > { %3512 = vst.msk [vmem:[%s859_s29] sm:$0xf] %vm3511_vm3, %v3509_v21 }
 0xfb7   : > { %4112 = shalt.err (!%p4109_p10)
}
 0xfb8   : > { %3848 = dma.vmem_to_hbm [thread:$0]  (%p4347_p5), %s3546_s10, 64, %s3548_s23, %s3525_s28  }
 0xfb9 PF: > { %s5473_s1 = sld [smem:[#allocation18_spill]] }
 0xfba   : > { %s5474_s30 = sld [smem:[#allocation16_spill]] }
 0xfbf   : > { %p3875_p11 = scmp.ge.s32.totalorder %s5473_s1, 2 }
 0xfc0   : > { %s3585_s6 = sand.u32 1, %s5474_s30  }
 0xfc1   : > { %p3862_p12 = pnand %p3875_p11, %p4351_p6  ;;  %s3586_s11 = scalar_lea.sflag [#allocation5], %s3585_s6 }
 0xfc3   : > { %p3863_p13 = pneg %p3862_p12 }
 0xfc5   : > { %4138 = dma.done.wait (%p3863_p13), %s3586_s11, 64  }
 0xfc6   : > { %4140 = vsyncadd (%p3863_p13), %s3586_s11, 4294967232  ;;  %s5476_s29 = sadd.s32 4294967294, %s5473_s1  }
 0xfc7   : > { %s3595_s8 = sand.u32 1, %s5476_s29  }
 0xfc8   : > { %s3596_s0 = scalar_lea.sflag [#allocation10], %s3595_s8 }
 0xfc9   : > { %4142 = dma.done.wait (%p3863_p13), %s3596_s0, 32  }
 0xfca   : > { %4144 = vsyncadd (%p3863_p13), %s3596_s0, 4294967264  ;;  %s5477_s28 = sld [smem:[#allocation19_spill]]  ;;  %s5480_s27 = smov %s4151_s3 }
 0xfcb   : > { %s5478_s2 = sld [smem:[#allocation17_spill]] }
 0xfcc   : > { %s5479_s7 = sld [smem:[#allocation20_spill]] }
 0xfd0   : > { %p42_p5 = scmp.ge.s32.totalorder %s5477_s28, 4  }
 0xfd1   : > { %s5481_s3 = smov %s5478_s2 }
 0xfd2   :  { %44 = sbr.rel (!%p42_p5) target bundleno = 22 (0x16), region = 219 }
 0xfd7   :  { %3610 = vsyncpa [#allocation4], 1 }
 0xfd8   :  { %3612 = vsyncpa [#allocation4 + $0x1], 1 }
 0xfd9   :  { %3613 = vsyncpa [#allocation7], 1 }
 0xfda   :  { %3614 = vsyncpa [#allocation5], 1 }
 0xfdb   :  { %3616 = vsyncpa [#allocation5 + $0x1], 1 }
 0xfdc   :  { %3617 = vsyncpa [#allocation10], 1 }
 0xfdd   :  { %3619 = vsyncpa [#allocation10 + $0x1], 1 }

</bundles_post_ra>
